<compile_context>
chip_gen: v7x
topology: tpu7x:2x2x1
jax: 0.10.0
libtpu: 0.0.40
codegen_flags: <defaults>
</compile_context>

<pallas_src>
import functools

import jax
import jax.numpy as jnp
import numpy as np
from jax.experimental import pallas as pl
from jax.experimental.pallas import tpu as pltpu

OUT_PER_BRANCH = 100      # ChebConv output channels per scale
PAD_PER_BRANCH = 128      # lane-dense slab width per scale
OUT_PAD = 3 * PAD_PER_BRANCH  # 384


def _round_up(x, m):
    return ((x + m - 1) // m) * m


# TODO(synk): the scatter-based graph normalization (ChebConv.__norm__) has no
# clean Pallas equivalent; it runs in plain JAX and produces a dense L_hat.
def build_scaled_laplacian(edge_index, edge_weight, num_nodes):
    """Dense L_hat = -D^{-1/2} A D^{-1/2}  (sym normalization, lambda_max=2)."""
    row, col = edge_index[0], edge_index[1]
    w = jnp.where(row != col, edge_weight.astype(jnp.float32), 0.0)  # drop self loops
    a = jnp.zeros((num_nodes, num_nodes), jnp.float32).at[row, col].add(w)
    deg = a.sum(axis=1)
    dinv = jnp.where(deg > 0.0, jax.lax.rsqrt(deg), 0.0)
    return -(dinv[:, None] * a * dinv[None, :])


# --------------------------- Pallas kernels --------------------------------


def _z1_kernel(l_ref, x_ref, z1_ref, acc_ref):
    """Z1 = L_hat @ x, tiled over (row tile i, contraction tile k)."""
    k = pl.program_id(1)

    @pl.when(k == 0)
    def _():
        acc_ref[...] = jnp.zeros_like(acc_ref)

    acc_ref[...] += jnp.dot(l_ref[...], x_ref[...],
                            preferred_element_type=jnp.float32)

    @pl.when(k == pl.num_programs(1) - 1)
    def _():
        z1_ref[...] = acc_ref[...].astype(z1_ref.dtype)


def _proj_kernel(l_ref, z1c_ref, x_ref, z1r_ref, wx_ref, wz1_ref, wz2_ref,
                 b_ref, out_ref, acc_ref):
    """acc = L_hat @ Z1; finalize: Z2 = 2*acc - x, then the three fused
    projections + bias written into one lane-dense [tm, 384] slab."""
    k = pl.program_id(1)

    @pl.when(k == 0)
    def _():
        acc_ref[...] = jnp.zeros_like(acc_ref)

    acc_ref[...] += jnp.dot(l_ref[...], z1c_ref[...],
                            preferred_element_type=jnp.float32)

    @pl.when(k == pl.num_programs(1) - 1)
    def _():
        z2 = 2.0 * acc_ref[...] - x_ref[...].astype(jnp.float32)
        out = jnp.dot(x_ref[...], wx_ref[...],
                      preferred_element_type=jnp.float32)      # T0 = x term
        out += jnp.dot(z1r_ref[...], wz1_ref[...],
                       preferred_element_type=jnp.float32)     # T1 = Z1 term
        out += jnp.dot(z2.astype(wz2_ref.dtype), wz2_ref[...],
                       preferred_element_type=jnp.float32)     # T2 = Z2 term
        out += b_ref[...]                                      # fused bias
        out_ref[...] = out.astype(out_ref.dtype)


@functools.partial(jax.jit, static_argnames=("tm", "tk"))
def _multichev_b_padded(l_hat, x, wx, wz1, wz2, bias, *, tm, tk):
    npad, f_in = x.shape
    grid = (npad // tm, npad // tk)
    cparams = pltpu.CompilerParams(
        dimension_semantics=("parallel", "arbitrary"))

    # Pass 1: Z1 = L_hat @ x   (bf16 inputs, f32 accumulation)
    z1 = pl.pallas_call(
        _z1_kernel,
        out_shape=jax.ShapeDtypeStruct((npad, f_in), jnp.bfloat16),
        grid_spec=pltpu.PrefetchScalarGridSpec(
            num_scalar_prefetch=0,
            grid=grid,
            in_specs=[
                pl.BlockSpec((tm, tk), lambda i, k: (i, k)),     # L_hat tile
                pl.BlockSpec((tk, f_in), lambda i, k: (k, 0)),   # x panel
            ],
            out_specs=pl.BlockSpec((tm, f_in), lambda i, k: (i, 0)),
            scratch_shapes=[pltpu.VMEM((tm, f_in), jnp.float32)],
        ),
        compiler_params=cparams,
    )(l_hat, x)

    # Pass 2: Z2 recursion + three projections + bias + concat, fused.
    out = pl.pallas_call(
        _proj_kernel,
        out_shape=jax.ShapeDtypeStruct((npad, OUT_PAD), jnp.float32),
        grid_spec=pltpu.PrefetchScalarGridSpec(
            num_scalar_prefetch=0,
            grid=grid,
            in_specs=[
                pl.BlockSpec((tm, tk), lambda i, k: (i, k)),       # L_hat tile
                pl.BlockSpec((tk, f_in), lambda i, k: (k, 0)),     # Z1 contraction panel
                pl.BlockSpec((tm, f_in), lambda i, k: (i, 0)),     # x row tile
                pl.BlockSpec((tm, f_in), lambda i, k: (i, 0)),     # Z1 row tile
                pl.BlockSpec((f_in, OUT_PAD), lambda i, k: (0, 0)),  # Wx (resident)
                pl.BlockSpec((f_in, OUT_PAD), lambda i, k: (0, 0)),  # Wz1 (resident)
                pl.BlockSpec((f_in, OUT_PAD), lambda i, k: (0, 0)),  # Wz2 (resident)
                pl.BlockSpec((1, OUT_PAD), lambda i, k: (0, 0)),     # bias (resident)
            ],
            out_specs=pl.BlockSpec((tm, OUT_PAD), lambda i, k: (i, 0)),
            scratch_shapes=[pltpu.VMEM((tm, f_in), jnp.float32)],
        ),
        compiler_params=cparams,
    )(l_hat, z1, x, z1, wx, wz1, wz2, bias)
    return out


# ------------------------------ wrapper -------------------------------------


def multichev_b_forward(x, edge_index, edge_weight, params, *, tm=256, tk=512):
    """Pallas forward pass for MultiChev_B. Returns [N, 300] float32."""
    n, f_in = x.shape
    l_hat = build_scaled_laplacian(edge_index, edge_weight, n)

    w1, w2, w3 = params["w1"], params["w2"], params["w3"]   # [K, F_in, 100]
    b1, b2, b3 = params["b1"], params["b2"], params["b3"]   # [100]

    # Pack per-order weights into lane-dense [F_in, 384] slabs:
    #   out[:,   0:128] <- scale_1 (K=1),  out[:, 128:256] <- scale_2 (K=2),
    #   out[:, 256:384] <- scale_3 (K=3);  columns 100..127 of each slab = 0.
    def pack_w(c0, c1, c2):
        w = jnp.zeros((f_in, OUT_PAD), jnp.float32)
        for slab, c in enumerate((c0, c1, c2)):
            if c is not None:
                base = slab * PAD_PER_BRANCH
                w = w.at[:, base:base + OUT_PER_BRANCH].set(c)
        return w

    wx = pack_w(w1[0], w2[0], w3[0])     # multiplies T0 = x
    wz1 = pack_w(None, w2[1], w3[1])     # multiplies T1 = Z1
    wz2 = pack_w(None, None, w3[2])      # multiplies T2 = Z2

    bias = jnp.zeros((1, OUT_PAD), jnp.float32)
    for slab, b in enumerate((b1, b2, b3)):
        base = slab * PAD_PER_BRANCH
        bias = bias.at[0, base:base + OUT_PER_BRANCH].set(b)

    # Pad node count so tm / tk tile evenly; zero rows/cols are inert.
    assert max(tm, tk) % min(tm, tk) == 0
    npad = _round_up(n, max(tm, tk))
    l_pad = jnp.zeros((npad, npad), jnp.float32).at[:n, :n].set(l_hat)
    x_pad = jnp.zeros((npad, f_in), jnp.float32).at[:n, :].set(x)

    out_pad = _multichev_b_padded(
        l_pad.astype(jnp.bfloat16), x_pad.astype(jnp.bfloat16),
        wx.astype(jnp.bfloat16), wz1.astype(jnp.bfloat16),
        wz2.astype(jnp.bfloat16), bias, tm=tm, tk=tk)

    s1 = out_pad[:n, 0:OUT_PER_BRANCH]
    s2 = out_pad[:n, PAD_PER_BRANCH:PAD_PER_BRANCH + OUT_PER_BRANCH]
    s3 = out_pad[:n, 2 * PAD_PER_BRANCH:2 * PAD_PER_BRANCH + OUT_PER_BRANCH]
    return jnp.concatenate([s1, s2, s3], axis=1)


# --------------------------- reference & test -------------------------------


def multichev_b_reference(x, edge_index, edge_weight, params):
    """Pure-JAX f32 reference matching torch_geometric ChebConv semantics."""
    n = x.shape[0]
    l_hat = build_scaled_laplacian(edge_index, edge_weight, n)
    z1 = l_hat @ x
    z2 = 2.0 * (l_hat @ z1) - x
    w1, w2, w3 = params["w1"], params["w2"], params["w3"]
    b1, b2, b3 = params["b1"], params["b2"], params["b3"]
    s1 = x @ w1[0] + b1
    s2 = x @ w2[0] + z1 @ w2[1] + b2
    s3 = x @ w3[0] + z1 @ w3[1] + z2 @ w3[2] + b3
    return jnp.concatenate([s1, s2, s3], axis=1)


def init_params(key, f_in):
    ks = jax.random.split(key, 6)

    def glorot(k, shape):
        scale = jnp.sqrt(2.0 / (shape[-2] + shape[-1]))
        return scale * jax.random.normal(k, shape, dtype=jnp.float32)

    return {
        "w1": glorot(ks[0], (1, f_in, OUT_PER_BRANCH)),
        "w2": glorot(ks[1], (2, f_in, OUT_PER_BRANCH)),
        "w3": glorot(ks[2], (3, f_in, OUT_PER_BRANCH)),
        "b1": 0.1 * jax.random.normal(ks[3], (OUT_PER_BRANCH,), dtype=jnp.float32),
        "b2": 0.1 * jax.random.normal(ks[4], (OUT_PER_BRANCH,), dtype=jnp.float32),
        "b3": 0.1 * jax.random.normal(ks[5], (OUT_PER_BRANCH,), dtype=jnp.float32),
    }


if __name__ == "__main__":
    key = jax.random.PRNGKey(0)
    k_src, k_dst, k_w, k_x, k_p = jax.random.split(key, 5)

    num_nodes, f_in, num_edges = 300, 16, 2400
    src = jax.random.randint(k_src, (num_edges,), 0, num_nodes)
    dst = jax.random.randint(k_dst, (num_edges,), 0, num_nodes)
    edge_index = jnp.stack([src, dst]).astype(jnp.int32)
    edge_weight = jax.random.uniform(k_w, (num_edges,), minval=0.5, maxval=1.5)
    x = jax.random.normal(k_x, (num_nodes, f_in), dtype=jnp.float32)
    params = init_params(k_p, f_in)

    out = multichev_b_forward(x, edge_index, edge_weight, params)
    out = jax.block_until_ready(out)
    assert out.shape == (num_nodes, 3 * OUT_PER_BRANCH), out.shape

    ref = multichev_b_reference(x, edge_index, edge_weight, params)
    np.testing.assert_allclose(np.asarray(out), np.asarray(ref),
                               rtol=5e-2, atol=5e-2)
    print("KERNEL_OK")
</pallas_src>

<mosaic_0001>
module attributes {stable_mosaic.version = 11 : i64} {
  func.func @_z1_kernel(%arg0: i32, %arg1: i32, %arg2: memref<256x512xbf16, #tpu.memory_space<vmem>>, %arg3: memref<512x16xbf16, #tpu.memory_space<vmem>>, %arg4: memref<256x16xbf16, #tpu.memory_space<vmem>>, %arg5: memref<256x16xf32, #tpu.memory_space<vmem>>) attributes {dimension_semantics = [#tpu.dimension_semantics<parallel>, #tpu.dimension_semantics<arbitrary>], iteration_bounds = array<i64: 2, 1>, scalar_prefetch = 0 : i64, scratch_operands = 1 : i64, tpu.core_type = #tpu.core_type<tc>, window_params = [{transform_indices = @transform_0, window_bounds = array<i64: 256, 512>}, {transform_indices = @transform_1, window_bounds = array<i64: 512, 16>}, {transform_indices = @transform_2, window_bounds = array<i64: 256, 16>}]} {
    %c0_i32 = arith.constant 0 : i32
    %0 = arith.cmpi eq, %arg1, %c0_i32 : i32
    %1 = arith.extui %0 : i1 to i32
    %c0_i32_0 = arith.constant 0 : i32
    %2 = arith.cmpi ne, %1, %c0_i32_0 : i32
    scf.if %2 {
      %cst_10 = arith.constant 0.000000e+00 : f32
      %12 = vector.broadcast %cst_10 : f32 to vector<256x16xf32>
      %c0_11 = arith.constant 0 : index
      %c0_12 = arith.constant 0 : index
      %13 = vector.load %arg5[%c0_11, %c0_12] : memref<256x16xf32, #tpu.memory_space<vmem>>, vector<256x16xf32>
      tpu.vector_store %arg5[%c0_11, %c0_12], %12 {strides = array<i32>} : memref<256x16xf32, #tpu.memory_space<vmem>>, vector<256x16xf32>,
    } else {
    }
    %c0 = arith.constant 0 : index
    %c0_1 = arith.constant 0 : index
    %3 = vector.load %arg5[%c0, %c0_1] : memref<256x16xf32, #tpu.memory_space<vmem>>, vector<256x16xf32>
    %c0_2 = arith.constant 0 : index
    %c0_3 = arith.constant 0 : index
    %4 = vector.load %arg2[%c0_2, %c0_3] : memref<256x512xbf16, #tpu.memory_space<vmem>>, vector<256x512xbf16>
    %c0_4 = arith.constant 0 : index
    %c0_5 = arith.constant 0 : index
    %5 = vector.load %arg3[%c0_4, %c0_5] : memref<512x16xbf16, #tpu.memory_space<vmem>>, vector<512x16xbf16>
    %cst = arith.constant dense<0.000000e+00> : vector<256x16xf32>
    %6 = tpu.matmul %4, %5, %cst {dimension_numbers = #tpu.dot_dimension_numbers<[1], [0], [0], [1], [0, 0, 1, 1], [], []>} : vector<256x512xbf16>, vector<512x16xbf16>, vector<256x16xf32> -> vector<256x16xf32>
    %7 = arith.addf %3, %6 : vector<256x16xf32>
    %c0_6 = arith.constant 0 : index
    %c0_7 = arith.constant 0 : index
    %8 = vector.load %arg5[%c0_6, %c0_7] : memref<256x16xf32, #tpu.memory_space<vmem>>, vector<256x16xf32>
    tpu.vector_store %arg5[%c0_6, %c0_7], %7 {strides = array<i32>} : memref<256x16xf32, #tpu.memory_space<vmem>>, vector<256x16xf32>,
    %c0_i32_8 = arith.constant 0 : i32
    %9 = arith.cmpi eq, %arg1, %c0_i32_8 : i32
    %10 = arith.extui %9 : i1 to i32
    %c0_i32_9 = arith.constant 0 : i32
    %11 = arith.cmpi ne, %10, %c0_i32_9 : i32
    scf.if %11 {
      %c0_10 = arith.constant 0 : index
      %c0_11 = arith.constant 0 : index
      %12 = vector.load %arg5[%c0_10, %c0_11] : memref<256x16xf32, #tpu.memory_space<vmem>>, vector<256x16xf32>
      %13 = arith.truncf %12 : vector<256x16xf32> to vector<256x16xbf16>
      %c0_12 = arith.constant 0 : index
      %c0_13 = arith.constant 0 : index
      %14 = vector.load %arg4[%c0_12, %c0_13] : memref<256x16xbf16, #tpu.memory_space<vmem>>, vector<256x16xbf16>
      tpu.vector_store %arg4[%c0_12, %c0_13], %13 {strides = array<i32>} : memref<256x16xbf16, #tpu.memory_space<vmem>>, vector<256x16xbf16>,
    } else {
    }
    return
  }
  func.func @transform_0(%arg0: i32, %arg1: i32) -> (i32, i32) {
    %c0_i32 = arith.constant 0 : i32
    return %arg0, %arg1 : i32, i32
  }
  func.func @transform_1(%arg0: i32, %arg1: i32) -> (i32, i32) {
    %c0_i32 = arith.constant 0 : i32
    %c0_i32_0 = arith.constant 0 : i32
    return %arg1, %c0_i32 : i32, i32
  }
  func.func @transform_2(%arg0: i32, %arg1: i32) -> (i32, i32) {
    %c0_i32 = arith.constant 0 : i32
    %c0_i32_0 = arith.constant 0 : i32
    return %arg0, %c0_i32 : i32, i32
  }
}

module attributes {stable_mosaic.version = 11 : i64} {
  func.func @_proj_kernel(%arg0: i32, %arg1: i32, %arg2: memref<256x512xbf16, #tpu.memory_space<vmem>>, %arg3: memref<512x16xbf16, #tpu.memory_space<vmem>>, %arg4: memref<256x16xbf16, #tpu.memory_space<vmem>>, %arg5: memref<256x16xbf16, #tpu.memory_space<vmem>>, %arg6: memref<16x384xbf16, #tpu.memory_space<vmem>>, %arg7: memref<16x384xbf16, #tpu.memory_space<vmem>>, %arg8: memref<16x384xbf16, #tpu.memory_space<vmem>>, %arg9: memref<1x384xf32, #tpu.memory_space<vmem>>, %arg10: memref<256x384xf32, #tpu.memory_space<vmem>>, %arg11: memref<256x16xf32, #tpu.memory_space<vmem>>) attributes {dimension_semantics = [#tpu.dimension_semantics<parallel>, #tpu.dimension_semantics<arbitrary>], iteration_bounds = array<i64: 2, 1>, scalar_prefetch = 0 : i64, scratch_operands = 1 : i64, tpu.core_type = #tpu.core_type<tc>, window_params = [{transform_indices = @transform_0, window_bounds = array<i64: 256, 512>}, {transform_indices = @transform_1, window_bounds = array<i64: 512, 16>}, {transform_indices = @transform_2, window_bounds = array<i64: 256, 16>}, {transform_indices = @transform_3, window_bounds = array<i64: 256, 16>}, {pipeline_mode = #tpu.pipeline_mode<synchronous>, transform_indices = @transform_4, window_bounds = array<i64: 16, 384>}, {pipeline_mode = #tpu.pipeline_mode<synchronous>, transform_indices = @transform_5, window_bounds = array<i64: 16, 384>}, {pipeline_mode = #tpu.pipeline_mode<synchronous>, transform_indices = @transform_6, window_bounds = array<i64: 16, 384>}, {pipeline_mode = #tpu.pipeline_mode<synchronous>, transform_indices = @transform_7, window_bounds = array<i64: 1, 384>}, {transform_indices = @transform_8, window_bounds = array<i64: 256, 384>}]} {
    %c0_i32 = arith.constant 0 : i32
    %0 = arith.cmpi eq, %arg1, %c0_i32 : i32
    %1 = arith.extui %0 : i1 to i32
    %c0_i32_0 = arith.constant 0 : i32
    %2 = arith.cmpi ne, %1, %c0_i32_0 : i32
    scf.if %2 {
      %cst_10 = arith.constant 0.000000e+00 : f32
      %12 = vector.broadcast %cst_10 : f32 to vector<256x16xf32>
      %c0_11 = arith.constant 0 : index
      %c0_12 = arith.constant 0 : index
      %13 = vector.load %arg11[%c0_11, %c0_12] : memref<256x16xf32, #tpu.memory_space<vmem>>, vector<256x16xf32>
      tpu.vector_store %arg11[%c0_11, %c0_12], %12 {strides = array<i32>} : memref<256x16xf32, #tpu.memory_space<vmem>>, vector<256x16xf32>,
    } else {
    }
    %c0 = arith.constant 0 : index
    %c0_1 = arith.constant 0 : index
    %3 = vector.load %arg11[%c0, %c0_1] : memref<256x16xf32, #tpu.memory_space<vmem>>, vector<256x16xf32>
    %c0_2 = arith.constant 0 : index
    %c0_3 = arith.constant 0 : index
    %4 = vector.load %arg2[%c0_2, %c0_3] : memref<256x512xbf16, #tpu.memory_space<vmem>>, vector<256x512xbf16>
    %c0_4 = arith.constant 0 : index
    %c0_5 = arith.constant 0 : index
    %5 = vector.load %arg3[%c0_4, %c0_5] : memref<512x16xbf16, #tpu.memory_space<vmem>>, vector<512x16xbf16>
    %cst = arith.constant dense<0.000000e+00> : vector<256x16xf32>
    %6 = tpu.matmul %4, %5, %cst {dimension_numbers = #tpu.dot_dimension_numbers<[1], [0], [0], [1], [0, 0, 1, 1], [], []>} : vector<256x512xbf16>, vector<512x16xbf16>, vector<256x16xf32> -> vector<256x16xf32>
    %7 = arith.addf %3, %6 : vector<256x16xf32>
    %c0_6 = arith.constant 0 : index
    %c0_7 = arith.constant 0 : index
    %8 = vector.load %arg11[%c0_6, %c0_7] : memref<256x16xf32, #tpu.memory_space<vmem>>, vector<256x16xf32>
    tpu.vector_store %arg11[%c0_6, %c0_7], %7 {strides = array<i32>} : memref<256x16xf32, #tpu.memory_space<vmem>>, vector<256x16xf32>,
    %c0_i32_8 = arith.constant 0 : i32
    %9 = arith.cmpi eq, %arg1, %c0_i32_8 : i32
    %10 = arith.extui %9 : i1 to i32
    %c0_i32_9 = arith.constant 0 : i32
    %11 = arith.cmpi ne, %10, %c0_i32_9 : i32
    scf.if %11 {
      %c0_10 = arith.constant 0 : index
      %c0_11 = arith.constant 0 : index
      %12 = vector.load %arg11[%c0_10, %c0_11] : memref<256x16xf32, #tpu.memory_space<vmem>>, vector<256x16xf32>
      %cst_12 = arith.constant 2.000000e+00 : f32
      %13 = vector.broadcast %cst_12 : f32 to vector<256x16xf32>
      %14 = arith.mulf %13, %12 : vector<256x16xf32>
      %c0_13 = arith.constant 0 : index
      %c0_14 = arith.constant 0 : index
      %15 = vector.load %arg4[%c0_13, %c0_14] : memref<256x16xbf16, #tpu.memory_space<vmem>>, vector<256x16xbf16>
      %16 = arith.extf %15 : vector<256x16xbf16> to vector<256x16xf32>
      %17 = arith.subf %14, %16 : vector<256x16xf32>
      %c0_15 = arith.constant 0 : index
      %c0_16 = arith.constant 0 : index
      %18 = vector.load %arg4[%c0_15, %c0_16] : memref<256x16xbf16, #tpu.memory_space<vmem>>, vector<256x16xbf16>
      %c0_17 = arith.constant 0 : index
      %c0_18 = arith.constant 0 : index
      %19 = vector.load %arg6[%c0_17, %c0_18] : memref<16x384xbf16, #tpu.memory_space<vmem>>, vector<16x384xbf16>
      %cst_19 = arith.constant dense<0.000000e+00> : vector<256x384xf32>
      %20 = tpu.matmul %18, %19, %cst_19 {dimension_numbers = #tpu.dot_dimension_numbers<[1], [0], [0], [1], [0, 0, 1, 1], [], []>} : vector<256x16xbf16>, vector<16x384xbf16>, vector<256x384xf32> -> vector<256x384xf32>
      %c0_20 = arith.constant 0 : index
      %c0_21 = arith.constant 0 : index
      %21 = vector.load %arg5[%c0_20, %c0_21] : memref<256x16xbf16, #tpu.memory_space<vmem>>, vector<256x16xbf16>
      %c0_22 = arith.constant 0 : index
      %c0_23 = arith.constant 0 : index
      %22 = vector.load %arg7[%c0_22, %c0_23] : memref<16x384xbf16, #tpu.memory_space<vmem>>, vector<16x384xbf16>
      %cst_24 = arith.constant dense<0.000000e+00> : vector<256x384xf32>
      %23 = tpu.matmul %21, %22, %cst_24 {dimension_numbers = #tpu.dot_dimension_numbers<[1], [0], [0], [1], [0, 0, 1, 1], [], []>} : vector<256x16xbf16>, vector<16x384xbf16>, vector<256x384xf32> -> vector<256x384xf32>
      %24 = arith.addf %20, %23 : vector<256x384xf32>
      %25 = arith.truncf %17 : vector<256x16xf32> to vector<256x16xbf16>
      %c0_25 = arith.constant 0 : index
      %c0_26 = arith.constant 0 : index
      %26 = vector.load %arg8[%c0_25, %c0_26] : memref<16x384xbf16, #tpu.memory_space<vmem>>, vector<16x384xbf16>
      %cst_27 = arith.constant dense<0.000000e+00> : vector<256x384xf32>
      %27 = tpu.matmul %25, %26, %cst_27 {dimension_numbers = #tpu.dot_dimension_numbers<[1], [0], [0], [1], [0, 0, 1, 1], [], []>} : vector<256x16xbf16>, vector<16x384xbf16>, vector<256x384xf32> -> vector<256x384xf32>
      %28 = arith.addf %24, %27 : vector<256x384xf32>
      %c0_28 = arith.constant 0 : index
      %c0_29 = arith.constant 0 : index
      %29 = vector.load %arg9[%c0_28, %c0_29] : memref<1x384xf32, #tpu.memory_space<vmem>>, vector<1x384xf32>
      %30 = vector.broadcast %29 : vector<1x384xf32> to vector<256x384xf32>
      %31 = arith.addf %28, %30 : vector<256x384xf32>
      %c0_30 = arith.constant 0 : index
      %c0_31 = arith.constant 0 : index
      %32 = vector.load %arg10[%c0_30, %c0_31] : memref<256x384xf32, #tpu.memory_space<vmem>>, vector<256x384xf32>
      tpu.vector_store %arg10[%c0_30, %c0_31], %31 {strides = array<i32>} : memref<256x384xf32, #tpu.memory_space<vmem>>, vector<256x384xf32>,
    } else {
    }
    return
  }
  func.func @transform_0(%arg0: i32, %arg1: i32) -> (i32, i32) {
    %c0_i32 = arith.constant 0 : i32
    return %arg0, %arg1 : i32, i32
  }
  func.func @transform_1(%arg0: i32, %arg1: i32) -> (i32, i32) {
    %c0_i32 = arith.constant 0 : i32
    %c0_i32_0 = arith.constant 0 : i32
    return %arg1, %c0_i32 : i32, i32
  }
  func.func @transform_2(%arg0: i32, %arg1: i32) -> (i32, i32) {
    %c0_i32 = arith.constant 0 : i32
    %c0_i32_0 = arith.constant 0 : i32
    return %arg0, %c0_i32 : i32, i32
  }
  func.func @transform_3(%arg0: i32, %arg1: i32) -> (i32, i32) {
    %c0_i32 = arith.constant 0 : i32
    %c0_i32_0 = arith.constant 0 : i32
    return %arg0, %c0_i32 : i32, i32
  }
  func.func @transform_4(%arg0: i32, %arg1: i32) -> (i32, i32) {
    %c0_i32 = arith.constant 0 : i32
    %c0_i32_0 = arith.constant 0 : i32
    %c0_i32_1 = arith.constant 0 : i32
    return %c0_i32, %c0_i32_0 : i32, i32
  }
  func.func @transform_5(%arg0: i32, %arg1: i32) -> (i32, i32) {
    %c0_i32 = arith.constant 0 : i32
    %c0_i32_0 = arith.constant 0 : i32
    %c0_i32_1 = arith.constant 0 : i32
    return %c0_i32, %c0_i32_0 : i32, i32
  }
  func.func @transform_6(%arg0: i32, %arg1: i32) -> (i32, i32) {
    %c0_i32 = arith.constant 0 : i32
    %c0_i32_0 = arith.constant 0 : i32
    %c0_i32_1 = arith.constant 0 : i32
    return %c0_i32, %c0_i32_0 : i32, i32
  }
  func.func @transform_7(%arg0: i32, %arg1: i32) -> (i32, i32) {
    %c0_i32 = arith.constant 0 : i32
    %c0_i32_0 = arith.constant 0 : i32
    %c0_i32_1 = arith.constant 0 : i32
    return %c0_i32, %c0_i32_0 : i32, i32
  }
  func.func @transform_8(%arg0: i32, %arg1: i32) -> (i32, i32) {
    %c0_i32 = arith.constant 0 : i32
    %c0_i32_0 = arith.constant 0 : i32
    return %arg0, %c0_i32 : i32, i32
  }
}

</mosaic_0001>

<bundles_post_ra>
// kernel: _multichev_b_padded.2
= control target key start
LH: loop header
LB: loop body
LE: loop exit
PB: predicated region body
PF: predicated region fallthrough
CT: control target
= control target key end

     0   :  { %7 = vsyncpa [#allocation4], 0  ;;  %s2696_s0 = inlined_call_operand.hbm [shape: bf16[512,512], index: 0, kind: input, shape index: {}]   ;;  %s2697_s1 = inlined_call_operand.vmem [shape: bf16[512,16], index: 1, kind: input, shape index: {}]   ;;  %s2698_s2 = inlined_call_operand.vmem [shape: bf16[512,16], index: 2, kind: output, shape index: {}]  }
   0x1   :  { %9 = vsyncpa [#allocation4 + $0x1], 0  ;;  %s2281_s9 = smov 0   ;;  %s2283_s10 = smov 0  }
   0x2   :  { %s2285_s11 = smov 0   ;;  %s2287_s12 = smov 0  }
   0x3   :  { %s2289_s13 = smov 0   ;;  %s2291_s14 = smov 0  }
   0x4 LB: > { %s1593_s15 = sadd.s32 4294967295, %s2260_s14   ;;  %s27_s16 = sadd.s32 1, %s2256_s13  ;;  %s2260_s14 = sphi %s2291_s14, %s15_s14   ;;  %s2256_s13 = sphi %s2289_s13, %s2706_s13   ;;  %s2252_s12 = sphi %s2287_s12, %s2705_s12   ;;  %s2248_s11 = sphi %s2285_s11, %s2704_s11   ;;  %s2244_s10 = sphi %s2283_s10, %s2703_s10   ;;  %s2240_s9 = sphi %s2281_s9, %s2702_s9  }
   0x5   : > { %p29_p0 = scmp.ge.s32.totalorder %s27_s16, 2  ;;  %s36_s17 = sadd.s32 1, %s2248_s11 }
   0x6   : > { %p43_p1 = scmp.ne.s32.totalorder %s2248_s11, %s2244_s10  ;;  %p44_p2 = scmp.eq.s32.totalorder %s2260_s14, 0 }
   0x7   : > { %s2708_s16 = smov (%p29_p0, %s27_s16), 0  ;;  %p49_p4 = scmp.ne.s32.totalorder %s2244_s10, %s2240_s9 }
   0x8   : > { %p2317_p3 = por %p44_p2, %p43_p1  ;;  %s31_s19 = ssub.s32 %s2256_s13, %s2708_s16 }
   0x9   : > { %p50_p5 = scmp.eq.s32.totalorder %s1593_s15, 0  ;;  %p34_p6 = scmp.eq.s32.totalorder %s31_s19, 0 }
   0xa   : > { %p2000_p8 = scmp.lt.s32.totalorder %s2260_s14, 2  ;;  %s134_s22 = sand.u32 1, %s2248_s11  }
   0xb   : > { %p2324_p7 = por %p50_p5, %p49_p4  ;;  %s1737_s23 = sshll.u32 %s2256_s13, 13 }
   0xc   : > { %s2330_s21 = scalar_select %p34_p6, %s2248_s11, %s36_s17  }
   0xd   : > { %s1598_s24 = sshll.u32 %s134_s22, 9  ;;  %s2337_s27 = scalar_lea.hbm %s2696_s0, %s1737_s23 }
   0xe   : > { %s138_s28 = scalar_lea.vmem [#allocation3], %s1598_s24  ;;  %p2341_p9 = pnand %p2000_p8, %p2317_p3 }
   0xf   : > { %s148_s29 = sshll.u32 %s138_s28, 4  ;;  %s2347_s3 = scalar_lea.sflag [#allocation4], %s134_s22  ;;  %s2345_s29 = int_to_ptr.vmem [resolvable:$true] %s148_s29 }
  0x10   : > { %s2180_s4 = scalar_lea.hbm %s2337_s27, 8192  ;;  %p2182_p11 = pneg %p2341_p9 }
  0x11   : > { %p2181_p10 = scmp.ne.s32.totalorder %s2337_s27, %s2180_s4  ;;  %s2185_s7 = scalar_lea.hbm %s2696_s0, 16384 }
  0x12   : > { %p2186_p0 = scmp.lt.u32.totalorder %s2337_s27, %s2696_s0  ;;  %p2187_p1 = scmp.lt.u32.totalorder %s2185_s7, %s2180_s4 }
  0x13   : > { %p2183_p12 = pnand %p2182_p11, %p2181_p10  ;;  %p2189_p3 = scmp.lt.u32.totalorder %s2180_s4, %s2337_s27 }
  0x14   : > { %p2188_p2 = por %p2187_p1, %p2186_p0 }
  0x15   : > { %p2184_p13 = pneg %p2183_p12 }
  0x16   : > { %p2190_p4 = por %p2189_p3, %p2188_p2 }
  0x18   : > { %p2191_p5 = pnand %p2190_p4, %p2184_p13 }
  0x1a   : > { %2194 = shalt.err (!%p2191_p5)
}
  0x1b   : > { %s2195_s15 = scalar_lea.vmem %s2345_s29, 8192  ;;  %s2262_s17 = smov [#allocation3]  }
  0x1c   : > { %p2196_p6 = scmp.ne.s32.totalorder %s2345_s29, %s2195_s15  ;;  %s2200_s18 = sshll.u32 %s2262_s17, 4  ;;  %s2201_s18 = int_to_ptr.vmem [resolvable:$false] %s2200_s18 }
  0x1d   : > { %s2202_s19 = scalar_lea.vmem %s2201_s18, 16384  ;;  %p2203_p12 = scmp.lt.s32.totalorder %s2345_s29, %s2201_s18 }
  0x1e   : > { %p2198_p8 = pnand %p2196_p6, %p2182_p11  ;;  %p2204_p0 = scmp.lt.s32.totalorder %s2202_s19, %s2195_s15 }
  0x20   : > { %p2199_p10 = pneg %p2198_p8  ;;  %p2205_p1 = por %p2204_p0, %p2203_p12 }
  0x22   : > { %p2206_p2 = pnand %p2205_p1, %p2199_p10 }
  0x24   : > { %2209 = shalt.err (!%p2206_p2)
}
  0x25   : > { %s2263_s22 = smov 256   ;;  %s2264_s23 = smov 16  }
  0x26   : > { %1999 = dma.hbm_to_vmem [thread:$0]  (!%p2341_p9), %s2337_s27, 8192, %s2345_s29, %s2347_s3, %s2263_s22, %s2263_s22, %s2264_s23  }
  0x27   : > { %p1602_p11 = scmp.ge.s32.totalorder %s2260_s14, 1  ;;  %p156_p13 = scmp.lt.s32.totalorder %s2260_s14, 3 }
  0x29   : > { %p157_p3 = pnand %p1602_p11, %p156_p13 }
  0x2a   : > { %s162_s24 = sand.u32 (!%p157_p3), 1, %s2244_s10  }
  0x2b   : > { %160 = sbr.rel (%p157_p3) target bundleno = 439 (0x1b7), region = 28  ;;  %s1603_s25 = sshll.u32 (!%p157_p3), %s162_s24, 9 }
  0x2c   : > { %s163_s26 = scalar_lea.sflag (!%p157_p3), [#allocation4], %s162_s24  ;;  %s2378_s28 = scalar_lea.vmem (!%p157_p3), [#allocation3], %s1603_s25 }
  0x32   : > { %2235 = dma.done.wait (%p2324_p7), %s163_s26, 8192  }
  0x33   : > { %2237 = vsyncadd (%p2324_p7), %s163_s26, 4294959104  ;;  %v2052_v0 = vld [vmem:[%s2697_s1 + $0x40] sm:$0xff]   ;;  %v2056_v4 = vld [vmem:[%s2697_s1 + $0x48] sm:$0xff]   ;;  %vm211_vm0 = vcmask 130048   ;;  %s1604_s30 = sshll.u32 %s2252_s12, 5  ;;  %vm1466_vm1 = vcmask 125952  }
  0x34   : > { %v2053_v1 = vld [vmem:[%s2697_s1 + $0xc0] sm:$0xff]   ;;  %1770 = vmatprep.subr.bf16.mxu0 %v2052_v0  ;;  %v2057_v5 = vld [vmem:[%s2697_s1 + $0xc8] sm:$0xff]   ;;  %v2060_v8 = vld [vmem:[%s2697_s1 + $0x50] sm:$0xff]   ;;  %p201_p7 = scmp.lt.s32.totalorder %s1604_s30, 63 }
  0x35   : > { %v2054_v2 = vld [vmem:[%s2697_s1] sm:$0xff]   ;;  %1882 = vmatprep.subr.bf16.mxu1 %v2053_v1  ;;  %v2058_v6 = vld [vmem:[%s2697_s1 + $0x8] sm:$0xff]   ;;  %v2061_v9 = vld [vmem:[%s2697_s1 + $0xd0] sm:$0xff]  }
  0x36   : > { %v2055_v3 = vld [vmem:[%s2697_s1 + $0x80] sm:$0xff]   ;;  %1771 = vmatpush3.bf16.msra.mxu0 %v2054_v2  ;;  %v2059_v7 = vld [vmem:[%s2697_s1 + $0x88] sm:$0xff]   ;;  %v2062_v10 = vld [vmem:[%s2697_s1 + $0x10] sm:$0xff]   ;;  %s2710_s30 = smov (!%p201_p7, %s1604_s30), 63 }
  0x37   : > { %1883 = vmatpush3.bf16.msra.mxu1 %v2055_v3  ;;  %1772 = vmatprep.subr.bf16.mxu0 %v2056_v4  ;;  %v2063_v11 = vld [vmem:[%s2697_s1 + $0x90] sm:$0xff]   ;;  %v2064_v12 = vld [vmem:[%s2697_s1 + $0x58] sm:$0xff]   ;;  %v2068_v16 = vld [vmem:[%s2697_s1 + $0x60] sm:$0xff]   ;;  %s1605_s12 = sshll.u32 %s2710_s30, 2 }
  0x38   : > { %1884 = vmatprep.subr.bf16.mxu1 %v2057_v5  ;;  %v2065_v13 = vld [vmem:[%s2697_s1 + $0xd8] sm:$0xff]   ;;  %v2069_v17 = vld [vmem:[%s2697_s1 + $0xe0] sm:$0xff]   ;;  %v2072_v20 = vld [vmem:[%s2697_s1 + $0x68] sm:$0xff]   ;;  %s2582_s6 = scalar_lea.vmem %s2698_s2, %s1605_s12 }
  0x39   : > { %v2066_v14 = vld [vmem:[%s2697_s1 + $0x18] sm:$0xff]   ;;  %v2070_v18 = vld [vmem:[%s2697_s1 + $0x20] sm:$0xff]   ;;  %v2073_v21 = vld [vmem:[%s2697_s1 + $0xe8] sm:$0xff]  }
  0x3a   : > { %1773 = vmatpush3.bf16.msra.mxu0 %v2058_v6  ;;  %v2067_v15 = vld [vmem:[%s2697_s1 + $0x98] sm:$0xff]   ;;  %v2071_v19 = vld [vmem:[%s2697_s1 + $0xa0] sm:$0xff]   ;;  %v2074_v22 = vld [vmem:[%s2697_s1 + $0x28] sm:$0xff]  }
  0x3b   : > { %1885 = vmatpush3.bf16.msra.mxu1 %v2059_v7  ;;  %1774 = vmatprep.subr.bf16.mxu0 %v2060_v8  ;;  %v2075_v23 = vld [vmem:[%s2697_s1 + $0xa8] sm:$0xff]   ;;  %v2076_v24 = vld [vmem:[%s2697_s1 + $0x70] sm:$0xff]   ;;  %v2080_v28 = vld [vmem:[%s2697_s1 + $0x78] sm:$0xff]  }
  0x3c   : > { %1886 = vmatprep.subr.bf16.mxu1 %v2061_v9  ;;  %v2077_v25 = vld [vmem:[%s2697_s1 + $0xf0] sm:$0xff]   ;;  %v2081_v29 = vld [vmem:[%s2697_s1 + $0xf8] sm:$0xff]  }
  0x3d   : > { %v2078_v26 = vld [vmem:[%s2697_s1 + $0x30] sm:$0xff]   ;;  %v2082_v30 = vld [vmem:[%s2697_s1 + $0x38] sm:$0xff]  }
  0x3e   : > { %1775 = vmatpush3.bf16.msra.mxu0 %v2062_v10  ;;  %v2079_v27 = vld [vmem:[%s2697_s1 + $0xb0] sm:$0xff]   ;;  %v2083_v31 = vld [vmem:[%s2697_s1 + $0xb8] sm:$0xff]  }
  0x3f   : > { %1887 = vmatpush3.bf16.msra.mxu1 %v2063_v11  ;;  %1776 = vmatprep.subr.bf16.mxu0 %v2064_v12  ;;  %v2084_v32 = vld [vmem:[%s2378_s28] ss:$16 sps:$4 sm:$0xff]   ;;  %v2086_v33 = vld [vmem:[%s2378_s28 + $0x4] ss:$16 sps:$4 sm:$0xff]   ;;  %v2087_v34 = vld [vmem:[%s2378_s28 + $0x8] ss:$16 sps:$4 sm:$0xff]  }
  0x40   : > { %1888 = vmatprep.subr.bf16.mxu1 %v2065_v13  ;;  %v2089_v35 = vld [vmem:[%s2378_s28 + $0xc] ss:$16 sps:$4 sm:$0xff]   ;;  %948 = vmatprep.mubr.bf16.mxu0 %v2086_v33  ;;  %v2090_v36 = vld [vmem:[%s2378_s28 + $0x24] ss:$16 sps:$4 sm:$0xff]   ;;  %v2094_v38 = vld [vmem:[%s2378_s28 + $0x20] ss:$16 sps:$4 sm:$0xff]  }
  0x41   : > { %1109 = vmatprep.mubr.bf16.mxu1 %v2089_v35  ;;  %v2092_v37 = vld [vmem:[%s2378_s28 + $0x2c] ss:$16 sps:$4 sm:$0xff]   ;;  %v2095_v39 = vld [vmem:[%s2378_s28 + $0x28] ss:$16 sps:$4 sm:$0xff]   ;;  %v2096_v40 = vld [vmem:[%s2378_s28 + $0x44] ss:$16 sps:$4 sm:$0xff]  }
  0x42   : > { %1777 = vmatpush3.bf16.msra.mxu0 %v2066_v14  ;;  %v2098_v41 = vld [vmem:[%s2378_s28 + $0x4c] ss:$16 sps:$4 sm:$0xff]   ;;  %v2100_v42 = vld [vmem:[%s2378_s28 + $0x40] ss:$16 sps:$4 sm:$0xff]   ;;  %v2101_v43 = vld [vmem:[%s2378_s28 + $0x48] ss:$16 sps:$4 sm:$0xff]  }
  0x43   : > { %1889 = vmatpush3.bf16.msra.mxu1 %v2067_v15  ;;  %1778 = vmatprep.subr.bf16.mxu0 %v2068_v16  ;;  %v2102_v44 = vld [vmem:[%s2378_s28 + $0x64] ss:$16 sps:$4 sm:$0xff]   ;;  %v2104_v45 = vld [vmem:[%s2378_s28 + $0x6c] ss:$16 sps:$4 sm:$0xff]   ;;  %v2106_v46 = vld [vmem:[%s2378_s28 + $0x60] ss:$16 sps:$4 sm:$0xff]  }
  0x44   : > { %1890 = vmatprep.subr.bf16.mxu1 %v2069_v17  ;;  %v2107_v47 = vld [vmem:[%s2378_s28 + $0x68] ss:$16 sps:$4 sm:$0xff]   ;;  %v2108_v48 = vld [vmem:[%s2378_s28 + $0x84] ss:$16 sps:$4 sm:$0xff]   ;;  %v2110_v49 = vld [vmem:[%s2378_s28 + $0x8c] ss:$16 sps:$4 sm:$0xff]  }
  0x45   : > { %v2112_v50 = vld [vmem:[%s2378_s28 + $0x80] ss:$16 sps:$4 sm:$0xff]   ;;  %v2113_v51 = vld [vmem:[%s2378_s28 + $0x88] ss:$16 sps:$4 sm:$0xff]   ;;  %v2114_v52 = vld [vmem:[%s2378_s28 + $0xa4] ss:$16 sps:$4 sm:$0xff]  }
  0x46   : > { %1779 = vmatpush3.bf16.msra.mxu0 %v2070_v18  ;;  %v2116_v53 = vld [vmem:[%s2378_s28 + $0xac] ss:$16 sps:$4 sm:$0xff]   ;;  %v2118_v54 = vld [vmem:[%s2378_s28 + $0xa0] ss:$16 sps:$4 sm:$0xff]   ;;  %v2119_v55 = vld [vmem:[%s2378_s28 + $0xa8] ss:$16 sps:$4 sm:$0xff]  }
  0x47   : > { %1891 = vmatpush3.bf16.msra.mxu1 %v2071_v19  ;;  %1780 = vmatprep.subr.bf16.mxu0 %v2072_v20  ;;  %v2120_v56 = vld [vmem:[%s2378_s28 + $0xc4] ss:$16 sps:$4 sm:$0xff]   ;;  %v2122_v57 = vld [vmem:[%s2378_s28 + $0xcc] ss:$16 sps:$4 sm:$0xff]   ;;  %v2124_v58 = vld [vmem:[%s2378_s28 + $0xc0] ss:$16 sps:$4 sm:$0xff]  }
  0x48   : > { %1892 = vmatprep.subr.bf16.mxu1 %v2073_v21  ;;  %v2125_v59 = vld [vmem:[%s2378_s28 + $0xc8] ss:$16 sps:$4 sm:$0xff]   ;;  %v2126_v60 = vld [vmem:[%s2378_s28 + $0xe4] ss:$16 sps:$4 sm:$0xff]   ;;  %v2128_v61 = vld [vmem:[%s2378_s28 + $0xec] ss:$16 sps:$4 sm:$0xff]  }
  0x49   : > { %v2130_v62 = vld [vmem:[%s2378_s28 + $0xe0] ss:$16 sps:$4 sm:$0xff]   ;;  %v2131_v63 = vld [vmem:[%s2378_s28 + $0xe8] ss:$16 sps:$4 sm:$0xff]   ;;  %v2132_v0 = vld [vmem:[%s2378_s28 + $0x104] ss:$16 sps:$4 sm:$0xff]  }
  0x4a   : > { %1781 = vmatpush3.bf16.msra.mxu0 %v2074_v22  ;;  %v2134_v1 = vld [vmem:[%s2378_s28 + $0x10c] ss:$16 sps:$4 sm:$0xff]   ;;  %v2136_v2 = vld [vmem:[%s2378_s28 + $0x100] ss:$16 sps:$4 sm:$0xff]   ;;  %v2137_v3 = vld [vmem:[%s2378_s28 + $0x108] ss:$16 sps:$4 sm:$0xff]  }
  0x4b   : > { %1893 = vmatpush3.bf16.msra.mxu1 %v2075_v23  ;;  %1782 = vmatprep.subr.bf16.mxu0 %v2076_v24  ;;  %v2138_v4 = vld [vmem:[%s2378_s28 + $0x124] ss:$16 sps:$4 sm:$0xff]   ;;  %v2140_v5 = vld [vmem:[%s2378_s28 + $0x12c] ss:$16 sps:$4 sm:$0xff]   ;;  %v2142_v6 = vld [vmem:[%s2378_s28 + $0x120] ss:$16 sps:$4 sm:$0xff]  }
  0x4c   : > { %1894 = vmatprep.subr.bf16.mxu1 %v2077_v25  ;;  %v2143_v7 = vld [vmem:[%s2378_s28 + $0x128] ss:$16 sps:$4 sm:$0xff]   ;;  %v2144_v8 = vld [vmem:[%s2378_s28 + $0x144] ss:$16 sps:$4 sm:$0xff]   ;;  %v2146_v9 = vld [vmem:[%s2378_s28 + $0x14c] ss:$16 sps:$4 sm:$0xff]  }
  0x4d   : > { %v2148_v10 = vld [vmem:[%s2378_s28 + $0x140] ss:$16 sps:$4 sm:$0xff]   ;;  %v2149_v11 = vld [vmem:[%s2378_s28 + $0x148] ss:$16 sps:$4 sm:$0xff]   ;;  %v2150_v12 = vld [vmem:[%s2378_s28 + $0x164] ss:$16 sps:$4 sm:$0xff]  }
  0x4e   : > { %1783 = vmatpush3.bf16.msra.mxu0 %v2078_v26  ;;  %v2152_v13 = vld [vmem:[%s2378_s28 + $0x16c] ss:$16 sps:$4 sm:$0xff]   ;;  %v2265_v14 = vmov 0.0   ;;  %v2154_v15 = vld [vmem:[%s2378_s28 + $0x160] ss:$16 sps:$4 sm:$0xff]  }
  0x4f   : > { %1895 = vmatpush3.bf16.msra.mxu1 %v2079_v27  ;;  %1784 = vmatprep.subr.bf16.mxu0 %v2080_v28  ;;  %212 = vst.msk [vmem:[#allocation2] sm:$0xff] %vm211_vm0, %v2265_v14  ;;  %213 = vst.msk [vmem:[#allocation2 + $0x8] sm:$0xff] %vm211_vm0, %v2265_v14  ;;  %v2155_v16 = vld [vmem:[%s2378_s28 + $0x168] ss:$16 sps:$4 sm:$0xff]   ;;  %v2156_v17 = vld [vmem:[%s2378_s28 + $0x184] ss:$16 sps:$4 sm:$0xff]  }
  0x50   : > { %1896 = vmatprep.subr.bf16.mxu1 %v2081_v29  ;;  %214 = vst.msk [vmem:[#allocation2 + $0x10] sm:$0xff] %vm211_vm0, %v2265_v14  ;;  %215 = vst.msk [vmem:[#allocation2 + $0x18] sm:$0xff] %vm211_vm0, %v2265_v14  ;;  %v2158_v18 = vld [vmem:[%s2378_s28 + $0x18c] ss:$16 sps:$4 sm:$0xff]   ;;  %v2160_v19 = vld [vmem:[%s2378_s28 + $0x180] ss:$16 sps:$4 sm:$0xff]  }
  0x51   : > { %216 = vst.msk [vmem:[#allocation2 + $0x20] sm:$0xff] %vm211_vm0, %v2265_v14  ;;  %217 = vst.msk [vmem:[#allocation2 + $0x28] sm:$0xff] %vm211_vm0, %v2265_v14  ;;  %v2161_v20 = vld [vmem:[%s2378_s28 + $0x188] ss:$16 sps:$4 sm:$0xff]   ;;  %v2162_v21 = vld [vmem:[%s2378_s28 + $0x1a4] ss:$16 sps:$4 sm:$0xff]  }
  0x52   : > { %1785 = vmatpush3.bf16.msra.mxu0 %v2082_v30  ;;  %218 = vst.msk [vmem:[#allocation2 + $0x30] sm:$0xff] %vm211_vm0, %v2265_v14  ;;  %219 = vst.msk [vmem:[#allocation2 + $0x38] sm:$0xff] %vm211_vm0, %v2265_v14  ;;  %v2164_v22 = vld [vmem:[%s2378_s28 + $0x1ac] ss:$16 sps:$4 sm:$0xff]   ;;  %v2166_v23 = vld [vmem:[%s2378_s28 + $0x1a0] ss:$16 sps:$4 sm:$0xff]  }
  0x53   : > { %1897 = vmatpush3.bf16.msra.mxu1 %v2083_v31  ;;  %220 = vst.msk [vmem:[#allocation2 + $0x40] sm:$0xff] %vm211_vm0, %v2265_v14  ;;  %221 = vst.msk [vmem:[#allocation2 + $0x48] sm:$0xff] %vm211_vm0, %v2265_v14  ;;  %v2167_v24 = vld [vmem:[%s2378_s28 + $0x1a8] ss:$16 sps:$4 sm:$0xff]   ;;  %v2168_v25 = vld [vmem:[%s2378_s28 + $0x1c4] ss:$16 sps:$4 sm:$0xff]  }
  0x54   : > { %222 = vst.msk [vmem:[#allocation2 + $0x50] sm:$0xff] %vm211_vm0, %v2265_v14  ;;  %223 = vst.msk [vmem:[#allocation2 + $0x58] sm:$0xff] %vm211_vm0, %v2265_v14  ;;  %v2170_v26 = vld [vmem:[%s2378_s28 + $0x1cc] ss:$16 sps:$4 sm:$0xff]   ;;  %v2172_v27 = vld [vmem:[%s2378_s28 + $0x1c0] ss:$16 sps:$4 sm:$0xff]  }
  0x55   : > { %949 = vmatmul.mubr.bf16.vlgmr.msra.gmra.mrb[0].mxu0 %v2084_v32  ;;  %224 = vst.msk [vmem:[#allocation2 + $0x60] sm:$0xff] %vm211_vm0, %v2265_v14  ;;  %225 = vst.msk [vmem:[#allocation2 + $0x68] sm:$0xff] %vm211_vm0, %v2265_v14  ;;  %v2173_v28 = vld [vmem:[%s2378_s28 + $0x1c8] ss:$16 sps:$4 sm:$0xff]   ;;  %v2174_v29 = vld [vmem:[%s2378_s28 + $0x1e4] ss:$16 sps:$4 sm:$0xff]  }
  0x56   : > { %1110 = vmatmul.mubr.bf16.vlgmr.msra.gmra.mrb[0].mxu1 %v2087_v34  ;;  %956 = vmatprep.mubr.bf16.mxu0 %v2090_v36  ;;  %226 = vst.msk [vmem:[#allocation2 + $0x70] sm:$0xff] %vm211_vm0, %v2265_v14  ;;  %227 = vst.msk [vmem:[#allocation2 + $0x78] sm:$0xff] %vm211_vm0, %v2265_v14  ;;  %v2176_v30 = vld [vmem:[%s2378_s28 + $0x1ec] ss:$16 sps:$4 sm:$0xff]   ;;  %v2178_v31 = vld [vmem:[%s2378_s28 + $0x1e0] ss:$16 sps:$4 sm:$0xff]  }
  0x57   : > { %1117 = vmatprep.mubr.bf16.mxu1 %v2092_v37  ;;  %228 = vst.msk [vmem:[#allocation2 + $0x80] sm:$0xff] %vm211_vm0, %v2265_v14  ;;  %229 = vst.msk [vmem:[#allocation2 + $0x88] sm:$0xff] %vm211_vm0, %v2265_v14  ;;  %v2179_v32 = vld [vmem:[%s2378_s28 + $0x1e8] ss:$16 sps:$4 sm:$0xff]  }
  0x58   : > { %230 = vst.msk [vmem:[#allocation2 + $0x90] sm:$0xff] %vm211_vm0, %v2265_v14  ;;  %231 = vst.msk [vmem:[#allocation2 + $0x98] sm:$0xff] %vm211_vm0, %v2265_v14 }
  0x59   : > { %232 = vst.msk [vmem:[#allocation2 + $0xa0] sm:$0xff] %vm211_vm0, %v2265_v14  ;;  %233 = vst.msk [vmem:[#allocation2 + $0xa8] sm:$0xff] %vm211_vm0, %v2265_v14 }
  0x5a   : > { %234 = vst.msk [vmem:[#allocation2 + $0xb0] sm:$0xff] %vm211_vm0, %v2265_v14  ;;  %235 = vst.msk [vmem:[#allocation2 + $0xb8] sm:$0xff] %vm211_vm0, %v2265_v14 }
  0x5b   : > { %236 = vst.msk [vmem:[#allocation2 + $0xc0] sm:$0xff] %vm211_vm0, %v2265_v14  ;;  %237 = vst.msk [vmem:[#allocation2 + $0xc8] sm:$0xff] %vm211_vm0, %v2265_v14 }
  0x5c   : > { %238 = vst.msk [vmem:[#allocation2 + $0xd0] sm:$0xff] %vm211_vm0, %v2265_v14  ;;  %239 = vst.msk [vmem:[#allocation2 + $0xd8] sm:$0xff] %vm211_vm0, %v2265_v14 }
  0x5d   : > { %957 = vmatmul.mubr.bf16.gmra.mrb[4].mxu0 %v2094_v38  ;;  %240 = vst.msk [vmem:[#allocation2 + $0xe0] sm:$0xff] %vm211_vm0, %v2265_v14  ;;  %241 = vst.msk [vmem:[#allocation2 + $0xe8] sm:$0xff] %vm211_vm0, %v2265_v14 }
  0x5e   : > { %1118 = vmatmul.mubr.bf16.gmra.mrb[4].mxu1 %v2095_v39  ;;  %964 = vmatprep.mubr.bf16.mxu0 %v2096_v40  ;;  %242 = vst.msk [vmem:[#allocation2 + $0xf0] sm:$0xff] %vm211_vm0, %v2265_v14  ;;  %243 = vst.msk [vmem:[#allocation2 + $0xf8] sm:$0xff] %vm211_vm0, %v2265_v14 }
  0x5f   : > { %1125 = vmatprep.mubr.bf16.mxu1 %v2098_v41 }
  0x65   : > { %965 = vmatmul.mubr.bf16.gmra.mrb[8].mxu0 %v2100_v42  ;;  %v244_v42 = vld [vmem:[#allocation2] sm:$0xff] }
  0x66   : > { %1126 = vmatmul.mubr.bf16.gmra.mrb[8].mxu1 %v2101_v43  ;;  %972 = vmatprep.mubr.bf16.mxu0 %v2102_v44 }
  0x67   : > { %1133 = vmatprep.mubr.bf16.mxu1 %v2104_v45 }
  0x6d   : > { %973 = vmatmul.mubr.bf16.gmra.mrb[12].mxu0 %v2106_v46 }
  0x6e   : > { %1134 = vmatmul.mubr.bf16.gmra.mrb[12].mxu1 %v2107_v47  ;;  %980 = vmatprep.mubr.bf16.mxu0 %v2108_v48  ;;  %v245_v47 = vld [vmem:[#allocation2 + $0x8] sm:$0xff] }
  0x6f   : > { %1141 = vmatprep.mubr.bf16.mxu1 %v2110_v49 }
  0x75   : > { %981 = vmatmul.mubr.bf16.gmra.mrb[16].mxu0 %v2112_v50 }
  0x76   : > { %1142 = vmatmul.mubr.bf16.gmra.mrb[16].mxu1 %v2113_v51  ;;  %988 = vmatprep.mubr.bf16.mxu0 %v2114_v52 }
  0x77   : > { %1149 = vmatprep.mubr.bf16.mxu1 %v2116_v53 }
  0x7d   : > { %989 = vmatmul.mubr.bf16.gmra.mrb[20].mxu0 %v2118_v54 }
  0x7e   : > { %1150 = vmatmul.mubr.bf16.gmra.mrb[20].mxu1 %v2119_v55  ;;  %996 = vmatprep.mubr.bf16.mxu0 %v2120_v56 }
  0x7f   : > { %1157 = vmatprep.mubr.bf16.mxu1 %v2122_v57 }
  0x85   : > { %997 = vmatmul.mubr.bf16.gmra.mrb[24].mxu0 %v2124_v58 }
  0x86   : > { %1158 = vmatmul.mubr.bf16.gmra.mrb[24].mxu1 %v2125_v59  ;;  %1004 = vmatprep.mubr.bf16.mxu0 %v2126_v60  ;;  %v246_v60 = vld [vmem:[#allocation2 + $0x10] sm:$0xff] }
  0x87   : > { %1165 = vmatprep.mubr.bf16.mxu1 %v2128_v61 }
  0x8d   : > { %1005 = vmatmul.mubr.bf16.gmra.mrb[28].mxu0 %v2130_v62 }
  0x8e   : > { %1166 = vmatmul.mubr.bf16.gmra.mrb[28].mxu1 %v2131_v63  ;;  %1012 = vmatprep.mubr.bf16.mxu0 %v2132_v0 }
  0x8f   : > { %1173 = vmatprep.mubr.bf16.mxu1 %v2134_v1  ;;  %v247_v1 = vld [vmem:[#allocation2 + $0x18] sm:$0xff] }
  0x95   : > { %1013 = vmatmul.mubr.bf16.gmra.mrb[32].mxu0 %v2136_v2 }
  0x96   : > { %1174 = vmatmul.mubr.bf16.gmra.mrb[32].mxu1 %v2137_v3  ;;  %1020 = vmatprep.mubr.bf16.mxu0 %v2138_v4 }
  0x97   : > { %1181 = vmatprep.mubr.bf16.mxu1 %v2140_v5 }
  0x9d   : > { %1021 = vmatmul.mubr.bf16.gmra.mrb[36].mxu0 %v2142_v6 }
  0x9e   : > { %1182 = vmatmul.mubr.bf16.gmra.mrb[36].mxu1 %v2143_v7  ;;  %1028 = vmatprep.mubr.bf16.mxu0 %v2144_v8 }
  0x9f   : > { %1189 = vmatprep.mubr.bf16.mxu1 %v2146_v9 }
  0xa5   : > { %1029 = vmatmul.mubr.bf16.gmra.mrb[40].mxu0 %v2148_v10 }
  0xa6   : > { %1190 = vmatmul.mubr.bf16.gmra.mrb[40].mxu1 %v2149_v11  ;;  %1036 = vmatprep.mubr.bf16.mxu0 %v2150_v12 }
  0xa7   : > { %1197 = vmatprep.mubr.bf16.mxu1 %v2152_v13 }
  0xad   : > { %1037 = vmatmul.mubr.bf16.gmra.mrb[44].mxu0 %v2154_v15 }
  0xae   : > { %1198 = vmatmul.mubr.bf16.gmra.mrb[44].mxu1 %v2155_v16  ;;  %1044 = vmatprep.mubr.bf16.mxu0 %v2156_v17 }
  0xaf   : > { %1205 = vmatprep.mubr.bf16.mxu1 %v2158_v18  ;;  %v248_v18 = vld [vmem:[#allocation2 + $0x20] sm:$0xff] }
  0xb5   : > { %1045 = vmatmul.mubr.bf16.gmra.mrb[48].mxu0 %v2160_v19 }
  0xb6   : > { %1206 = vmatmul.mubr.bf16.gmra.mrb[48].mxu1 %v2161_v20  ;;  %1052 = vmatprep.mubr.bf16.mxu0 %v2162_v21 }
  0xb7   : > { %1213 = vmatprep.mubr.bf16.mxu1 %v2164_v22 }
  0xbd   : > { %1053 = vmatmul.mubr.bf16.gmra.mrb[52].mxu0 %v2166_v23  ;;  %v249_v23 = vld [vmem:[#allocation2 + $0x28] sm:$0xff] }
  0xbe   : > { %1214 = vmatmul.mubr.bf16.gmra.mrb[52].mxu1 %v2167_v24  ;;  %1060 = vmatprep.mubr.bf16.mxu0 %v2168_v25 }
  0xbf   : > { %1221 = vmatprep.mubr.bf16.mxu1 %v2170_v26 }
  0xc5   : > { %1061 = vmatmul.mubr.bf16.gmra.mrb[56].mxu0 %v2172_v27 }
  0xc6   : > { %1222 = vmatmul.mubr.bf16.gmra.mrb[56].mxu1 %v2173_v28  ;;  %1068 = vmatprep.mubr.bf16.mxu0 %v2174_v29 }
  0xc7   : > { %1229 = vmatprep.mubr.bf16.mxu1 %v2176_v30 }
  0xcd   : > { %1069 = vmatmul.mubr.bf16.gmra.mrb[60].mxu0 %v2178_v31 }
  0xce   : > { %1230 = vmatmul.mubr.bf16.gmra.mrb[60].mxu1 %v2179_v32 }
 0x128   : > { %v1786_v33 = vpop.f32.mrb[0].mxu0 }
 0x129   : > { %v1898_v34 = vpop.f32.mrb[0].mxu1  ;;  %v1787_v35 = vpop.f32.mrb[1].mxu0 }
 0x12a   : > { %v1788_v36 = vadd.f32 %v1787_v35, %v1786_v33  ;;  %v1899_v37 = vpop.f32.mrb[1].mxu1  ;;  %v1789_v38 = vpop.f32.mrb[2].mxu0 }
 0x12b   : > { %v1900_v39 = vadd.f32 %v1899_v37, %v1898_v34  ;;  %v1901_v40 = vpop.f32.mrb[2].mxu1  ;;  %v1790_v41 = vpop.f32.mrb[3].mxu0 }
 0x12c   : > { %v1791_v43 = vadd.f32 %v1790_v41, %v1789_v38  ;;  %v1902_v44 = vpop.f32.mrb[3].mxu1 }
 0x12d   : > { %v1112_v45 = vadd.f32 %v1900_v39, %v1788_v36  ;;  %v1903_v46 = vadd.f32 %v1902_v44, %v1901_v40  ;;  %v250_v40 = vld [vmem:[#allocation2 + $0x30] sm:$0xff] }
 0x12f   : > { %v1238_v48 = vadd.f32 %v1112_v45, %v244_v42  ;;  %v1115_v49 = vadd.f32 %v1903_v46, %v1791_v43  ;;  %v251_v45 = vld [vmem:[#allocation2 + $0x38] sm:$0xff] }
 0x130   : > { %v1792_v50 = vpop.f32.mrb[4].mxu0 }
 0x131   : > { %1271 = vst.msk [vmem:[#allocation2] sm:$0xff] %vm211_vm0, %v1238_v48  ;;  %v1239_v51 = vadd.f32 %v1115_v49, %v245_v47  ;;  %v1904_v52 = vpop.f32.mrb[4].mxu1  ;;  %v1793_v53 = vpop.f32.mrb[5].mxu0 }
 0x132   : > { %v1794_v54 = vadd.f32 %v1793_v53, %v1792_v50  ;;  %v1905_v55 = vpop.f32.mrb[5].mxu1  ;;  %v1795_v56 = vpop.f32.mrb[6].mxu0 }
 0x133   : > { %1272 = vst.msk [vmem:[#allocation2 + $0x8] sm:$0xff] %vm211_vm0, %v1239_v51  ;;  %v1906_v57 = vadd.f32 %v1905_v55, %v1904_v52  ;;  %v1907_v58 = vpop.f32.mrb[6].mxu1  ;;  %v1796_v59 = vpop.f32.mrb[7].mxu0 }
 0x134   : > { %v1797_v61 = vadd.f32 %v1796_v59, %v1795_v56  ;;  %v1908_v62 = vpop.f32.mrb[7].mxu1 }
 0x135   : > { %v1120_v63 = vadd.f32 %v1906_v57, %v1794_v54  ;;  %v1909_v0 = vadd.f32 %v1908_v62, %v1907_v58  ;;  %v252_v62 = vld [vmem:[#allocation2 + $0x40] sm:$0xff] }
 0x137   : > { %v1240_v2 = vadd.f32 %v1120_v63, %v246_v60  ;;  %v1123_v3 = vadd.f32 %v1909_v0, %v1797_v61 }
 0x138   : > { %v1306_v4 = vld [vmem:[#allocation2] sm:$0xff]  ;;  %v1798_v5 = vpop.f32.mrb[8].mxu0 }
 0x139   : > { %v1738_v6 = vpack.c.bf16 %v1306_v4, %v1306_v4  ;;  %1273 = vst.msk [vmem:[#allocation2 + $0x10] sm:$0xff] %vm211_vm0, %v1240_v2  ;;  %v1241_v7 = vadd.f32 %v1123_v3, %v247_v1  ;;  %v1910_v8 = vpop.f32.mrb[8].mxu1  ;;  %v1799_v9 = vpop.f32.mrb[9].mxu0  ;;  %v253_v3 = vld [vmem:[#allocation2 + $0x48] sm:$0xff] }
 0x13a   : > { %v1307_v10 = vld [vmem:[#allocation2 + $0x8] sm:$0xff]  ;;  %v1800_v11 = vadd.f32 %v1799_v9, %v1798_v5  ;;  %v1911_v12 = vpop.f32.mrb[9].mxu1  ;;  %v1801_v13 = vpop.f32.mrb[10].mxu0 }
 0x13b   : > { %1467 = vst.msk [vmem:[%s2582_s6] sm:$0xf] %vm1466_vm1, %v1738_v6  ;;  %v1739_v14 = vpack.c.bf16 %v1307_v10, %v1307_v10  ;;  %v1912_v15 = vadd.f32 %v1911_v12, %v1910_v8  ;;  %v1913_v16 = vpop.f32.mrb[10].mxu1  ;;  %v1802_v17 = vpop.f32.mrb[11].mxu0 }
 0x13c   : > { %1274 = vst.msk [vmem:[#allocation2 + $0x18] sm:$0xff] %vm211_vm0, %v1241_v7  ;;  %v1803_v19 = vadd.f32 %v1802_v17, %v1801_v13  ;;  %v1914_v20 = vpop.f32.mrb[11].mxu1 }
 0x13d   : > { %1468 = vst.msk [vmem:[%s2582_s6 + $0x4] sm:$0xf] %vm1466_vm1, %v1739_v14  ;;  %v1128_v21 = vadd.f32 %v1912_v15, %v1800_v11  ;;  %v1915_v22 = vadd.f32 %v1914_v20, %v1913_v16  ;;  %v254_v20 = vld [vmem:[#allocation2 + $0x50] sm:$0xff] }
 0x13f   : > { %v1242_v24 = vadd.f32 %v1128_v21, %v248_v18  ;;  %v1131_v25 = vadd.f32 %v1915_v22, %v1803_v19 }
 0x140   : > { %v1308_v26 = vld [vmem:[#allocation2 + $0x10] sm:$0xff]  ;;  %v1804_v27 = vpop.f32.mrb[12].mxu0 }
 0x141   : > { %v1740_v28 = vpack.c.bf16 %v1308_v26, %v1308_v26  ;;  %1275 = vst.msk [vmem:[#allocation2 + $0x20] sm:$0xff] %vm211_vm0, %v1242_v24  ;;  %v1243_v29 = vadd.f32 %v1131_v25, %v249_v23  ;;  %v1916_v30 = vpop.f32.mrb[12].mxu1  ;;  %v1805_v31 = vpop.f32.mrb[13].mxu0  ;;  %v255_v25 = vld [vmem:[#allocation2 + $0x58] sm:$0xff] }
 0x142   : > { %v1806_v33 = vadd.f32 %v1805_v31, %v1804_v27  ;;  %v1917_v34 = vpop.f32.mrb[13].mxu1  ;;  %v1807_v35 = vpop.f32.mrb[14].mxu0 }
 0x143   : > { %v1309_v32 = vld [vmem:[#allocation2 + $0x18] sm:$0xff]  ;;  %1469 = vst.msk [vmem:[%s2582_s6 + $0x8] sm:$0xf] %vm1466_vm1, %v1740_v28  ;;  %v1918_v37 = vadd.f32 %v1917_v34, %v1916_v30  ;;  %v1919_v38 = vpop.f32.mrb[14].mxu1  ;;  %v1808_v39 = vpop.f32.mrb[15].mxu0 }
 0x144   : > { %v1741_v36 = vpack.c.bf16 %v1309_v32, %v1309_v32  ;;  %1276 = vst.msk [vmem:[#allocation2 + $0x28] sm:$0xff] %vm211_vm0, %v1243_v29  ;;  %v1809_v41 = vadd.f32 %v1808_v39, %v1807_v35  ;;  %v1920_v42 = vpop.f32.mrb[15].mxu1 }
 0x145   : > { %v1136_v43 = vadd.f32 %v1918_v37, %v1806_v33  ;;  %v1921_v44 = vadd.f32 %v1920_v42, %v1919_v38  ;;  %v256_v42 = vld [vmem:[#allocation2 + $0x60] sm:$0xff] }
 0x146   : > { %1470 = vst.msk [vmem:[%s2582_s6 + $0xc] sm:$0xf] %vm1466_vm1, %v1741_v36 }
 0x147   : > { %v1244_v46 = vadd.f32 %v1136_v43, %v250_v40  ;;  %v1139_v47 = vadd.f32 %v1921_v44, %v1809_v41 }
 0x148   : > { %v1310_v48 = vld [vmem:[#allocation2 + $0x20] sm:$0xff]  ;;  %v1810_v49 = vpop.f32.mrb[16].mxu0 }
 0x149   : > { %v1742_v50 = vpack.c.bf16 %v1310_v48, %v1310_v48  ;;  %1277 = vst.msk [vmem:[#allocation2 + $0x30] sm:$0xff] %vm211_vm0, %v1244_v46  ;;  %v1245_v51 = vadd.f32 %v1139_v47, %v251_v45  ;;  %v1922_v52 = vpop.f32.mrb[16].mxu1  ;;  %v1811_v53 = vpop.f32.mrb[17].mxu0  ;;  %v257_v47 = vld [vmem:[#allocation2 + $0x68] sm:$0xff] }
 0x14a   : > { %v1812_v55 = vadd.f32 %v1811_v53, %v1810_v49  ;;  %v1923_v56 = vpop.f32.mrb[17].mxu1  ;;  %v1813_v57 = vpop.f32.mrb[18].mxu0 }
 0x14b   : > { %v1311_v54 = vld [vmem:[#allocation2 + $0x28] sm:$0xff]  ;;  %1471 = vst.msk [vmem:[%s2582_s6 + $0x10] sm:$0xf] %vm1466_vm1, %v1742_v50  ;;  %v1924_v59 = vadd.f32 %v1923_v56, %v1922_v52  ;;  %v1925_v60 = vpop.f32.mrb[18].mxu1  ;;  %v1814_v61 = vpop.f32.mrb[19].mxu0 }
 0x14c   : > { %v1743_v58 = vpack.c.bf16 %v1311_v54, %v1311_v54  ;;  %1278 = vst.msk [vmem:[#allocation2 + $0x38] sm:$0xff] %vm211_vm0, %v1245_v51  ;;  %v1815_v63 = vadd.f32 %v1814_v61, %v1813_v57  ;;  %v1926_v0 = vpop.f32.mrb[19].mxu1 }
 0x14d   : > { %v1144_v1 = vadd.f32 %v1924_v59, %v1812_v55  ;;  %v1927_v2 = vadd.f32 %v1926_v0, %v1925_v60  ;;  %v258_v0 = vld [vmem:[#allocation2 + $0x70] sm:$0xff] }
 0x14e   : > { %1472 = vst.msk [vmem:[%s2582_s6 + $0x14] sm:$0xf] %vm1466_vm1, %v1743_v58 }
 0x14f   : > { %v1246_v4 = vadd.f32 %v1144_v1, %v252_v62  ;;  %v1147_v5 = vadd.f32 %v1927_v2, %v1815_v63 }
 0x150   : > { %v1312_v6 = vld [vmem:[#allocation2 + $0x30] sm:$0xff]  ;;  %v1816_v7 = vpop.f32.mrb[20].mxu0 }
 0x151   : > { %v1744_v8 = vpack.c.bf16 %v1312_v6, %v1312_v6  ;;  %1279 = vst.msk [vmem:[#allocation2 + $0x40] sm:$0xff] %vm211_vm0, %v1246_v4  ;;  %v1247_v9 = vadd.f32 %v1147_v5, %v253_v3  ;;  %v1928_v10 = vpop.f32.mrb[20].mxu1  ;;  %v1817_v11 = vpop.f32.mrb[21].mxu0  ;;  %v259_v5 = vld [vmem:[#allocation2 + $0x78] sm:$0xff] }
 0x152   : > { %v1818_v13 = vadd.f32 %v1817_v11, %v1816_v7  ;;  %v1929_v14 = vpop.f32.mrb[21].mxu1  ;;  %v1819_v15 = vpop.f32.mrb[22].mxu0 }
 0x153   : > { %v1313_v12 = vld [vmem:[#allocation2 + $0x38] sm:$0xff]  ;;  %1473 = vst.msk [vmem:[%s2582_s6 + $0x18] sm:$0xf] %vm1466_vm1, %v1744_v8  ;;  %v1930_v17 = vadd.f32 %v1929_v14, %v1928_v10  ;;  %v1931_v18 = vpop.f32.mrb[22].mxu1  ;;  %v1820_v19 = vpop.f32.mrb[23].mxu0 }
 0x154   : > { %v1745_v16 = vpack.c.bf16 %v1313_v12, %v1313_v12  ;;  %1280 = vst.msk [vmem:[#allocation2 + $0x48] sm:$0xff] %vm211_vm0, %v1247_v9  ;;  %v1821_v21 = vadd.f32 %v1820_v19, %v1819_v15  ;;  %v1932_v22 = vpop.f32.mrb[23].mxu1 }
 0x155   : > { %v1152_v23 = vadd.f32 %v1930_v17, %v1818_v13  ;;  %v1933_v24 = vadd.f32 %v1932_v22, %v1931_v18  ;;  %v260_v22 = vld [vmem:[#allocation2 + $0x80] sm:$0xff] }
 0x156   : > { %1474 = vst.msk [vmem:[%s2582_s6 + $0x1c] sm:$0xf] %vm1466_vm1, %v1745_v16 }
 0x157   : > { %v1248_v26 = vadd.f32 %v1152_v23, %v254_v20  ;;  %v1155_v27 = vadd.f32 %v1933_v24, %v1821_v21 }
 0x158   : > { %v1314_v28 = vld [vmem:[#allocation2 + $0x40] sm:$0xff]  ;;  %v1822_v29 = vpop.f32.mrb[24].mxu0 }
 0x159   : > { %v1746_v30 = vpack.c.bf16 %v1314_v28, %v1314_v28  ;;  %1281 = vst.msk [vmem:[#allocation2 + $0x50] sm:$0xff] %vm211_vm0, %v1248_v26  ;;  %v1249_v31 = vadd.f32 %v1155_v27, %v255_v25  ;;  %v1934_v32 = vpop.f32.mrb[24].mxu1  ;;  %v1823_v33 = vpop.f32.mrb[25].mxu0  ;;  %v261_v27 = vld [vmem:[#allocation2 + $0x88] sm:$0xff] }
 0x15a   : > { %v1824_v35 = vadd.f32 %v1823_v33, %v1822_v29  ;;  %v1935_v36 = vpop.f32.mrb[25].mxu1  ;;  %v1825_v37 = vpop.f32.mrb[26].mxu0 }
 0x15b   : > { %v1315_v34 = vld [vmem:[#allocation2 + $0x48] sm:$0xff]  ;;  %1475 = vst.msk [vmem:[%s2582_s6 + $0x20] sm:$0xf] %vm1466_vm1, %v1746_v30  ;;  %v1936_v39 = vadd.f32 %v1935_v36, %v1934_v32  ;;  %v1937_v40 = vpop.f32.mrb[26].mxu1  ;;  %v1826_v41 = vpop.f32.mrb[27].mxu0 }
 0x15c   : > { %v1747_v38 = vpack.c.bf16 %v1315_v34, %v1315_v34  ;;  %1282 = vst.msk [vmem:[#allocation2 + $0x58] sm:$0xff] %vm211_vm0, %v1249_v31  ;;  %v1827_v43 = vadd.f32 %v1826_v41, %v1825_v37  ;;  %v1938_v44 = vpop.f32.mrb[27].mxu1 }
 0x15d   : > { %v1160_v45 = vadd.f32 %v1936_v39, %v1824_v35  ;;  %v1939_v46 = vadd.f32 %v1938_v44, %v1937_v40  ;;  %v262_v44 = vld [vmem:[#allocation2 + $0x90] sm:$0xff] }
 0x15e   : > { %1476 = vst.msk [vmem:[%s2582_s6 + $0x24] sm:$0xf] %vm1466_vm1, %v1747_v38 }
 0x15f   : > { %v1250_v48 = vadd.f32 %v1160_v45, %v256_v42  ;;  %v1163_v49 = vadd.f32 %v1939_v46, %v1827_v43 }
 0x160   : > { %v1316_v50 = vld [vmem:[#allocation2 + $0x50] sm:$0xff]  ;;  %v1828_v51 = vpop.f32.mrb[28].mxu0 }
 0x161   : > { %v1748_v52 = vpack.c.bf16 %v1316_v50, %v1316_v50  ;;  %1283 = vst.msk [vmem:[#allocation2 + $0x60] sm:$0xff] %vm211_vm0, %v1250_v48  ;;  %v1251_v53 = vadd.f32 %v1163_v49, %v257_v47  ;;  %v1940_v54 = vpop.f32.mrb[28].mxu1  ;;  %v1829_v55 = vpop.f32.mrb[29].mxu0  ;;  %v263_v49 = vld [vmem:[#allocation2 + $0x98] sm:$0xff] }
 0x162   : > { %v1830_v57 = vadd.f32 %v1829_v55, %v1828_v51  ;;  %v1941_v58 = vpop.f32.mrb[29].mxu1  ;;  %v1831_v59 = vpop.f32.mrb[30].mxu0 }
 0x163   : > { %v1317_v56 = vld [vmem:[#allocation2 + $0x58] sm:$0xff]  ;;  %1477 = vst.msk [vmem:[%s2582_s6 + $0x28] sm:$0xf] %vm1466_vm1, %v1748_v52  ;;  %v1942_v61 = vadd.f32 %v1941_v58, %v1940_v54  ;;  %v1943_v62 = vpop.f32.mrb[30].mxu1  ;;  %v1832_v63 = vpop.f32.mrb[31].mxu0 }
 0x164   : > { %v1749_v60 = vpack.c.bf16 %v1317_v56, %v1317_v56  ;;  %1284 = vst.msk [vmem:[#allocation2 + $0x68] sm:$0xff] %vm211_vm0, %v1251_v53  ;;  %v1833_v1 = vadd.f32 %v1832_v63, %v1831_v59  ;;  %v1944_v2 = vpop.f32.mrb[31].mxu1 }
 0x165   : > { %v1168_v3 = vadd.f32 %v1942_v61, %v1830_v57  ;;  %v1945_v4 = vadd.f32 %v1944_v2, %v1943_v62  ;;  %v264_v2 = vld [vmem:[#allocation2 + $0xa0] sm:$0xff] }
 0x166   : > { %1478 = vst.msk [vmem:[%s2582_s6 + $0x2c] sm:$0xf] %vm1466_vm1, %v1749_v60 }
 0x167   : > { %v1252_v6 = vadd.f32 %v1168_v3, %v258_v0  ;;  %v1171_v7 = vadd.f32 %v1945_v4, %v1833_v1 }
 0x168   : > { %v1318_v8 = vld [vmem:[#allocation2 + $0x60] sm:$0xff]  ;;  %v1834_v9 = vpop.f32.mrb[32].mxu0 }
 0x169   : > { %v1750_v10 = vpack.c.bf16 %v1318_v8, %v1318_v8  ;;  %1285 = vst.msk [vmem:[#allocation2 + $0x70] sm:$0xff] %vm211_vm0, %v1252_v6  ;;  %v1253_v11 = vadd.f32 %v1171_v7, %v259_v5  ;;  %v1946_v12 = vpop.f32.mrb[32].mxu1  ;;  %v1835_v13 = vpop.f32.mrb[33].mxu0  ;;  %v265_v7 = vld [vmem:[#allocation2 + $0xa8] sm:$0xff] }
 0x16a   : > { %v1836_v15 = vadd.f32 %v1835_v13, %v1834_v9  ;;  %v1947_v16 = vpop.f32.mrb[33].mxu1  ;;  %v1837_v17 = vpop.f32.mrb[34].mxu0 }
 0x16b   : > { %v1319_v14 = vld [vmem:[#allocation2 + $0x68] sm:$0xff]  ;;  %1479 = vst.msk [vmem:[%s2582_s6 + $0x30] sm:$0xf] %vm1466_vm1, %v1750_v10  ;;  %v1948_v19 = vadd.f32 %v1947_v16, %v1946_v12  ;;  %v1949_v20 = vpop.f32.mrb[34].mxu1  ;;  %v1838_v21 = vpop.f32.mrb[35].mxu0 }
 0x16c   : > { %v1751_v18 = vpack.c.bf16 %v1319_v14, %v1319_v14  ;;  %1286 = vst.msk [vmem:[#allocation2 + $0x78] sm:$0xff] %vm211_vm0, %v1253_v11  ;;  %v1839_v23 = vadd.f32 %v1838_v21, %v1837_v17  ;;  %v1950_v24 = vpop.f32.mrb[35].mxu1 }
 0x16d   : > { %v1176_v25 = vadd.f32 %v1948_v19, %v1836_v15  ;;  %v1951_v26 = vadd.f32 %v1950_v24, %v1949_v20  ;;  %v266_v24 = vld [vmem:[#allocation2 + $0xb0] sm:$0xff] }
 0x16e   : > { %1480 = vst.msk [vmem:[%s2582_s6 + $0x34] sm:$0xf] %vm1466_vm1, %v1751_v18 }
 0x16f   : > { %v1254_v28 = vadd.f32 %v1176_v25, %v260_v22  ;;  %v1179_v29 = vadd.f32 %v1951_v26, %v1839_v23 }
 0x170   : > { %v1320_v30 = vld [vmem:[#allocation2 + $0x70] sm:$0xff]  ;;  %v1840_v31 = vpop.f32.mrb[36].mxu0 }
 0x171   : > { %v1752_v32 = vpack.c.bf16 %v1320_v30, %v1320_v30  ;;  %1287 = vst.msk [vmem:[#allocation2 + $0x80] sm:$0xff] %vm211_vm0, %v1254_v28  ;;  %v1255_v33 = vadd.f32 %v1179_v29, %v261_v27  ;;  %v1952_v34 = vpop.f32.mrb[36].mxu1  ;;  %v1841_v35 = vpop.f32.mrb[37].mxu0  ;;  %v267_v29 = vld [vmem:[#allocation2 + $0xb8] sm:$0xff] }
 0x172   : > { %v1842_v37 = vadd.f32 %v1841_v35, %v1840_v31  ;;  %v1953_v38 = vpop.f32.mrb[37].mxu1  ;;  %v1843_v39 = vpop.f32.mrb[38].mxu0 }
 0x173   : > { %v1321_v36 = vld [vmem:[#allocation2 + $0x78] sm:$0xff]  ;;  %1481 = vst.msk [vmem:[%s2582_s6 + $0x38] sm:$0xf] %vm1466_vm1, %v1752_v32  ;;  %v1954_v41 = vadd.f32 %v1953_v38, %v1952_v34  ;;  %v1955_v42 = vpop.f32.mrb[38].mxu1  ;;  %v1844_v43 = vpop.f32.mrb[39].mxu0 }
 0x174   : > { %v1753_v40 = vpack.c.bf16 %v1321_v36, %v1321_v36  ;;  %1288 = vst.msk [vmem:[#allocation2 + $0x88] sm:$0xff] %vm211_vm0, %v1255_v33  ;;  %v1845_v45 = vadd.f32 %v1844_v43, %v1843_v39  ;;  %v1956_v46 = vpop.f32.mrb[39].mxu1 }
 0x175   : > { %v1184_v47 = vadd.f32 %v1954_v41, %v1842_v37  ;;  %v1957_v48 = vadd.f32 %v1956_v46, %v1955_v42  ;;  %v268_v46 = vld [vmem:[#allocation2 + $0xc0] sm:$0xff] }
 0x176   : > { %1482 = vst.msk [vmem:[%s2582_s6 + $0x3c] sm:$0xf] %vm1466_vm1, %v1753_v40 }
 0x177   : > { %v1256_v50 = vadd.f32 %v1184_v47, %v262_v44  ;;  %v1187_v51 = vadd.f32 %v1957_v48, %v1845_v45 }
 0x178   : > { %v1322_v52 = vld [vmem:[#allocation2 + $0x80] sm:$0xff]  ;;  %v1846_v53 = vpop.f32.mrb[40].mxu0 }
 0x179   : > { %v1754_v54 = vpack.c.bf16 %v1322_v52, %v1322_v52  ;;  %1289 = vst.msk [vmem:[#allocation2 + $0x90] sm:$0xff] %vm211_vm0, %v1256_v50  ;;  %v1257_v55 = vadd.f32 %v1187_v51, %v263_v49  ;;  %v1958_v56 = vpop.f32.mrb[40].mxu1  ;;  %v1847_v57 = vpop.f32.mrb[41].mxu0  ;;  %v269_v51 = vld [vmem:[#allocation2 + $0xc8] sm:$0xff] }
 0x17a   : > { %v1848_v59 = vadd.f32 %v1847_v57, %v1846_v53  ;;  %v1959_v60 = vpop.f32.mrb[41].mxu1  ;;  %v1849_v61 = vpop.f32.mrb[42].mxu0 }
 0x17b   : > { %v1323_v58 = vld [vmem:[#allocation2 + $0x88] sm:$0xff]  ;;  %1483 = vst.msk [vmem:[%s2582_s6 + $0x40] sm:$0xf] %vm1466_vm1, %v1754_v54  ;;  %v1960_v63 = vadd.f32 %v1959_v60, %v1958_v56  ;;  %v1961_v0 = vpop.f32.mrb[42].mxu1  ;;  %v1850_v1 = vpop.f32.mrb[43].mxu0 }
 0x17c   : > { %v1755_v62 = vpack.c.bf16 %v1323_v58, %v1323_v58  ;;  %1290 = vst.msk [vmem:[#allocation2 + $0x98] sm:$0xff] %vm211_vm0, %v1257_v55  ;;  %v1851_v3 = vadd.f32 %v1850_v1, %v1849_v61  ;;  %v1962_v4 = vpop.f32.mrb[43].mxu1 }
 0x17d   : > { %v1192_v5 = vadd.f32 %v1960_v63, %v1848_v59  ;;  %v1963_v6 = vadd.f32 %v1962_v4, %v1961_v0  ;;  %v270_v4 = vld [vmem:[#allocation2 + $0xd0] sm:$0xff] }
 0x17e   : > { %1484 = vst.msk [vmem:[%s2582_s6 + $0x44] sm:$0xf] %vm1466_vm1, %v1755_v62 }
 0x17f   : > { %v1258_v8 = vadd.f32 %v1192_v5, %v264_v2  ;;  %v1195_v9 = vadd.f32 %v1963_v6, %v1851_v3 }
 0x180   : > { %v1324_v10 = vld [vmem:[#allocation2 + $0x90] sm:$0xff]  ;;  %v1852_v11 = vpop.f32.mrb[44].mxu0 }
 0x181   : > { %v1756_v12 = vpack.c.bf16 %v1324_v10, %v1324_v10  ;;  %1291 = vst.msk [vmem:[#allocation2 + $0xa0] sm:$0xff] %vm211_vm0, %v1258_v8  ;;  %v1259_v13 = vadd.f32 %v1195_v9, %v265_v7  ;;  %v1964_v14 = vpop.f32.mrb[44].mxu1  ;;  %v1853_v15 = vpop.f32.mrb[45].mxu0  ;;  %v271_v9 = vld [vmem:[#allocation2 + $0xd8] sm:$0xff] }
 0x182   : > { %v1854_v17 = vadd.f32 %v1853_v15, %v1852_v11  ;;  %v1965_v18 = vpop.f32.mrb[45].mxu1  ;;  %v1855_v19 = vpop.f32.mrb[46].mxu0 }
 0x183   : > { %v1325_v16 = vld [vmem:[#allocation2 + $0x98] sm:$0xff]  ;;  %1485 = vst.msk [vmem:[%s2582_s6 + $0x48] sm:$0xf] %vm1466_vm1, %v1756_v12  ;;  %v1966_v21 = vadd.f32 %v1965_v18, %v1964_v14  ;;  %v1967_v22 = vpop.f32.mrb[46].mxu1  ;;  %v1856_v23 = vpop.f32.mrb[47].mxu0 }
 0x184   : > { %v1757_v20 = vpack.c.bf16 %v1325_v16, %v1325_v16  ;;  %1292 = vst.msk [vmem:[#allocation2 + $0xa8] sm:$0xff] %vm211_vm0, %v1259_v13  ;;  %v1857_v25 = vadd.f32 %v1856_v23, %v1855_v19  ;;  %v1968_v26 = vpop.f32.mrb[47].mxu1 }
 0x185   : > { %v1200_v27 = vadd.f32 %v1966_v21, %v1854_v17  ;;  %v1969_v28 = vadd.f32 %v1968_v26, %v1967_v22  ;;  %v272_v26 = vld [vmem:[#allocation2 + $0xe0] sm:$0xff] }
 0x186   : > { %1486 = vst.msk [vmem:[%s2582_s6 + $0x4c] sm:$0xf] %vm1466_vm1, %v1757_v20 }
 0x187   : > { %v1260_v30 = vadd.f32 %v1200_v27, %v266_v24  ;;  %v1203_v31 = vadd.f32 %v1969_v28, %v1857_v25 }
 0x188   : > { %v1326_v32 = vld [vmem:[#allocation2 + $0xa0] sm:$0xff]  ;;  %v1858_v33 = vpop.f32.mrb[48].mxu0 }
 0x189   : > { %v1758_v34 = vpack.c.bf16 %v1326_v32, %v1326_v32  ;;  %1293 = vst.msk [vmem:[#allocation2 + $0xb0] sm:$0xff] %vm211_vm0, %v1260_v30  ;;  %v1261_v35 = vadd.f32 %v1203_v31, %v267_v29  ;;  %v1970_v36 = vpop.f32.mrb[48].mxu1  ;;  %v1859_v37 = vpop.f32.mrb[49].mxu0  ;;  %v273_v31 = vld [vmem:[#allocation2 + $0xe8] sm:$0xff] }
 0x18a   : > { %v1860_v39 = vadd.f32 %v1859_v37, %v1858_v33  ;;  %v1971_v40 = vpop.f32.mrb[49].mxu1  ;;  %v1861_v41 = vpop.f32.mrb[50].mxu0 }
 0x18b   : > { %v1327_v38 = vld [vmem:[#allocation2 + $0xa8] sm:$0xff]  ;;  %1487 = vst.msk [vmem:[%s2582_s6 + $0x50] sm:$0xf] %vm1466_vm1, %v1758_v34  ;;  %v1972_v43 = vadd.f32 %v1971_v40, %v1970_v36  ;;  %v1973_v44 = vpop.f32.mrb[50].mxu1  ;;  %v1862_v45 = vpop.f32.mrb[51].mxu0 }
 0x18c   : > { %v1759_v42 = vpack.c.bf16 %v1327_v38, %v1327_v38  ;;  %1294 = vst.msk [vmem:[#allocation2 + $0xb8] sm:$0xff] %vm211_vm0, %v1261_v35  ;;  %v1863_v47 = vadd.f32 %v1862_v45, %v1861_v41  ;;  %v1974_v48 = vpop.f32.mrb[51].mxu1 }
 0x18d   : > { %v1208_v49 = vadd.f32 %v1972_v43, %v1860_v39  ;;  %v1975_v50 = vadd.f32 %v1974_v48, %v1973_v44  ;;  %v274_v48 = vld [vmem:[#allocation2 + $0xf0] sm:$0xff] }
 0x18e   : > { %1488 = vst.msk [vmem:[%s2582_s6 + $0x54] sm:$0xf] %vm1466_vm1, %v1759_v42 }
 0x18f   : > { %v1262_v52 = vadd.f32 %v1208_v49, %v268_v46  ;;  %v1211_v53 = vadd.f32 %v1975_v50, %v1863_v47 }
 0x190   : > { %v1328_v54 = vld [vmem:[#allocation2 + $0xb0] sm:$0xff]  ;;  %v1864_v55 = vpop.f32.mrb[52].mxu0 }
 0x191   : > { %v1760_v56 = vpack.c.bf16 %v1328_v54, %v1328_v54  ;;  %1295 = vst.msk [vmem:[#allocation2 + $0xc0] sm:$0xff] %vm211_vm0, %v1262_v52  ;;  %v1263_v57 = vadd.f32 %v1211_v53, %v269_v51  ;;  %v1976_v58 = vpop.f32.mrb[52].mxu1  ;;  %v1865_v59 = vpop.f32.mrb[53].mxu0  ;;  %v275_v53 = vld [vmem:[#allocation2 + $0xf8] sm:$0xff] }
 0x192   : > { %v1866_v61 = vadd.f32 %v1865_v59, %v1864_v55  ;;  %v1977_v62 = vpop.f32.mrb[53].mxu1  ;;  %v1867_v63 = vpop.f32.mrb[54].mxu0 }
 0x193   : > { %v1329_v60 = vld [vmem:[#allocation2 + $0xb8] sm:$0xff]  ;;  %1489 = vst.msk [vmem:[%s2582_s6 + $0x58] sm:$0xf] %vm1466_vm1, %v1760_v56  ;;  %v1978_v1 = vadd.f32 %v1977_v62, %v1976_v58  ;;  %v1979_v2 = vpop.f32.mrb[54].mxu1  ;;  %v1868_v3 = vpop.f32.mrb[55].mxu0 }
 0x194   : > { %v1761_v0 = vpack.c.bf16 %v1329_v60, %v1329_v60  ;;  %1296 = vst.msk [vmem:[#allocation2 + $0xc8] sm:$0xff] %vm211_vm0, %v1263_v57  ;;  %v1869_v5 = vadd.f32 %v1868_v3, %v1867_v63  ;;  %v1980_v6 = vpop.f32.mrb[55].mxu1 }
 0x195   : > { %v1216_v7 = vadd.f32 %v1978_v1, %v1866_v61  ;;  %v1981_v8 = vadd.f32 %v1980_v6, %v1979_v2 }
 0x196   : > { %1490 = vst.msk [vmem:[%s2582_s6 + $0x5c] sm:$0xf] %vm1466_vm1, %v1761_v0 }
 0x197   : > { %v1264_v10 = vadd.f32 %v1216_v7, %v270_v4  ;;  %v1219_v11 = vadd.f32 %v1981_v8, %v1869_v5 }
 0x198   : > { %v1330_v12 = vld [vmem:[#allocation2 + $0xc0] sm:$0xff]  ;;  %v1870_v13 = vpop.f32.mrb[56].mxu0 }
 0x199   : > { %v1762_v14 = vpack.c.bf16 %v1330_v12, %v1330_v12  ;;  %1297 = vst.msk [vmem:[#allocation2 + $0xd0] sm:$0xff] %vm211_vm0, %v1264_v10  ;;  %v1265_v15 = vadd.f32 %v1219_v11, %v271_v9  ;;  %v1982_v16 = vpop.f32.mrb[56].mxu1  ;;  %v1871_v17 = vpop.f32.mrb[57].mxu0 }
 0x19a   : > { %v1872_v19 = vadd.f32 %v1871_v17, %v1870_v13  ;;  %v1983_v20 = vpop.f32.mrb[57].mxu1  ;;  %v1873_v21 = vpop.f32.mrb[58].mxu0 }
 0x19b   : > { %v1331_v18 = vld [vmem:[#allocation2 + $0xc8] sm:$0xff]  ;;  %1491 = vst.msk [vmem:[%s2582_s6 + $0x60] sm:$0xf] %vm1466_vm1, %v1762_v14  ;;  %v1984_v23 = vadd.f32 %v1983_v20, %v1982_v16  ;;  %v1985_v24 = vpop.f32.mrb[58].mxu1  ;;  %v1874_v25 = vpop.f32.mrb[59].mxu0 }
 0x19c   : > { %v1763_v22 = vpack.c.bf16 %v1331_v18, %v1331_v18  ;;  %1298 = vst.msk [vmem:[#allocation2 + $0xd8] sm:$0xff] %vm211_vm0, %v1265_v15  ;;  %v1875_v27 = vadd.f32 %v1874_v25, %v1873_v21  ;;  %v1986_v28 = vpop.f32.mrb[59].mxu1 }
 0x19d   : > { %v1224_v29 = vadd.f32 %v1984_v23, %v1872_v19  ;;  %v1987_v30 = vadd.f32 %v1986_v28, %v1985_v24 }
 0x19e   : > { %1492 = vst.msk [vmem:[%s2582_s6 + $0x64] sm:$0xf] %vm1466_vm1, %v1763_v22 }
 0x19f   : > { %v1266_v32 = vadd.f32 %v1224_v29, %v272_v26  ;;  %v1227_v33 = vadd.f32 %v1987_v30, %v1875_v27 }
 0x1a0   : > { %v1332_v34 = vld [vmem:[#allocation2 + $0xd0] sm:$0xff]  ;;  %v1876_v35 = vpop.f32.mrb[60].mxu0 }
 0x1a1   : > { %v1764_v36 = vpack.c.bf16 %v1332_v34, %v1332_v34  ;;  %1299 = vst.msk [vmem:[#allocation2 + $0xe0] sm:$0xff] %vm211_vm0, %v1266_v32  ;;  %v1267_v37 = vadd.f32 %v1227_v33, %v273_v31  ;;  %v1988_v38 = vpop.f32.mrb[60].mxu1  ;;  %v1877_v39 = vpop.f32.mrb[61].mxu0 }
 0x1a2   : > { %v1878_v41 = vadd.f32 %v1877_v39, %v1876_v35  ;;  %v1989_v42 = vpop.f32.mrb[61].mxu1  ;;  %v1879_v43 = vpop.f32.mrb[62].mxu0 }
 0x1a3   : > { %v1333_v40 = vld [vmem:[#allocation2 + $0xd8] sm:$0xff]  ;;  %1493 = vst.msk [vmem:[%s2582_s6 + $0x68] sm:$0xf] %vm1466_vm1, %v1764_v36  ;;  %v1990_v45 = vadd.f32 %v1989_v42, %v1988_v38  ;;  %v1991_v46 = vpop.f32.mrb[62].mxu1  ;;  %v1880_v47 = vpop.f32.mrb[63].mxu0 }
 0x1a4   : > { %v1765_v44 = vpack.c.bf16 %v1333_v40, %v1333_v40  ;;  %1300 = vst.msk [vmem:[#allocation2 + $0xe8] sm:$0xff] %vm211_vm0, %v1267_v37  ;;  %v1881_v49 = vadd.f32 %v1880_v47, %v1879_v43  ;;  %v1992_v50 = vpop.f32.mrb[63].mxu1 }
 0x1a5   : > { %v1232_v51 = vadd.f32 %v1990_v45, %v1878_v41  ;;  %v1993_v52 = vadd.f32 %v1992_v50, %v1991_v46 }
 0x1a6   : > { %1494 = vst.msk [vmem:[%s2582_s6 + $0x6c] sm:$0xf] %vm1466_vm1, %v1765_v44 }
 0x1a7   : > { %v1268_v54 = vadd.f32 %v1232_v51, %v274_v48  ;;  %v1235_v55 = vadd.f32 %v1993_v52, %v1881_v49 }
 0x1a8   : > { %v1334_v56 = vld [vmem:[#allocation2 + $0xe0] sm:$0xff] }
 0x1a9   : > { %v1766_v57 = vpack.c.bf16 %v1334_v56, %v1334_v56  ;;  %1301 = vst.msk [vmem:[#allocation2 + $0xf0] sm:$0xff] %vm211_vm0, %v1268_v54  ;;  %v1269_v58 = vadd.f32 %v1235_v55, %v275_v53 }
 0x1ab   : > { %v1335_v59 = vld [vmem:[#allocation2 + $0xe8] sm:$0xff]  ;;  %1495 = vst.msk [vmem:[%s2582_s6 + $0x70] sm:$0xf] %vm1466_vm1, %v1766_v57 }
 0x1ac   : > { %v1767_v60 = vpack.c.bf16 %v1335_v59, %v1335_v59  ;;  %1302 = vst.msk [vmem:[#allocation2 + $0xf8] sm:$0xff] %vm211_vm0, %v1269_v58 }
 0x1ae   : > { %1496 = vst.msk [vmem:[%s2582_s6 + $0x74] sm:$0xf] %vm1466_vm1, %v1767_v60 }
 0x1b0   : > { %v1336_v61 = vld [vmem:[#allocation2 + $0xf0] sm:$0xff] }
 0x1b1   : > { %v1768_v62 = vpack.c.bf16 %v1336_v61, %v1336_v61 }
 0x1b3   : > { %v1337_v63 = vld [vmem:[#allocation2 + $0xf8] sm:$0xff]  ;;  %1497 = vst.msk [vmem:[%s2582_s6 + $0x78] sm:$0xf] %vm1466_vm1, %v1768_v62 }
 0x1b4   : > { %v1769_v0 = vpack.c.bf16 %v1337_v63, %v1337_v63 }
 0x1b6   : > { %1498 = vst.msk [vmem:[%s2582_s6 + $0x7c] sm:$0xf] %vm1466_vm1, %v1769_v0 }
 0x1b7 PF: > { %s15_s14 = sadd.s32 1, %s2260_s14   ;;  %s2702_s9 = smov %s2244_s10 }
 0x1b8   : > { %p12_p9 = scmp.ge.s32.totalorder %s15_s14, 4   ;;  %s2703_s10 = smov %s2248_s11 }
 0x1b9   : > { %s2704_s11 = smov %s2330_s21  ;;  %s2705_s12 = smov %s2256_s13 }
 0x1ba   : > { %s2706_s13 = smov %s2708_s16  ;;  %14 = sbr.rel (!%p12_p9) target bundleno = 4 (0x4), region = 79 }
 0x1c1   :  { %1521 = vsyncpa [#allocation4], 1 }
 0x1c2   :  { %1523 = vsyncpa [#allocation4 + $0x1], 1 }

// kernel: _multichev_b_padded.3
= control target key start
LH: loop header
LB: loop body
LE: loop exit
PB: predicated region body
PF: predicated region fallthrough
CT: control target
= control target key end

     0   :  { %13 = vsyncpa [#allocation4], 0  ;;  %s5822_s0 = inlined_call_operand.vmem [shape: bf16[512,512], index: 0, kind: input, shape index: {}]   ;;  %s5823_s1 = inlined_call_operand.vmem [shape: bf16[512,16], index: 1, kind: input, shape index: {}, may-alias: {1,3}]   ;;  %s5824_s2 = inlined_call_operand.vmem [shape: bf16[512,16], index: 2, kind: input, shape index: {}]   ;;  %s5825_s3 = inlined_call_operand.vmem [shape: bf16[512,16], index: 3, kind: input, shape index: {}, may-alias: {1,3}]   ;;  %s5826_s4 = inlined_call_operand.vmem [shape: bf16[16,384], index: 4, kind: input, shape index: {}]   ;;  %s5827_s5 = inlined_call_operand.vmem [shape: bf16[16,384], index: 5, kind: input, shape index: {}]   ;;  %s5828_s6 = inlined_call_operand.vmem [shape: bf16[16,384], index: 6, kind: input, shape index: {}]   ;;  %s5829_s7 = inlined_call_operand.vmem [shape: f32[1,384], index: 7, kind: input, shape index: {}]   ;;  %s5830_s8 = inlined_call_operand.hbm [shape: f32[512,384], index: 8, kind: output, shape index: {}]  }
   0x1   :  { %15 = vsyncpa [#allocation4 + $0x1], 0  ;;  %s4789_s27 = smov 0   ;;  %s4791_s28 = smov 0  }
   0x2   :  { %s4793_s29 = smov 0   ;;  %s4795_s30 = smov 0  }
   0x3   :  { %s4797_s9 = smov 0   ;;  %s4799_s10 = smov 0  }
   0x4 LB: > { %s3573_s11 = sadd.s32 4294967295, %s4737_s10   ;;  %s3574_s12 = sadd.s32 4294967294, %s4737_s10   ;;  %s4737_s10 = sphi %s4799_s10, %s21_s10   ;;  %s4733_s9 = sphi %s4797_s9, %s5840_s9   ;;  %s4729_s30 = sphi %s4795_s30, %s5839_s30   ;;  %s4725_s29 = sphi %s4793_s29, %s5838_s29   ;;  %s4721_s28 = sphi %s4791_s28, %s5837_s28   ;;  %s4717_s27 = sphi %s4789_s27, %s5836_s27  }
   0x5   : > { %s33_s13 = sadd.s32 1, %s4733_s9  ;;  %s230_s14 = sadd.s32 1, %s4725_s29 }
   0x6   : > { %p35_p0 = scmp.ge.s32.totalorder %s33_s13, 2  ;;  %p240_p1 = scmp.ne.s32.totalorder %s4725_s29, %s4721_s28 }
   0x7   : > { %p241_p2 = scmp.eq.s32.totalorder %s3573_s11, 1  ;;  %p246_p3 = scmp.ne.s32.totalorder %s4721_s28, %s4717_s27 }
   0x8   : > { %s5842_s13 = smov (%p35_p0, %s33_s13), 0  ;;  %p247_p5 = scmp.eq.s32.totalorder %s3574_s12, 1 }
   0x9   : > { %p4829_p4 = por %p241_p2, %p240_p1  ;;  %s227_s16 = ssub.s32 %s4733_s9, %s5842_s13 }
   0xa   : > { %p3578_p6 = scmp.ge.s32.totalorder %s4737_s10, 1  ;;  %p228_p7 = scmp.eq.s32.totalorder %s227_s16, 0 }
   0xb   : > { %p4836_p8 = por %p247_p5, %p246_p3  ;;  %p319_p9 = scmp.lt.s32.totalorder %s4737_s10, 3 }
   0xc   : > { %s4842_s18 = scalar_select %p228_p7, %s4725_s29, %s230_s14  }
   0xd   : > { %p320_p10 = pnand %p3578_p6, %p319_p9 }
   0xe   : > { %v4471_v0 = vld [vmem:[%s5823_s1 + $0x40] sm:$0xff] (!%p320_p10)   ;;  %s3579_s21 = sshll.u32 (!%p320_p10), %s4729_s30, 5  ;;  %v4473_v2 = vld [vmem:[%s5823_s1 + $0x48] sm:$0xff] (!%p320_p10)   ;;  %v4475_v4 = vld [vmem:[%s5823_s1 + $0x50] sm:$0xff] (!%p320_p10)   ;;  %v5831_v52 = vmov (!%p320_p10), 0   ;;  %vm409_vm0 = vcmask (!%p320_p10), 130048  }
   0xf   : > { %323 = sbr.rel (%p320_p10) target bundleno = 730 (0x2da), region = 52  ;;  %v4472_v1 = vld [vmem:[%s5823_s1] sm:$0xff] (!%p320_p10)   ;;  %4202 = vmatprep.subr.bf16.mxu1 (!%p320_p10), %v4471_v0  ;;  %3825 = vmatprep.subr.bf16.mxu0 (!%p320_p10), %v4471_v0  ;;  %v4474_v3 = vld [vmem:[%s5823_s1 + $0x8] sm:$0xff] (!%p320_p10)   ;;  %p375_p11 = scmp.lt.s32.totalorder (!%p320_p10), %s3579_s21, 63  ;;  %v4476_v5 = vld [vmem:[%s5823_s1 + $0x10] sm:$0xff] (!%p320_p10)  }
  0x10   : > { %4210 = vmatpush3.bf16.msra.mxu1 (!%p320_p10), %v4472_v1  ;;  %3826 = vmatpush3.bf16.msra.mxu0 (!%p320_p10), %v4472_v1  ;;  %v4477_v6 = vld [vmem:[%s5823_s1 + $0x58] sm:$0xff] (!%p320_p10)   ;;  %v4479_v8 = vld [vmem:[%s5823_s1 + $0x60] sm:$0xff] (!%p320_p10)   ;;  %v4481_v10 = vld [vmem:[%s5823_s1 + $0x68] sm:$0xff] (!%p320_p10)   ;;  %s370_s22 = sand.u32 (!%p320_p10), 1, %s4721_s28   ;;  %s4411_s14 = smul.u32 (!%p320_p10), 12288, %s4729_s30 }
  0x11   : > { %4203 = vmatprep.subr.bf16.mxu1 (!%p320_p10), %v4473_v2  ;;  %3827 = vmatprep.subr.bf16.mxu0 (!%p320_p10), %v4473_v2  ;;  %v4478_v7 = vld [vmem:[%s5823_s1 + $0x18] sm:$0xff] (!%p320_p10)   ;;  %v4480_v9 = vld [vmem:[%s5823_s1 + $0x20] sm:$0xff] (!%p320_p10)   ;;  %v4482_v12 = vld [vmem:[%s5823_s1 + $0x28] sm:$0xff] (!%p320_p10)   ;;  %s4410_s11 = smul.u32 (!%p320_p10), 768, %s370_s22 }
  0x12   : > { %v4483_v13 = vld [vmem:[%s5823_s1 + $0x70] sm:$0xff] (!%p320_p10)   ;;  %v4485_v15 = vld [vmem:[%s5823_s1 + $0x78] sm:$0xff] (!%p320_p10)   ;;  %v4490_v18 = vld [vmem:[%s5823_s1 + $0xc0] sm:$0xff] (!%p320_p10)  }
  0x13   : > { %v4484_v14 = vld [vmem:[%s5823_s1 + $0x30] sm:$0xff] (!%p320_p10)   ;;  %v4486_v16 = vld [vmem:[%s5823_s1 + $0x38] sm:$0xff] (!%p320_p10)   ;;  %v4491_v19 = vld [vmem:[%s5823_s1 + $0x80] sm:$0xff] (!%p320_p10)   ;;  %s5571_s12 = scalar_lea.vmem (!%p320_p10), [#allocation3], %s4410_s11 }
  0x14   : > { %4211 = vmatpush3.bf16.msra.mxu1 (!%p320_p10), %v4474_v3  ;;  %3828 = vmatpush3.bf16.msra.mxu0 (!%p320_p10), %v4474_v3  ;;  %v4495_v21 = vld [vmem:[%s5823_s1 + $0xc8] sm:$0xff] (!%p320_p10)   ;;  %v4518_v25 = vld [vmem:[%s5827_s5 + $0x4] ss:$12 sps:$4 sm:$0xff] (!%p320_p10)   ;;  %v4508_v32 = vld [vmem:[%s5823_s1 + $0xd8] sm:$0xff] (!%p320_p10)   ;;  %s3458_s19 = sshll.u32 (!%p320_p10), %s5571_s12, 4  ;;  %s5764_s19 = int_to_ptr.vmem [resolvable:$true] %s3458_s19 }
  0x15   : > { %4204 = vmatprep.subr.bf16.mxu1 (!%p320_p10), %v4475_v4  ;;  %3829 = vmatprep.subr.bf16.mxu0 (!%p320_p10), %v4475_v4  ;;  %v4516_v24 = vld [vmem:[%s5827_s5] ss:$12 sps:$4 sm:$0xff] (!%p320_p10)   ;;  %v4503_v28 = vld [vmem:[%s5823_s1 + $0xd0] sm:$0xff] (!%p320_p10)   ;;  %v4509_v35 = vld [vmem:[%s5823_s1 + $0x98] sm:$0xff] (!%p320_p10)  }
  0x16   : > { %s5844_s21 = smov (!%p375_p11, %s3579_s21), 63  ;;  %v4496_v26 = vld [vmem:[%s5823_s1 + $0x88] sm:$0xff]   ;;  %v4504_v31 = vld [vmem:[%s5823_s1 + $0x90] sm:$0xff]   ;;  %v4524_v36 = vld [vmem:[%s5823_s1 + $0xe0] sm:$0xff]  }
  0x17   : > { %s3824_s25 = sshll.u32 %s5844_s21, 4  ;;  %v4526_v39 = vld [vmem:[%s5823_s1 + $0xa0] sm:$0xff]   ;;  %v4533_v41 = vld [vmem:[%s5823_s1 + $0xe8] sm:$0xff]   ;;  %v4544_v44 = vld [vmem:[%s5823_s1 + $0xf0] sm:$0xff]  }
  0x18   : > { %4212 = vmatpush3.bf16.msra.mxu1 %v4476_v5  ;;  %3830 = vmatpush3.bf16.msra.mxu0 %v4476_v5  ;;  %s4878_s16 = scalar_lea.vmem %s5822_s0, %s3824_s25  ;;  %s3583_s25 = sshll.u32 %s5844_s21, 2  ;;  %v4534_v43 = vld [vmem:[%s5823_s1 + $0xa8] sm:$0xff]   ;;  %v4549_v45 = vld [vmem:[%s5826_s4 + $0x4] ss:$12 sps:$4 sm:$0xff]   ;;  %v4554_v50 = vld [vmem:[%s5823_s1 + $0xf8] sm:$0xff]  }
  0x19   : > { %4205 = vmatprep.subr.bf16.mxu1 %v4477_v6  ;;  %3831 = vmatprep.subr.bf16.mxu0 %v4477_v6  ;;  %v4489_v11 = vld [vmem:[%s4878_s16 + $0x84] ss:$16 sps:$4 sm:$0xff]   ;;  %v4487_v17 = vld [vmem:[%s4878_s16 + $0x80] ss:$16 sps:$4 sm:$0xff]   ;;  %s4960_s23 = scalar_lea.vmem %s5825_s3, %s3583_s25  ;;  %v4555_v51 = vld [vmem:[%s5823_s1 + $0xb8] sm:$0xff]   ;;  %s5129_s20 = scalar_lea.vmem %s5824_s2, %s3583_s25 }
  0x1a   : > { %1178 = vmatprep.mubr.bf16.mxu1 %v4489_v11  ;;  %v4492_v20 = vld [vmem:[%s4878_s16 + $0xa4] ss:$16 sps:$4 sm:$0xff]   ;;  %v4512_v22 = vld [vmem:[%s4878_s16] ss:$16 sps:$4 sm:$0xff]   ;;  %v4998_v59 = vld [vmem:[%s4960_s23 + $0x8] sm:$0xff]   ;;  %s5762_s21 = scalar_lea.hbm %s5830_s8, %s4411_s14  ;;  %s4741_s25 = smov [#allocation3]  }
  0x1b   : > { %v4514_v23 = vld [vmem:[%s4878_s16 + $0x4] ss:$16 sps:$4 sm:$0xff]   ;;  %v4494_v27 = vld [vmem:[%s4878_s16 + $0xa0] ss:$16 sps:$4 sm:$0xff]   ;;  %v5017_v2 = vld [vmem:[%s4960_s23 + $0x18] sm:$0xff]   ;;  %s4663_s24 = sshll.u32 %s4741_s25, 4  ;;  %s4664_s24 = int_to_ptr.vmem [resolvable:$false] %s4663_s24 }
  0x1c   : > { %4213 = vmatpush3.bf16.msra.mxu1 %v4478_v7  ;;  %3832 = vmatpush3.bf16.msra.mxu0 %v4478_v7  ;;  %v4521_v29 = vld [vmem:[%s4878_s16 + $0x24] ss:$16 sps:$4 sm:$0xff]   ;;  %v4525_v33 = vld [vmem:[%s4878_s16 + $0x20] ss:$16 sps:$4 sm:$0xff]   ;;  %s4665_s26 = scalar_lea.vmem %s4664_s24, 24576  ;;  %p4666_p1 = scmp.lt.s32.totalorder %s5764_s19, %s4664_s24 }
  0x1d   : > { %4206 = vmatprep.subr.bf16.mxu1 %v4479_v8  ;;  %3833 = vmatprep.subr.bf16.mxu0 %v4479_v8  ;;  %v4497_v30 = vld [vmem:[%s4878_s16 + $0xc4] ss:$16 sps:$4 sm:$0xff]   ;;  %v4499_v37 = vld [vmem:[%s4878_s16 + $0xc0] ss:$16 sps:$4 sm:$0xff]   ;;  %v5033_v8 = vld [vmem:[%s4960_s23 + $0x28] sm:$0xff]  }
  0x1e   : > { %1146 = vmatprep.mubr.bf16.mxu0 %v4514_v23  ;;  %v4529_v34 = vld [vmem:[%s4878_s16 + $0x44] ss:$16 sps:$4 sm:$0xff]   ;;  %v4532_v40 = vld [vmem:[%s4878_s16 + $0x40] ss:$16 sps:$4 sm:$0xff]   ;;  %v4572_v23 = vld [vmem:[%s4878_s16 + $0x6c] ss:$16 sps:$4 sm:$0xff]  }
  0x1f   : > { %v4500_v38 = vld [vmem:[%s4878_s16 + $0xe4] ss:$16 sps:$4 sm:$0xff]   ;;  %v4502_v46 = vld [vmem:[%s4878_s16 + $0xe0] ss:$16 sps:$4 sm:$0xff]  }
  0x20   : > { %4214 = vmatpush3.bf16.msra.mxu1 %v4480_v9  ;;  %3834 = vmatpush3.bf16.msra.mxu0 %v4480_v9  ;;  %v4537_v42 = vld [vmem:[%s4878_s16 + $0x64] ss:$16 sps:$4 sm:$0xff]   ;;  %v4540_v48 = vld [vmem:[%s4878_s16 + $0x60] ss:$16 sps:$4 sm:$0xff]  }
  0x21   : > { %4207 = vmatprep.subr.bf16.mxu1 %v4481_v10  ;;  %3835 = vmatprep.subr.bf16.mxu0 %v4481_v10  ;;  %v4505_v47 = vld [vmem:[%s4878_s16 + $0x104] ss:$16 sps:$4 sm:$0xff]   ;;  %v4507_v53 = vld [vmem:[%s4878_s16 + $0x100] ss:$16 sps:$4 sm:$0xff]  }
  0x22   : > { %v4545_v49 = vld [vmem:[%s5823_s1 + $0xb0] sm:$0xff]   ;;  %v4987_v55 = vld [vmem:[%s4960_s23] sm:$0xff]  }
  0x23   : > { %v4510_v54 = vld [vmem:[%s4878_s16 + $0x124] ss:$16 sps:$4 sm:$0xff]   ;;  %v4547_v56 = vld [vmem:[%s5826_s4] ss:$12 sps:$4 sm:$0xff]  }
  0x24   : > { %4215 = vmatpush3.bf16.msra.mxu1 %v4482_v12  ;;  %3836 = vmatpush3.bf16.msra.mxu0 %v4482_v12  ;;  %v4515_v57 = vld [vmem:[%s4878_s16 + $0x120] ss:$16 sps:$4 sm:$0xff]   ;;  %v4519_v58 = vld [vmem:[%s4878_s16 + $0x144] ss:$16 sps:$4 sm:$0xff]  }
  0x25   : > { %4208 = vmatprep.subr.bf16.mxu1 %v4483_v13  ;;  %3837 = vmatprep.subr.bf16.mxu0 %v4483_v13  ;;  %v4584_v60 = vld [vmem:[%s5827_s5 + $0x8] ss:$12 sps:$4 sm:$0xff]   ;;  %v4523_v61 = vld [vmem:[%s4878_s16 + $0x140] ss:$16 sps:$4 sm:$0xff]  }
  0x26   : > { %v4527_v62 = vld [vmem:[%s4878_s16 + $0x164] ss:$16 sps:$4 sm:$0xff]   ;;  %v4531_v0 = vld [vmem:[%s4878_s16 + $0x160] ss:$16 sps:$4 sm:$0xff]  }
  0x27   : > { %v5009_v63 = vld [vmem:[%s4960_s23 + $0x10] sm:$0xff]   ;;  %v5025_v5 = vld [vmem:[%s4960_s23 + $0x20] sm:$0xff]  }
  0x28   : > { %4216 = vmatpush3.bf16.msra.mxu1 %v4484_v14  ;;  %3838 = vmatpush3.bf16.msra.mxu0 %v4484_v14  ;;  %v4535_v1 = vld [vmem:[%s4878_s16 + $0x184] ss:$16 sps:$4 sm:$0xff]   ;;  %v4539_v3 = vld [vmem:[%s4878_s16 + $0x180] ss:$16 sps:$4 sm:$0xff]   ;;  %v4562_v14 = vld [vmem:[%s4878_s16 + $0xc] ss:$16 sps:$4 sm:$0xff]  }
  0x29   : > { %4209 = vmatprep.subr.bf16.mxu1 %v4485_v15  ;;  %3839 = vmatprep.subr.bf16.mxu0 %v4485_v15  ;;  %v4541_v4 = vld [vmem:[%s4878_s16 + $0x1a4] ss:$16 sps:$4 sm:$0xff]   ;;  %v4543_v6 = vld [vmem:[%s4878_s16 + $0x1a0] ss:$16 sps:$4 sm:$0xff]   ;;  %v5052_v15 = vld [vmem:[%s4960_s23 + $0x38] sm:$0xff]  }
  0x2a   : > { %v4550_v7 = vld [vmem:[%s4878_s16 + $0x1c4] ss:$16 sps:$4 sm:$0xff]   ;;  %v4552_v10 = vld [vmem:[%s4878_s16 + $0x1c0] ss:$16 sps:$4 sm:$0xff]  }
  0x2b   : > { %v4619_v9 = vld [vmem:[%s5828_s6 + $0x4] ss:$12 sps:$4 sm:$0xff]  }
  0x2c   : > { %4217 = vmatpush3.bf16.msra.mxu1 %v4486_v16  ;;  %3840 = vmatpush3.bf16.msra.mxu0 %v4486_v16  ;;  %v4556_v11 = vld [vmem:[%s4878_s16 + $0x1e4] ss:$16 sps:$4 sm:$0xff]   ;;  %v4558_v13 = vld [vmem:[%s4878_s16 + $0x1e0] ss:$16 sps:$4 sm:$0xff]   ;;  %v4560_v16 = vld [vmem:[%s4878_s16 + $0x8] ss:$16 sps:$4 sm:$0xff]  }
  0x2d   : > { %3937 = vmatprep.subr.bf16.mxu1 %v4490_v18  ;;  %1848 = vmatprep.subr.bf16.mxu0 %v4518_v25  ;;  %v5044_v12 = vld [vmem:[%s4960_s23 + $0x30] sm:$0xff]   ;;  %v5060_v18 = vld [vmem:[%s4960_s23 + $0x40] sm:$0xff]   ;;  %v4574_v25 = vld [vmem:[%s4878_s16 + $0x68] ss:$16 sps:$4 sm:$0xff]  }
  0x2f   : > { %1179 = vmatmul.mubr.bf16.vlgmr.msra.gmra.mrb[0].mxu1 %v4487_v17  ;;  %1147 = vmatmul.mubr.bf16.vlgmr.msra.gmra.mrb[0].mxu0 %v4512_v22  ;;  %v4564_v17 = vld [vmem:[%s4878_s16 + $0x2c] ss:$16 sps:$4 sm:$0xff]   ;;  %v4570_v22 = vld [vmem:[%s4878_s16 + $0x48] ss:$16 sps:$4 sm:$0xff]  }
  0x30   : > { %3938 = vmatpush3.bf16.msra.mxu1 %v4491_v19  ;;  %1186 = vmatprep.mubr.bf16.mxu1 %v4492_v20  ;;  %v4566_v19 = vld [vmem:[%s4878_s16 + $0x28] ss:$16 sps:$4 sm:$0xff]   ;;  %v4568_v20 = vld [vmem:[%s4878_s16 + $0x4c] ss:$16 sps:$4 sm:$0xff]  }
  0x31   : > { %3939 = vmatprep.subr.bf16.mxu1 %v4495_v21  ;;  %1849 = vmatpush1.bf16.msra.mxu0 %v4516_v24  ;;  %v5068_v21 = vld [vmem:[%s4960_s23 + $0x48] sm:$0xff]   ;;  %v5076_v24 = vld [vmem:[%s4960_s23 + $0x50] sm:$0xff]  }
  0x32   : > { %1154 = vmatprep.mubr.bf16.mxu0 %v4521_v29  ;;  %2346 = vmatprep.subr.bf16.mxu0 %v4549_v45  ;;  %v4580_v29 = vld [vmem:[%s4878_s16 + $0xac] ss:$16 sps:$4 sm:$0xff]  }
  0x33   : > { %v5146_v45 = vld [vmem:[%s5129_s20 + $0x8] sm:$0xff]  }
  0x34   : > { %3940 = vmatpush3.bf16.msra.mxu1 %v4496_v26  ;;  %v4576_v26 = vld [vmem:[%s4878_s16 + $0x8c] ss:$16 sps:$4 sm:$0xff]  }
  0x35   : > { %3941 = vmatprep.subr.bf16.mxu1 %v4503_v28  ;;  %v4578_v28 = vld [vmem:[%s4878_s16 + $0x88] ss:$16 sps:$4 sm:$0xff]  }
  0x37   : > { %1187 = vmatmul.mubr.bf16.gmra.mrb[4].mxu1 %v4494_v27  ;;  %1155 = vmatmul.mubr.bf16.gmra.mrb[4].mxu0 %v4525_v33  ;;  %v5084_v27 = vld [vmem:[%s4960_s23 + $0x58] sm:$0xff]   ;;  %v5100_v33 = vld [vmem:[%s4960_s23 + $0x68] sm:$0xff]  }
  0x38   : > { %1194 = vmatprep.mubr.bf16.mxu1 %v4497_v30  ;;  %3942 = vmatpush3.bf16.msra.mxu1 %v4504_v31  ;;  %v5092_v30 = vld [vmem:[%s4960_s23 + $0x60] sm:$0xff]   ;;  %v4582_v31 = vld [vmem:[%s4878_s16 + $0xa8] ss:$16 sps:$4 sm:$0xff]  }
  0x39   : > { %3943 = vmatprep.subr.bf16.mxu1 %v4508_v32  ;;  %1162 = vmatprep.mubr.bf16.mxu0 %v4529_v34  ;;  %v4585_v32 = vld [vmem:[%s4878_s16 + $0xcc] ss:$16 sps:$4 sm:$0xff]   ;;  %v5108_v34 = vld [vmem:[%s5826_s4 + $0x8] ss:$12 sps:$4 sm:$0xff]  }
  0x3c   : > { %3944 = vmatpush3.bf16.msra.mxu1 %v4509_v35  ;;  %v4587_v35 = vld [vmem:[%s4878_s16 + $0xc8] ss:$16 sps:$4 sm:$0xff]  }
  0x3d   : > { %3945 = vmatprep.subr.bf16.mxu1 %v4524_v36  ;;  %v4589_v36 = vld [vmem:[%s4878_s16 + $0xec] ss:$16 sps:$4 sm:$0xff]  }
  0x3f   : > { %1195 = vmatmul.mubr.bf16.gmra.mrb[8].mxu1 %v4499_v37  ;;  %1163 = vmatmul.mubr.bf16.gmra.mrb[8].mxu0 %v4532_v40  ;;  %v5114_v37 = vld [vmem:[%s4960_s23 + $0x70] sm:$0xff]   ;;  %v5122_v40 = vld [vmem:[%s4960_s23 + $0x78] sm:$0xff]   ;;  %s5776_s23 = scalar_lea.sflag [#allocation4], %s370_s22 }
  0x40   : > { %1202 = vmatprep.mubr.bf16.mxu1 %v4500_v38  ;;  %3946 = vmatpush3.bf16.msra.mxu1 %v4526_v39  ;;  %v4591_v38 = vld [vmem:[%s4878_s16 + $0xe8] ss:$16 sps:$4 sm:$0xff]   ;;  %v4593_v39 = vld [vmem:[%s4878_s16 + $0x10c] ss:$16 sps:$4 sm:$0xff]  }
  0x41   : > { %3947 = vmatprep.subr.bf16.mxu1 %v4533_v41  ;;  %1170 = vmatprep.mubr.bf16.mxu0 %v4537_v42  ;;  %v5135_v41 = vld [vmem:[%s5129_s20] sm:$0xff]   ;;  %v4595_v42 = vld [vmem:[%s4878_s16 + $0x108] ss:$16 sps:$4 sm:$0xff]  }
  0x44   : > { %3948 = vmatpush3.bf16.msra.mxu1 %v4534_v43  ;;  %v4597_v43 = vld [vmem:[%s4878_s16 + $0x12c] ss:$16 sps:$4 sm:$0xff]  }
  0x45   : > { %3949 = vmatprep.subr.bf16.mxu1 %v4544_v44  ;;  %v4617_v44 = vld [vmem:[%s5828_s6] ss:$12 sps:$4 sm:$0xff]  }
  0x47   : > { %1203 = vmatmul.mubr.bf16.gmra.mrb[12].mxu1 %v4502_v46  ;;  %1171 = vmatmul.mubr.bf16.gmra.mrb[12].mxu0 %v4540_v48  ;;  %v4599_v46 = vld [vmem:[%s4878_s16 + $0x128] ss:$16 sps:$4 sm:$0xff]   ;;  %v5154_v48 = vld [vmem:[%s5129_s20 + $0x10] sm:$0xff]  }
  0x48   : > { %1210 = vmatprep.mubr.bf16.mxu1 %v4505_v47  ;;  %3950 = vmatpush3.bf16.msra.mxu1 %v4545_v49  ;;  %v4601_v47 = vld [vmem:[%s4878_s16 + $0x14c] ss:$16 sps:$4 sm:$0xff]   ;;  %v4603_v49 = vld [vmem:[%s4878_s16 + $0x148] ss:$16 sps:$4 sm:$0xff]  }
  0x49   : > { %3951 = vmatprep.subr.bf16.mxu1 %v4554_v50  ;;  %1880 = vmatprep.mubr.bf16.mxu0 %v5831_v52  ;;  %v4605_v50 = vld [vmem:[%s4878_s16 + $0x16c] ss:$16 sps:$4 sm:$0xff]  }
  0x4c   : > { %3952 = vmatpush3.bf16.msra.mxu1 %v4555_v51  ;;  %v4740_v51 = vmov 0.0  }
  0x4d   : > { %4100 = vmatprep.subr.bf16.mxu1 %v4584_v60  ;;  %410 = vst.msk [vmem:[#allocation2] sm:$0xff] %vm409_vm0, %v4740_v51  ;;  %411 = vst.msk [vmem:[#allocation2 + $0x8] sm:$0xff] %vm409_vm0, %v4740_v51 }
  0x4e   : > { %412 = vst.msk [vmem:[#allocation2 + $0x10] sm:$0xff] %vm409_vm0, %v4740_v51  ;;  %413 = vst.msk [vmem:[#allocation2 + $0x18] sm:$0xff] %vm409_vm0, %v4740_v51 }
  0x4f   : > { %1211 = vmatmul.mubr.bf16.gmra.mrb[16].mxu1 %v4507_v53  ;;  %3701 = vmatmul.mubr.msk.bf16.vlgmr.msra.gmra.mrb[16].mxu0 %vm409_vm0, %v4987_v55  ;;  %414 = vst.msk [vmem:[#allocation2 + $0x20] sm:$0xff] %vm409_vm0, %v4740_v51  ;;  %415 = vst.msk [vmem:[#allocation2 + $0x28] sm:$0xff] %vm409_vm0, %v4740_v51  ;;  %v5194_v53 = vld [vmem:[%s5129_s20 + $0x18] sm:$0xff]  }
  0x50   : > { %1218 = vmatprep.mubr.bf16.mxu1 %v4510_v54  ;;  %2347 = vmatpush1.bf16.msra.mxu0 %v4547_v56  ;;  %416 = vst.msk [vmem:[#allocation2 + $0x30] sm:$0xff] %vm409_vm0, %v4740_v51  ;;  %417 = vst.msk [vmem:[#allocation2 + $0x38] sm:$0xff] %vm409_vm0, %v4740_v51  ;;  %v4607_v54 = vld [vmem:[%s4878_s16 + $0x168] ss:$16 sps:$4 sm:$0xff]   ;;  %v4609_v56 = vld [vmem:[%s4878_s16 + $0x18c] ss:$16 sps:$4 sm:$0xff]  }
  0x51   : > { %1890 = vmatprep.mubr.bf16.mxu0 %v5831_v52  ;;  %2784 = vmatprep.subr.bf16.mxu0 %v4619_v9  ;;  %418 = vst.msk [vmem:[#allocation2 + $0x40] sm:$0xff] %vm409_vm0, %v4740_v51  ;;  %419 = vst.msk [vmem:[#allocation2 + $0x48] sm:$0xff] %vm409_vm0, %v4740_v51 }
  0x52   : > { %420 = vst.msk [vmem:[#allocation2 + $0x50] sm:$0xff] %vm409_vm0, %v4740_v51  ;;  %421 = vst.msk [vmem:[#allocation2 + $0x58] sm:$0xff] %vm409_vm0, %v4740_v51 }
  0x53   : > { %422 = vst.msk [vmem:[#allocation2 + $0x60] sm:$0xff] %vm409_vm0, %v4740_v51  ;;  %423 = vst.msk [vmem:[#allocation2 + $0x68] sm:$0xff] %vm409_vm0, %v4740_v51 }
  0x54   : > { %424 = vst.msk [vmem:[#allocation2 + $0x70] sm:$0xff] %vm409_vm0, %v4740_v51  ;;  %425 = vst.msk [vmem:[#allocation2 + $0x78] sm:$0xff] %vm409_vm0, %v4740_v51 }
  0x55   : > { %426 = vst.msk [vmem:[#allocation2 + $0x80] sm:$0xff] %vm409_vm0, %v4740_v51  ;;  %427 = vst.msk [vmem:[#allocation2 + $0x88] sm:$0xff] %vm409_vm0, %v4740_v51 }
  0x56   : > { %428 = vst.msk [vmem:[#allocation2 + $0x90] sm:$0xff] %vm409_vm0, %v4740_v51  ;;  %429 = vst.msk [vmem:[#allocation2 + $0x98] sm:$0xff] %vm409_vm0, %v4740_v51 }
  0x57   : > { %1219 = vmatmul.mubr.bf16.gmra.mrb[20].mxu1 %v4515_v57  ;;  %3702 = vmatmul.mubr.msk.bf16.gmra.mrb[20].mxu0 %vm409_vm0, %v4998_v59  ;;  %430 = vst.msk [vmem:[#allocation2 + $0xa0] sm:$0xff] %vm409_vm0, %v4740_v51  ;;  %431 = vst.msk [vmem:[#allocation2 + $0xa8] sm:$0xff] %vm409_vm0, %v4740_v51  ;;  %v5202_v57 = vld [vmem:[%s5129_s20 + $0x20] sm:$0xff]  }
  0x58   : > { %1226 = vmatprep.mubr.bf16.mxu1 %v4519_v58  ;;  %1900 = vmatprep.mubr.bf16.mxu0 %v5831_v52  ;;  %432 = vst.msk [vmem:[#allocation2 + $0xb0] sm:$0xff] %vm409_vm0, %v4740_v51  ;;  %433 = vst.msk [vmem:[#allocation2 + $0xb8] sm:$0xff] %vm409_vm0, %v4740_v51  ;;  %v4611_v58 = vld [vmem:[%s4878_s16 + $0x188] ss:$16 sps:$4 sm:$0xff]  }
  0x59   : > { %434 = vst.msk [vmem:[#allocation2 + $0xc0] sm:$0xff] %vm409_vm0, %v4740_v51  ;;  %435 = vst.msk [vmem:[#allocation2 + $0xc8] sm:$0xff] %vm409_vm0, %v4740_v51 }
  0x5a   : > { %436 = vst.msk [vmem:[#allocation2 + $0xd0] sm:$0xff] %vm409_vm0, %v4740_v51  ;;  %437 = vst.msk [vmem:[#allocation2 + $0xd8] sm:$0xff] %vm409_vm0, %v4740_v51 }
  0x5b   : > { %438 = vst.msk [vmem:[#allocation2 + $0xe0] sm:$0xff] %vm409_vm0, %v4740_v51  ;;  %439 = vst.msk [vmem:[#allocation2 + $0xe8] sm:$0xff] %vm409_vm0, %v4740_v51 }
  0x5c   : > { %440 = vst.msk [vmem:[#allocation2 + $0xf0] sm:$0xff] %vm409_vm0, %v4740_v51  ;;  %441 = vst.msk [vmem:[#allocation2 + $0xf8] sm:$0xff] %vm409_vm0, %v4740_v51 }
  0x5f   : > { %1227 = vmatmul.mubr.bf16.gmra.mrb[24].mxu1 %v4523_v61  ;;  %3703 = vmatmul.mubr.msk.bf16.gmra.mrb[24].mxu0 %vm409_vm0, %v5009_v63  ;;  %v5210_v61 = vld [vmem:[%s5129_s20 + $0x28] sm:$0xff]  }
  0x60   : > { %1234 = vmatprep.mubr.bf16.mxu1 %v4527_v62  ;;  %1910 = vmatprep.mubr.bf16.mxu0 %v5831_v52  ;;  %v4615_v62 = vld [vmem:[%s4878_s16 + $0x1a8] ss:$16 sps:$4 sm:$0xff]  }
  0x67   : > { %1235 = vmatmul.mubr.bf16.gmra.mrb[28].mxu1 %v4531_v0  ;;  %3704 = vmatmul.mubr.msk.bf16.gmra.mrb[28].mxu0 %vm409_vm0, %v5017_v2  ;;  %v4620_v0 = vld [vmem:[%s4878_s16 + $0x1cc] ss:$16 sps:$4 sm:$0xff]  }
  0x68   : > { %1242 = vmatprep.mubr.bf16.mxu1 %v4535_v1  ;;  %1920 = vmatprep.mubr.bf16.mxu0 %v5831_v52  ;;  %v5218_v1 = vld [vmem:[%s5129_s20 + $0x30] sm:$0xff]  }
  0x6f   : > { %1243 = vmatmul.mubr.bf16.gmra.mrb[32].mxu1 %v4539_v3  ;;  %3705 = vmatmul.mubr.msk.bf16.gmra.mrb[32].mxu0 %vm409_vm0, %v5025_v5  ;;  %v4622_v3 = vld [vmem:[%s4878_s16 + $0x1c8] ss:$16 sps:$4 sm:$0xff]  }
  0x70   : > { %1250 = vmatprep.mubr.bf16.mxu1 %v4541_v4  ;;  %1930 = vmatprep.mubr.bf16.mxu0 %v5831_v52  ;;  %v4624_v4 = vld [vmem:[%s4878_s16 + $0x1ec] ss:$16 sps:$4 sm:$0xff]  }
  0x77   : > { %1251 = vmatmul.mubr.bf16.gmra.mrb[36].mxu1 %v4543_v6  ;;  %3706 = vmatmul.mubr.msk.bf16.gmra.mrb[36].mxu0 %vm409_vm0, %v5033_v8 }
  0x78   : > { %1258 = vmatprep.mubr.bf16.mxu1 %v4550_v7  ;;  %1940 = vmatprep.mubr.bf16.mxu0 %v5831_v52  ;;  %v5226_v7 = vld [vmem:[%s5129_s20 + $0x38] sm:$0xff]  }
  0x7f   : > { %1259 = vmatmul.mubr.bf16.gmra.mrb[40].mxu1 %v4552_v10  ;;  %3707 = vmatmul.mubr.msk.bf16.gmra.mrb[40].mxu0 %vm409_vm0, %v5044_v12  ;;  %v4626_v10 = vld [vmem:[%s4878_s16 + $0x1e8] ss:$16 sps:$4 sm:$0xff]  }
  0x80   : > { %1266 = vmatprep.mubr.bf16.mxu1 %v4556_v11  ;;  %1950 = vmatprep.mubr.bf16.mxu0 %v5831_v52 }
  0x87   : > { %1267 = vmatmul.mubr.bf16.gmra.mrb[44].mxu1 %v4558_v13  ;;  %3708 = vmatmul.mubr.msk.bf16.gmra.mrb[44].mxu0 %vm409_vm0, %v5052_v15 }
  0x88   : > { %1307 = vmatprep.mubr.bf16.mxu1 %v4562_v14  ;;  %1960 = vmatprep.mubr.bf16.mxu0 %v5831_v52 }
  0x8f   : > { %1308 = vmatmul.mubr.bf16.vlgmr.msra.gmra.mrb[48].mxu1 %v4560_v16  ;;  %3709 = vmatmul.mubr.msk.bf16.gmra.mrb[48].mxu0 %vm409_vm0, %v5060_v18 }
  0x90   : > { %1315 = vmatprep.mubr.bf16.mxu1 %v4564_v17  ;;  %4101 = vmatpush3.bf16.msra.mxu1 %v4584_v60  ;;  %v4613_v60 = vld [vmem:[%s4878_s16 + $0x1ac] ss:$16 sps:$4 sm:$0xff]   ;;  %s4659_s16 = scalar_lea.vmem %s5764_s19, 12288 }
  0x91   : > { %1970 = vmatprep.mubr.bf16.mxu0 %v5831_v52  ;;  %4134 = vmatprep.subr.bf16.mxu1 %v5108_v34  ;;  %p4660_p12 = scmp.ne.s32.totalorder %s5764_s19, %s4659_s16  ;;  %p4667_p2 = scmp.lt.s32.totalorder %s4665_s26, %s4659_s16 }
  0x93   : > { %p4661_p13 = pnand %p4660_p12, %p4829_p4  ;;  %p4668_p3 = por %p4667_p2, %p4666_p1 }
  0x95   : > { %p4662_p0 = pneg %p4661_p13 }
  0x97   : > { %1316 = vmatmul.mubr.bf16.gmra.mrb[52].mxu1 %v4566_v19  ;;  %3710 = vmatmul.mubr.msk.bf16.gmra.mrb[52].mxu0 %vm409_vm0, %v5068_v21  ;;  %p4669_p5 = pnand %p4668_p3, %p4662_p0 }
  0x98   : > { %1323 = vmatprep.mubr.bf16.mxu1 %v4568_v20  ;;  %1980 = vmatprep.mubr.bf16.mxu0 %v5831_v52 }
  0x9f   : > { %1324 = vmatmul.mubr.bf16.gmra.mrb[56].mxu1 %v4570_v22  ;;  %3711 = vmatmul.mubr.msk.bf16.gmra.mrb[56].mxu0 %vm409_vm0, %v5076_v24 }
  0xa0   : > { %1331 = vmatprep.mubr.bf16.mxu1 %v4572_v23  ;;  %1990 = vmatprep.mubr.bf16.mxu0 %v5831_v52 }
  0xa7   : > { %1332 = vmatmul.mubr.bf16.gmra.mrb[60].mxu1 %v4574_v25  ;;  %3712 = vmatmul.mubr.msk.bf16.gmra.mrb[60].mxu0 %vm409_vm0, %v5084_v27 }
  0xa8   : > { %1339 = vmatprep.mubr.bf16.mxu1 %v4576_v26  ;;  %2000 = vmatprep.mubr.bf16.mxu0 %v5831_v52 }
  0xaf   : > { %1340 = vmatmul.mubr.bf16.gmra.mrb[64].mxu1 %v4578_v28  ;;  %3713 = vmatmul.mubr.msk.bf16.gmra.mrb[64].mxu0 %vm409_vm0, %v5092_v30  ;;  %v5243_v28 = vld [vmem:[%s5129_s20 + $0x40] sm:$0xff]  }
  0xb0   : > { %1347 = vmatprep.mubr.bf16.mxu1 %v4580_v29  ;;  %2010 = vmatprep.mubr.bf16.mxu0 %v5831_v52 }
  0xb7   : > { %1348 = vmatmul.mubr.bf16.gmra.mrb[68].mxu1 %v4582_v31  ;;  %3714 = vmatmul.mubr.msk.bf16.gmra.mrb[68].mxu0 %vm409_vm0, %v5100_v33 }
  0xb8   : > { %1355 = vmatprep.mubr.bf16.mxu1 %v4585_v32  ;;  %2020 = vmatprep.mubr.bf16.mxu0 %v5831_v52 }
  0xbf   : > { %1356 = vmatmul.mubr.bf16.gmra.mrb[72].mxu1 %v4587_v35  ;;  %3715 = vmatmul.mubr.msk.bf16.gmra.mrb[72].mxu0 %vm409_vm0, %v5114_v37 }
  0xc0   : > { %1363 = vmatprep.mubr.bf16.mxu1 %v4589_v36  ;;  %2030 = vmatprep.mubr.bf16.mxu0 %v5831_v52 }
  0xc7   : > { %1364 = vmatmul.mubr.bf16.gmra.mrb[76].mxu1 %v4591_v38  ;;  %3716 = vmatmul.mubr.msk.bf16.gmra.mrb[76].mxu0 %vm409_vm0, %v5122_v40 }
  0xc8   : > { %1371 = vmatprep.mubr.bf16.mxu1 %v4593_v39  ;;  %2378 = vmatprep.mubr.bf16.mxu0 %v5831_v52 }
  0xcf   : > { %1372 = vmatmul.mubr.bf16.gmra.mrb[80].mxu1 %v4595_v42  ;;  %3752 = vmatmul.mubr.msk.bf16.vlgmr.msra.gmra.mrb[16].mxu0 %vm409_vm0, %v5135_v41 }
  0xd0   : > { %1379 = vmatprep.mubr.bf16.mxu1 %v4597_v43  ;;  %2785 = vmatpush1.bf16.msra.mxu0 %v4617_v44 }
  0xd1   : > { %2388 = vmatprep.mubr.bf16.mxu0 %v5831_v52 }
  0xd7   : > { %1380 = vmatmul.mubr.bf16.gmra.mrb[84].mxu1 %v4599_v46  ;;  %3753 = vmatmul.mubr.msk.bf16.gmra.mrb[20].mxu0 %vm409_vm0, %v5146_v45 }
  0xd8   : > { %1387 = vmatprep.mubr.bf16.mxu1 %v4601_v47  ;;  %2398 = vmatprep.mubr.bf16.mxu0 %v5831_v52 }
  0xdf   : > { %1388 = vmatmul.mubr.bf16.gmra.mrb[88].mxu1 %v4603_v49  ;;  %3754 = vmatmul.mubr.msk.bf16.gmra.mrb[24].mxu0 %vm409_vm0, %v5154_v48  ;;  %v5268_v49 = vld [vmem:[%s5129_s20 + $0x48] sm:$0xff]  }
  0xe0   : > { %1395 = vmatprep.mubr.bf16.mxu1 %v4605_v50  ;;  %2408 = vmatprep.mubr.bf16.mxu0 %v5831_v52 }
  0xe7   : > { %1396 = vmatmul.mubr.bf16.gmra.mrb[92].mxu1 %v4607_v54  ;;  %3755 = vmatmul.mubr.msk.bf16.gmra.mrb[28].mxu0 %vm409_vm0, %v5194_v53 }
  0xe8   : > { %1403 = vmatprep.mubr.bf16.mxu1 %v4609_v56  ;;  %2418 = vmatprep.mubr.bf16.mxu0 %v5831_v52 }
  0xef   : > { %1404 = vmatmul.mubr.bf16.gmra.mrb[96].mxu1 %v4611_v58  ;;  %3756 = vmatmul.mubr.msk.bf16.gmra.mrb[32].mxu0 %vm409_vm0, %v5202_v57 }
  0xf0   : > { %1411 = vmatprep.mubr.bf16.mxu1 %v4613_v60  ;;  %2428 = vmatprep.mubr.bf16.mxu0 %v5831_v52 }
  0xf7   : > { %1412 = vmatmul.mubr.bf16.gmra.mrb[100].mxu1 %v4615_v62  ;;  %3757 = vmatmul.mubr.msk.bf16.gmra.mrb[36].mxu0 %vm409_vm0, %v5210_v61 }
  0xf8   : > { %1419 = vmatprep.mubr.bf16.mxu1 %v4620_v0  ;;  %2438 = vmatprep.mubr.bf16.mxu0 %v5831_v52 }
  0xff   : > { %1420 = vmatmul.mubr.bf16.gmra.mrb[104].mxu1 %v4622_v3  ;;  %3758 = vmatmul.mubr.msk.bf16.gmra.mrb[40].mxu0 %vm409_vm0, %v5218_v1 }
 0x100   : > { %1427 = vmatprep.mubr.bf16.mxu1 %v4624_v4  ;;  %2448 = vmatprep.mubr.bf16.mxu0 %v5831_v52  ;;  %v5286_v4 = vld [vmem:[%s5129_s20 + $0x50] sm:$0xff]  }
 0x102   : > { %v3865_v6 = vpop.f32.mrb[0].mxu1  ;;  %v3841_v14 = vpop.f32.mrb[0].mxu0 }
 0x103   : > { %v3866_v9 = vpop.f32.mrb[1].mxu1  ;;  %v3842_v17 = vpop.f32.mrb[1].mxu0 }
 0x104   : > { %v5229_v11 = vadd.f32 %v3866_v9, %v3865_v6  ;;  %v3868_v13 = vpop.f32.mrb[2].mxu1  ;;  %v5233_v20 = vadd.f32 %v3842_v17, %v3841_v14  ;;  %v3844_v22 = vpop.f32.mrb[2].mxu0 }
 0x105   : > { %v3869_v16 = vpop.f32.mrb[3].mxu1  ;;  %v3845_v23 = vpop.f32.mrb[3].mxu0 }
 0x106   : > { %v5231_v19 = vadd.f32 %v3869_v16, %v3868_v13  ;;  %v5237_v25 = vadd.f32 %v3845_v23, %v3844_v22 }
 0x107   : > { %1428 = vmatmul.mubr.bf16.gmra.mrb[108].mxu1 %v4626_v10  ;;  %3759 = vmatmul.mubr.msk.bf16.gmra.mrb[44].mxu0 %vm409_vm0, %v5226_v7 }
 0x108   : > { %4102 = vmatprep.mubr.msk.bf16.mxu1 %vm409_vm0, %v4987_v55  ;;  %2458 = vmatprep.mubr.bf16.mxu0 %v5831_v52  ;;  %v5250_v55 = vld [vmem:[%s5828_s6 + $0x8] ss:$12 sps:$4 sm:$0xff]  }
 0x10a   : > { %v3871_v26 = vpop.f32.mrb[4].mxu1  ;;  %v3847_v35 = vpop.f32.mrb[4].mxu0 }
 0x10b   : > { %v3872_v29 = vpop.f32.mrb[5].mxu1  ;;  %v3848_v38 = vpop.f32.mrb[5].mxu0 }
 0x10c   : > { %v5245_v31 = vadd.f32 %v3872_v29, %v3871_v26  ;;  %v3874_v32 = vpop.f32.mrb[6].mxu1  ;;  %v5254_v42 = vadd.f32 %v3848_v38, %v3847_v35  ;;  %v3850_v43 = vpop.f32.mrb[6].mxu0  ;;  %v5304_v29 = vld [vmem:[%s5129_s20 + $0x58] sm:$0xff]  }
 0x10d   : > { %v3875_v36 = vpop.f32.mrb[7].mxu1  ;;  %v3851_v44 = vpop.f32.mrb[7].mxu0 }
 0x10e   : > { %v5252_v39 = vadd.f32 %v3875_v36, %v3874_v32  ;;  %v5260_v46 = vadd.f32 %v3851_v44, %v3850_v43  ;;  %v5318_v43 = vld [vmem:[%s5129_s20 + $0x60] sm:$0xff]  }
 0x10f   : > { %4103 = vmatmul.mubr.msk.bf16.vlgmr.msra.gmra.mrb[112].mxu1 %vm409_vm0, %v4998_v59  ;;  %3760 = vmatmul.mubr.msk.bf16.gmra.mrb[48].mxu0 %vm409_vm0, %v5243_v28 }
 0x110   : > { %4106 = vmatprep.mubr.msk.bf16.mxu1 %vm409_vm0, %v5009_v63  ;;  %4135 = vmatpush3.bf16.msra.mxu1 %v5108_v34 }
 0x111   : > { %4168 = vmatprep.subr.bf16.mxu1 %v5250_v55  ;;  %2468 = vmatprep.mubr.bf16.mxu0 %v5831_v52 }
 0x112   : > { %v3877_v47 = vpop.f32.mrb[8].mxu1  ;;  %v3853_v63 = vpop.f32.mrb[8].mxu0 }
 0x113   : > { %v3878_v50 = vpop.f32.mrb[9].mxu1  ;;  %v3854_v56 = vpop.f32.mrb[9].mxu0 }
 0x114   : > { %v5270_v59 = vadd.f32 %v3878_v50, %v3877_v47  ;;  %v3880_v51 = vpop.f32.mrb[10].mxu1  ;;  %v5274_v34 = vadd.f32 %v3854_v56, %v3853_v63  ;;  %v3856_v60 = vpop.f32.mrb[10].mxu0 }
 0x115   : > { %v3881_v54 = vpop.f32.mrb[11].mxu1  ;;  %v3857_v62 = vpop.f32.mrb[11].mxu0 }
 0x116   : > { %v5272_v58 = vadd.f32 %v3881_v54, %v3880_v51  ;;  %v5280_v0 = vadd.f32 %v3857_v62, %v3856_v60 }
 0x117   : > { %4107 = vmatmul.mubr.msk.bf16.gmra.mrb[116].mxu1 %vm409_vm0, %v5017_v2  ;;  %3761 = vmatmul.mubr.msk.bf16.gmra.mrb[52].mxu0 %vm409_vm0, %v5268_v49 }
 0x118   : > { %4110 = vmatprep.mubr.msk.bf16.mxu1 %vm409_vm0, %v5025_v5  ;;  %2478 = vmatprep.mubr.bf16.mxu0 %v5831_v52 }
 0x11a   : > { %v3883_v3 = vpop.f32.mrb[12].mxu1  ;;  %v3859_v2 = vpop.f32.mrb[12].mxu0 }
 0x11b   : > { %v3884_v6 = vpop.f32.mrb[13].mxu1  ;;  %v3860_v14 = vpop.f32.mrb[13].mxu0 }
 0x11c   : > { %v5288_v9 = vadd.f32 %v3884_v6, %v3883_v3  ;;  %v3886_v10 = vpop.f32.mrb[14].mxu1  ;;  %v5292_v5 = vadd.f32 %v3860_v14, %v3859_v2  ;;  %v3862_v17 = vpop.f32.mrb[14].mxu0 }
 0x11d   : > { %v3887_v13 = vpop.f32.mrb[15].mxu1  ;;  %v3863_v22 = vpop.f32.mrb[15].mxu0 }
 0x11e   : > { %v5290_v16 = vadd.f32 %v3887_v13, %v3886_v10  ;;  %v5298_v23 = vadd.f32 %v3863_v22, %v3862_v17 }
 0x11f   : > { %4111 = vmatmul.mubr.msk.bf16.gmra.mrb[120].mxu1 %vm409_vm0, %v5033_v8  ;;  %3762 = vmatmul.mubr.msk.bf16.gmra.mrb[56].mxu0 %vm409_vm0, %v5286_v4 }
 0x120   : > { %4114 = vmatprep.mubr.msk.bf16.mxu1 %vm409_vm0, %v5044_v12  ;;  %2488 = vmatprep.mubr.bf16.mxu0 %v5831_v52 }
 0x122   : > { %v3889_v26 = vpop.f32.mrb[16].mxu1 }
 0x123   : > { %v3890_v32 = vpop.f32.mrb[17].mxu1 }
 0x124   : > { %v5306_v35 = vadd.f32 %v3890_v32, %v3889_v26  ;;  %v3892_v36 = vpop.f32.mrb[18].mxu1 }
 0x125   : > { %v3893_v8 = vpop.f32.mrb[19].mxu1 }
 0x126   : > { %v5308_v38 = vadd.f32 %v3893_v8, %v3892_v36 }
 0x127   : > { %4115 = vmatmul.mubr.msk.bf16.gmra.mrb[124].mxu1 %vm409_vm0, %v5052_v15  ;;  %3763 = vmatmul.mubr.msk.bf16.gmra.mrb[60].mxu0 %vm409_vm0, %v5304_v29 }
 0x128   : > { %4118 = vmatprep.mubr.msk.bf16.mxu1 %vm409_vm0, %v5060_v18  ;;  %2498 = vmatprep.mubr.bf16.mxu0 %v5831_v52  ;;  %v5332_v18 = vld [vmem:[%s5129_s20 + $0x68] sm:$0xff]  }
 0x12a   : > { %v3895_v12 = vpop.f32.mrb[20].mxu1 }
 0x12b   : > { %v3896_v44 = vpop.f32.mrb[21].mxu1 }
 0x12c   : > { %v5320_v47 = vadd.f32 %v3896_v44, %v3895_v12  ;;  %v3898_v50 = vpop.f32.mrb[22].mxu1 }
 0x12d   : > { %v3899_v51 = vpop.f32.mrb[23].mxu1 }
 0x12e   : > { %v5322_v63 = vadd.f32 %v3899_v51, %v3898_v50 }
 0x12f   : > { %4119 = vmatmul.mubr.msk.bf16.gmra.mrb[128].mxu1 %vm409_vm0, %v5068_v21  ;;  %3764 = vmatmul.mubr.msk.bf16.gmra.mrb[64].mxu0 %vm409_vm0, %v5318_v43 }
 0x130   : > { %4122 = vmatprep.mubr.msk.bf16.mxu1 %vm409_vm0, %v5076_v24  ;;  %2508 = vmatprep.mubr.bf16.mxu0 %v5831_v52  ;;  %v5346_v24 = vld [vmem:[%s5129_s20 + $0x70] sm:$0xff]  }
 0x132   : > { %v3901_v15 = vpop.f32.mrb[24].mxu1 }
 0x133   : > { %v3902_v54 = vpop.f32.mrb[25].mxu1 }
 0x134   : > { %v5334_v56 = vadd.f32 %v3902_v54, %v3901_v15  ;;  %v3904_v60 = vpop.f32.mrb[26].mxu1 }
 0x135   : > { %v3905_v62 = vpop.f32.mrb[27].mxu1 }
 0x136   : > { %v5336_v3 = vadd.f32 %v3905_v62, %v3904_v60 }
 0x137   : > { %4123 = vmatmul.mubr.msk.bf16.gmra.mrb[132].mxu1 %vm409_vm0, %v5084_v27  ;;  %3765 = vmatmul.mubr.msk.bf16.gmra.mrb[68].mxu0 %vm409_vm0, %v5332_v18 }
 0x138   : > { %4126 = vmatprep.mubr.msk.bf16.mxu1 %vm409_vm0, %v5092_v30  ;;  %2518 = vmatprep.mubr.bf16.mxu0 %v5831_v52  ;;  %v5360_v30 = vld [vmem:[%s5129_s20 + $0x78] sm:$0xff]  }
 0x13a   : > { %v3907_v21 = vpop.f32.mrb[28].mxu1 }
 0x13b   : > { %v3908_v6 = vpop.f32.mrb[29].mxu1 }
 0x13c   : > { %v5348_v10 = vadd.f32 %v3908_v6, %v3907_v21  ;;  %v3910_v2 = vpop.f32.mrb[30].mxu1 }
 0x13d   : > { %v3911_v13 = vpop.f32.mrb[31].mxu1 }
 0x13e   : > { %v5350_v14 = vadd.f32 %v3911_v13, %v3910_v2 }
 0x13f   : > { %4127 = vmatmul.mubr.msk.bf16.gmra.mrb[136].mxu1 %vm409_vm0, %v5100_v33  ;;  %3766 = vmatmul.mubr.msk.bf16.gmra.mrb[72].mxu0 %vm409_vm0, %v5346_v24 }
 0x140   : > { %4130 = vmatprep.mubr.msk.bf16.mxu1 %vm409_vm0, %v5114_v37  ;;  %2528 = vmatprep.mubr.bf16.mxu0 %v5831_v52 }
 0x142   : > { %v3913_v27 = vpop.f32.mrb[32].mxu1 }
 0x143   : > { %v3914_v17 = vpop.f32.mrb[33].mxu1 }
 0x144   : > { %v5362_v22 = vadd.f32 %v3914_v17, %v3913_v27  ;;  %v3916_v26 = vpop.f32.mrb[34].mxu1 }
 0x145   : > { %v3917_v32 = vpop.f32.mrb[35].mxu1 }
 0x146   : > { %v5364_v36 = vadd.f32 %v3917_v32, %v3916_v26 }
 0x147   : > { %4131 = vmatmul.mubr.msk.bf16.gmra.mrb[140].mxu1 %vm409_vm0, %v5122_v40  ;;  %3767 = vmatmul.mubr.msk.bf16.gmra.mrb[76].mxu0 %vm409_vm0, %v5360_v30 }
 0x148   : > { %4136 = vmatprep.mubr.msk.bf16.mxu1 %vm409_vm0, %v5135_v41  ;;  %2816 = vmatprep.mubr.bf16.mxu0 %v5831_v52 }
 0x14a   : > { %v3919_v33 = vpop.f32.mrb[36].mxu1 }
 0x14b   : > { %v3920_v37 = vpop.f32.mrb[37].mxu1 }
 0x14c   : > { %v5373_v8 = vadd.f32 %v3920_v37, %v3919_v33  ;;  %v3922_v12 = vpop.f32.mrb[38].mxu1  ;;  %v442_v37 = vld [vmem:[#allocation2] sm:$0xff] }
 0x14d   : > { %v3923_v44 = vpop.f32.mrb[39].mxu1 }
 0x14e   : > { %v5375_v50 = vadd.f32 %v3923_v44, %v3922_v12 }
 0x14f   : > { %4137 = vmatmul.mubr.msk.bf16.vlgmr.msra.gmra.mrb[112].mxu1 %vm409_vm0, %v5146_v45 }
 0x150   : > { %4140 = vmatprep.mubr.msk.bf16.mxu1 %vm409_vm0, %v5154_v48  ;;  %4169 = vmatpush3.bf16.msra.mxu1 %v5250_v55 }
 0x152   : > { %v3925_v40 = vpop.f32.mrb[40].mxu1 }
 0x153   : > { %v3926_v51 = vpop.f32.mrb[41].mxu1 }
 0x154   : > { %v5382_v15 = vadd.f32 %v3926_v51, %v3925_v40  ;;  %v3928_v54 = vpop.f32.mrb[42].mxu1  ;;  %v443_v51 = vld [vmem:[#allocation2 + $0x8] sm:$0xff] }
 0x155   : > { %v3929_v60 = vpop.f32.mrb[43].mxu1 }
 0x156   : > { %v5384_v62 = vadd.f32 %v3929_v60, %v3928_v54 }
 0x157   : > { %4141 = vmatmul.mubr.msk.bf16.gmra.mrb[116].mxu1 %vm409_vm0, %v5194_v53 }
 0x158   : > { %4144 = vmatprep.mubr.msk.bf16.mxu1 %vm409_vm0, %v5202_v57 }
 0x15a   : > { %v3931_v21 = vpop.f32.mrb[44].mxu1 }
 0x15b   : > { %v3932_v6 = vpop.f32.mrb[45].mxu1 }
 0x15c   : > { %v5390_v2 = vadd.f32 %v3932_v6, %v3931_v21  ;;  %v3934_v13 = vpop.f32.mrb[46].mxu1 }
 0x15d   : > { %v3935_v55 = vpop.f32.mrb[47].mxu1 }
 0x15e   : > { %v5392_v27 = vadd.f32 %v3935_v55, %v3934_v13 }
 0x15f   : > { %4145 = vmatmul.mubr.msk.bf16.gmra.mrb[120].mxu1 %vm409_vm0, %v5210_v61 }
 0x160   : > { %4148 = vmatprep.mubr.msk.bf16.mxu1 %vm409_vm0, %v5218_v1 }
 0x162   : > { %v3953_v17 = vpop.f32.mrb[48].mxu1 }
 0x163   : > { %v3954_v26 = vpop.f32.mrb[49].mxu1 }
 0x164   : > { %v3955_v32 = vadd.f32 %v3954_v26, %v3953_v17  ;;  %v3956_v33 = vpop.f32.mrb[50].mxu1  ;;  %v444_v17 = vld [vmem:[#allocation2 + $0x10] sm:$0xff] }
 0x165   : > { %v3957_v12 = vpop.f32.mrb[51].mxu1 }
 0x166   : > { %v1310_v44 = vadd.f32 %v3955_v32, %v5233_v20  ;;  %v3958_v40 = vadd.f32 %v3957_v12, %v3956_v33 }
 0x167   : > { %4149 = vmatmul.mubr.msk.bf16.gmra.mrb[124].mxu1 %vm409_vm0, %v5226_v7 }
 0x168   : > { %v1436_v54 = vadd.f32 %v1310_v44, %v442_v37  ;;  %v1313_v60 = vadd.f32 %v3958_v40, %v5237_v25  ;;  %4152 = vmatprep.mubr.msk.bf16.mxu1 %vm409_vm0, %v5243_v28  ;;  %v445_v37 = vld [vmem:[#allocation2 + $0x18] sm:$0xff]  ;;  %v1600_v40 = vunpack.c.l.bf16 %v5135_v41 }
 0x16a   : > { %1469 = vst.msk [vmem:[#allocation2] sm:$0xff] %vm409_vm0, %v1436_v54  ;;  %v1437_v21 = vadd.f32 %v1313_v60, %v443_v51  ;;  %v3959_v6 = vpop.f32.mrb[52].mxu1  ;;  %v1601_v51 = vunpack.c.h.bf16 %v5135_v41  ;;  %v447_v41 = vld [vmem:[#allocation2 + $0x28] sm:$0xff] }
 0x16b   : > { %v3960_v13 = vpop.f32.mrb[53].mxu1 }
 0x16c   : > { %1470 = vst.msk [vmem:[#allocation2 + $0x8] sm:$0xff] %vm409_vm0, %v1437_v21  ;;  %v3961_v55 = vadd.f32 %v3960_v13, %v3959_v6  ;;  %v3962_v20 = vpop.f32.mrb[54].mxu1 }
 0x16d   : > { %v3963_v26 = vpop.f32.mrb[55].mxu1 }
 0x16e   : > { %v1318_v32 = vadd.f32 %v3961_v55, %v5254_v42  ;;  %v3964_v33 = vadd.f32 %v3963_v26, %v3962_v20  ;;  %v446_v20 = vld [vmem:[#allocation2 + $0x20] sm:$0xff] }
 0x16f   : > { %4153 = vmatmul.mubr.msk.bf16.gmra.mrb[128].mxu1 %vm409_vm0, %v5268_v49 }
 0x170   : > { %v1438_v25 = vadd.f32 %v1318_v32, %v444_v17  ;;  %v1321_v12 = vadd.f32 %v3964_v33, %v5260_v46  ;;  %4156 = vmatprep.mubr.msk.bf16.mxu1 %vm409_vm0, %v5286_v4 }
 0x171   : > { %v1504_v44 = vld [vmem:[#allocation2] sm:$0xff] }
 0x172   : > { %1471 = vst.msk [vmem:[#allocation2 + $0x10] sm:$0xff] %vm409_vm0, %v1438_v25  ;;  %v1439_v54 = vadd.f32 %v1321_v12, %v445_v37  ;;  %v3965_v42 = vpop.f32.mrb[56].mxu1  ;;  %v1536_v60 = vmul.f32 2.0, %v1504_v44 }
 0x173   : > { %v3966_v21 = vpop.f32.mrb[57].mxu1  ;;  %v1505_v6 = vld [vmem:[#allocation2 + $0x8] sm:$0xff] }
 0x174   : > { %1472 = vst.msk [vmem:[#allocation2 + $0x18] sm:$0xff] %vm409_vm0, %v1439_v54  ;;  %v3967_v13 = vadd.f32 %v3966_v21, %v3965_v42  ;;  %v3968_v55 = vpop.f32.mrb[58].mxu1  ;;  %v1537_v46 = vmul.f32 2.0, %v1505_v6  ;;  %v1632_v33 = vsub.f32 %v1536_v60, %v1600_v40  ;;  %v1602_v54 = vunpack.c.l.bf16 %v5146_v45 }
 0x175   : > { %v3969_v17 = vpop.f32.mrb[59].mxu1  ;;  %v1603_v42 = vunpack.c.h.bf16 %v5146_v45  ;;  %v5835_v21 = vmov 0  }
 0x176   : > { %v1326_v26 = vadd.f32 %v3967_v13, %v5274_v34  ;;  %v3970_v32 = vadd.f32 %v3969_v17, %v3968_v55  ;;  %v1633_v52 = vsub.f32 %v1537_v46, %v1601_v51  ;;  %v448_v55 = vld [vmem:[#allocation2 + $0x30] sm:$0xff] }
 0x177   : > { %4157 = vmatmul.mubr.msk.bf16.gmra.mrb[132].mxu1 %vm409_vm0, %v5304_v29 }
 0x178   : > { %v1440_v37 = vadd.f32 %v1326_v26, %v446_v20  ;;  %v1329_v25 = vadd.f32 %v3970_v32, %v5280_v0  ;;  %v2700_v12 = vpack.c.bf16 %v1633_v52, %v1632_v33  ;;  %4160 = vmatprep.mubr.msk.bf16.mxu1 %vm409_vm0, %v5318_v43  ;;  %v449_v32 = vld [vmem:[#allocation2 + $0x38] sm:$0xff] }
 0x179   : > { %v1506_v44 = vld [vmem:[#allocation2 + $0x10] sm:$0xff] }
 0x17a   : > { %1473 = vst.msk [vmem:[#allocation2 + $0x20] sm:$0xff] %vm409_vm0, %v1440_v37  ;;  %v1441_v34 = vadd.f32 %v1329_v25, %v447_v41  ;;  %v3971_v40 = vpop.f32.mrb[60].mxu1  ;;  %3787 = vmatmul.mubr.msk.bf16.vlgmr.msra.gmra.mrb[16].mxu0 %vm409_vm0, %v2700_v12  ;;  %v1538_v51 = vmul.f32 2.0, %v1506_v44  ;;  %v1604_v44 = vunpack.c.l.bf16 %v5154_v48 }
 0x17b   : > { %v3972_v60 = vpop.f32.mrb[61].mxu1  ;;  %2826 = vmatprep.mubr.bf16.mxu0 %v5835_v21  ;;  %v1507_v0 = vld [vmem:[#allocation2 + $0x18] sm:$0xff] }
 0x17c   : > { %1474 = vst.msk [vmem:[#allocation2 + $0x28] sm:$0xff] %vm409_vm0, %v1441_v34  ;;  %v3973_v52 = vadd.f32 %v3972_v60, %v3971_v40  ;;  %v3974_v6 = vpop.f32.mrb[62].mxu1  ;;  %v1539_v13 = vmul.f32 2.0, %v1507_v0  ;;  %v1634_v17 = vsub.f32 %v1538_v51, %v1602_v54  ;;  %v1605_v34 = vunpack.c.h.bf16 %v5154_v48 }
 0x17d   : > { %v3975_v46 = vpop.f32.mrb[63].mxu1 }
 0x17e   : > { %v1334_v45 = vadd.f32 %v3973_v52, %v5292_v5  ;;  %v3976_v20 = vadd.f32 %v3975_v46, %v3974_v6  ;;  %v1635_v26 = vsub.f32 %v1539_v13, %v1603_v42  ;;  %v450_v52 = vld [vmem:[#allocation2 + $0x40] sm:$0xff] }
 0x17f   : > { %4161 = vmatmul.mubr.msk.bf16.gmra.mrb[136].mxu1 %vm409_vm0, %v5332_v18 }
 0x180   : > { %v1442_v33 = vadd.f32 %v1334_v45, %v448_v55  ;;  %v1337_v41 = vadd.f32 %v3976_v20, %v5298_v23  ;;  %v2701_v37 = vpack.c.bf16 %v1635_v26, %v1634_v17  ;;  %4164 = vmatprep.mubr.msk.bf16.mxu1 %vm409_vm0, %v5346_v24  ;;  %v451_v45 = vld [vmem:[#allocation2 + $0x48] sm:$0xff] }
 0x181   : > { %v1508_v25 = vld [vmem:[#allocation2 + $0x20] sm:$0xff] }
 0x182   : > { %1475 = vst.msk [vmem:[#allocation2 + $0x30] sm:$0xff] %vm409_vm0, %v1442_v33  ;;  %v1443_v5 = vadd.f32 %v1337_v41, %v449_v32  ;;  %v3977_v54 = vpop.f32.mrb[64].mxu1  ;;  %3788 = vmatmul.mubr.msk.bf16.gmra.mrb[20].mxu0 %vm409_vm0, %v2701_v37  ;;  %v1540_v42 = vmul.f32 2.0, %v1508_v25  ;;  %v1606_v33 = vunpack.c.l.bf16 %v5194_v53  ;;  %v1607_v41 = vunpack.c.h.bf16 %v5194_v53 }
 0x183   : > { %v3978_v40 = vpop.f32.mrb[65].mxu1  ;;  %2836 = vmatprep.mubr.bf16.mxu0 %v5835_v21  ;;  %v1509_v23 = vld [vmem:[#allocation2 + $0x28] sm:$0xff] }
 0x184   : > { %1476 = vst.msk [vmem:[#allocation2 + $0x38] sm:$0xff] %vm409_vm0, %v1443_v5  ;;  %v3979_v51 = vadd.f32 %v3978_v40, %v3977_v54  ;;  %v3980_v60 = vpop.f32.mrb[66].mxu1  ;;  %v1541_v0 = vmul.f32 2.0, %v1509_v23  ;;  %v1636_v55 = vsub.f32 %v1540_v42, %v1604_v44  ;;  %v452_v42 = vld [vmem:[#allocation2 + $0x50] sm:$0xff] }
 0x185   : > { %v3981_v6 = vpop.f32.mrb[67].mxu1 }
 0x186   : > { %v1342_v48 = vadd.f32 %v3979_v51, %v5229_v11  ;;  %v3982_v13 = vadd.f32 %v3981_v6, %v3980_v60  ;;  %v1637_v46 = vsub.f32 %v1541_v0, %v1605_v34  ;;  %v453_v0 = vld [vmem:[#allocation2 + $0x58] sm:$0xff] }
 0x187   : > { %4165 = vmatmul.mubr.msk.bf16.gmra.mrb[140].mxu1 %vm409_vm0, %v5360_v30 }
 0x188   : > { %v1444_v20 = vadd.f32 %v1342_v48, %v450_v52  ;;  %v1345_v17 = vadd.f32 %v3982_v13, %v5231_v19  ;;  %4170 = vmatprep.mubr.msk.bf16.mxu1 %vm409_vm0, %v2700_v12  ;;  %v2702_v26 = vpack.c.bf16 %v1637_v46, %v1636_v55  ;;  %v1608_v55 = vunpack.c.l.bf16 %v5202_v57 }
 0x189   : > { %v1510_v32 = vld [vmem:[#allocation2 + $0x30] sm:$0xff]  ;;  %v1609_v46 = vunpack.c.h.bf16 %v5202_v57 }
 0x18a   : > { %1477 = vst.msk [vmem:[#allocation2 + $0x40] sm:$0xff] %vm409_vm0, %v1444_v20  ;;  %v1445_v11 = vadd.f32 %v1345_v17, %v451_v45  ;;  %v3983_v25 = vpop.f32.mrb[68].mxu1  ;;  %3789 = vmatmul.mubr.msk.bf16.gmra.mrb[24].mxu0 %vm409_vm0, %v2702_v26  ;;  %v1542_v44 = vmul.f32 2.0, %v1510_v32 }
 0x18b   : > { %v3984_v34 = vpop.f32.mrb[69].mxu1  ;;  %2846 = vmatprep.mubr.bf16.mxu0 %v5835_v21  ;;  %v1511_v5 = vld [vmem:[#allocation2 + $0x38] sm:$0xff] }
 0x18c   : > { %1478 = vst.msk [vmem:[#allocation2 + $0x48] sm:$0xff] %vm409_vm0, %v1445_v11  ;;  %v3985_v19 = vadd.f32 %v3984_v34, %v3983_v25  ;;  %v3986_v12 = vpop.f32.mrb[70].mxu1  ;;  %v1543_v54 = vmul.f32 2.0, %v1511_v5  ;;  %v1638_v51 = vsub.f32 %v1542_v44, %v1606_v33  ;;  %v454_v33 = vld [vmem:[#allocation2 + $0x60] sm:$0xff]  ;;  %v455_v34 = vld [vmem:[#allocation2 + $0x68] sm:$0xff] }
 0x18d   : > { %v3987_v40 = vpop.f32.mrb[71].mxu1 }
 0x18e   : > { %v1350_v53 = vadd.f32 %v3985_v19, %v5245_v31  ;;  %v3988_v23 = vadd.f32 %v3987_v40, %v3986_v12  ;;  %v1639_v60 = vsub.f32 %v1543_v54, %v1607_v41  ;;  %v1611_v40 = vunpack.c.h.bf16 %v5210_v61 }
 0x18f   : > { %4171 = vmatmul.mubr.msk.bf16.vlgmr.msra.gmra.mrb[112].mxu1 %vm409_vm0, %v2701_v37 }
 0x190   : > { %v1446_v52 = vadd.f32 %v1350_v53, %v452_v42  ;;  %v1353_v6 = vadd.f32 %v3988_v23, %v5252_v39  ;;  %4174 = vmatprep.mubr.msk.bf16.mxu1 %vm409_vm0, %v2702_v26  ;;  %v2703_v48 = vpack.c.bf16 %v1639_v60, %v1638_v51  ;;  %v1610_v42 = vunpack.c.l.bf16 %v5210_v61 }
 0x191   : > { %v1512_v13 = vld [vmem:[#allocation2 + $0x40] sm:$0xff] }
 0x192   : > { %1479 = vst.msk [vmem:[#allocation2 + $0x50] sm:$0xff] %vm409_vm0, %v1446_v52  ;;  %v1447_v31 = vadd.f32 %v1353_v6, %v453_v0  ;;  %v3989_v45 = vpop.f32.mrb[72].mxu1  ;;  %3790 = vmatmul.mubr.msk.bf16.gmra.mrb[28].mxu0 %vm409_vm0, %v2703_v48  ;;  %v1544_v20 = vmul.f32 2.0, %v1512_v13  ;;  %v456_v6 = vld [vmem:[#allocation2 + $0x70] sm:$0xff] }
 0x193   : > { %v3990_v17 = vpop.f32.mrb[73].mxu1  ;;  %2856 = vmatprep.mubr.bf16.mxu0 %v5835_v21  ;;  %v1513_v37 = vld [vmem:[#allocation2 + $0x48] sm:$0xff] }
 0x194   : > { %1480 = vst.msk [vmem:[#allocation2 + $0x58] sm:$0xff] %vm409_vm0, %v1447_v31  ;;  %v3991_v39 = vadd.f32 %v3990_v17, %v3989_v45  ;;  %v3992_v26 = vpop.f32.mrb[74].mxu1  ;;  %v1545_v32 = vmul.f32 2.0, %v1513_v37  ;;  %v1640_v25 = vsub.f32 %v1544_v20, %v1608_v55  ;;  %v457_v31 = vld [vmem:[#allocation2 + $0x78] sm:$0xff] }
 0x195   : > { %v3993_v41 = vpop.f32.mrb[75].mxu1 }
 0x196   : > { %v1358_v57 = vadd.f32 %v3991_v39, %v5270_v59  ;;  %v3994_v11 = vadd.f32 %v3993_v41, %v3992_v26  ;;  %v1641_v44 = vsub.f32 %v1545_v32, %v1609_v46  ;;  %v1612_v39 = vunpack.c.l.bf16 %v5218_v1 }
 0x197   : > { %4175 = vmatmul.mubr.msk.bf16.gmra.mrb[116].mxu1 %vm409_vm0, %v2703_v48  ;;  %v1613_v26 = vunpack.c.h.bf16 %v5218_v1 }
 0x198   : > { %v1448_v5 = vadd.f32 %v1358_v57, %v454_v33  ;;  %v1361_v19 = vadd.f32 %v3994_v11, %v5272_v58  ;;  %v2704_v12 = vpack.c.bf16 %v1641_v44, %v1640_v25  ;;  %v458_v44 = vld [vmem:[#allocation2 + $0x80] sm:$0xff] }
 0x199   : > { %v1514_v54 = vld [vmem:[#allocation2 + $0x50] sm:$0xff] }
 0x19a   : > { %1481 = vst.msk [vmem:[#allocation2 + $0x60] sm:$0xff] %vm409_vm0, %v1448_v5  ;;  %v1449_v53 = vadd.f32 %v1361_v19, %v455_v34  ;;  %v3995_v23 = vpop.f32.mrb[76].mxu1  ;;  %3791 = vmatmul.mubr.msk.bf16.gmra.mrb[32].mxu0 %vm409_vm0, %v2704_v12  ;;  %4178 = vmatprep.mubr.msk.bf16.mxu1 %vm409_vm0, %v2704_v12  ;;  %v1546_v59 = vmul.f32 2.0, %v1514_v54  ;;  %v459_v54 = vld [vmem:[#allocation2 + $0x88] sm:$0xff] }
 0x19b   : > { %v3996_v51 = vpop.f32.mrb[77].mxu1  ;;  %2866 = vmatprep.mubr.bf16.mxu0 %v5835_v21  ;;  %v1515_v60 = vld [vmem:[#allocation2 + $0x58] sm:$0xff] }
 0x19c   : > { %1482 = vst.msk [vmem:[#allocation2 + $0x68] sm:$0xff] %vm409_vm0, %v1449_v53  ;;  %v3997_v58 = vadd.f32 %v3996_v51, %v3995_v23  ;;  %v3998_v0 = vpop.f32.mrb[78].mxu1  ;;  %v1547_v52 = vmul.f32 2.0, %v1515_v60  ;;  %v1642_v55 = vsub.f32 %v1546_v59, %v1610_v42  ;;  %v1614_v59 = vunpack.c.l.bf16 %v5226_v7 }
 0x19d   : > { %v3999_v61 = vpop.f32.mrb[79].mxu1  ;;  %v1615_v51 = vunpack.c.h.bf16 %v5226_v7 }
 0x19e   : > { %v1366_v48 = vadd.f32 %v3997_v58, %v5288_v9  ;;  %v4000_v13 = vadd.f32 %v3999_v61, %v3998_v0  ;;  %v1643_v46 = vsub.f32 %v1547_v52, %v1611_v40 }
 0x1a0   : > { %v1450_v45 = vadd.f32 %v1366_v48, %v456_v6  ;;  %v1369_v20 = vadd.f32 %v4000_v13, %v5290_v16  ;;  %v2705_v17 = vpack.c.bf16 %v1643_v46, %v1642_v55  ;;  %v460_v48 = vld [vmem:[#allocation2 + $0x90] sm:$0xff] }
 0x1a1   : > { %v1516_v37 = vld [vmem:[#allocation2 + $0x60] sm:$0xff] }
 0x1a2   : > { %1483 = vst.msk [vmem:[#allocation2 + $0x70] sm:$0xff] %vm409_vm0, %v1450_v45  ;;  %v1451_v32 = vadd.f32 %v1369_v20, %v457_v31  ;;  %v4001_v33 = vpop.f32.mrb[80].mxu1  ;;  %3792 = vmatmul.mubr.msk.bf16.gmra.mrb[36].mxu0 %vm409_vm0, %v2705_v17  ;;  %4179 = vmatmul.mubr.msk.bf16.gmra.mrb[120].mxu1 %vm409_vm0, %v2705_v17  ;;  %v1548_v9 = vmul.f32 2.0, %v1516_v37  ;;  %v461_v45 = vld [vmem:[#allocation2 + $0x98] sm:$0xff] }
 0x1a3   : > { %v4002_v41 = vpop.f32.mrb[81].mxu1  ;;  %2876 = vmatprep.mubr.bf16.mxu0 %v5835_v21  ;;  %v1517_v57 = vld [vmem:[#allocation2 + $0x68] sm:$0xff] }
 0x1a4   : > { %1484 = vst.msk [vmem:[#allocation2 + $0x78] sm:$0xff] %vm409_vm0, %v1451_v32  ;;  %v4003_v16 = vadd.f32 %v4002_v41, %v4001_v33  ;;  %v4004_v11 = vpop.f32.mrb[82].mxu1  ;;  %v1549_v25 = vmul.f32 2.0, %v1517_v57  ;;  %v1644_v19 = vsub.f32 %v1548_v9, %v1612_v39  ;;  %v1617_v32 = vunpack.c.h.bf16 %v5243_v28 }
 0x1a5   : > { %v4005_v1 = vpop.f32.mrb[83].mxu1 }
 0x1a6   : > { %v1374_v34 = vadd.f32 %v4003_v16, %v5306_v35  ;;  %v4006_v5 = vadd.f32 %v4005_v1, %v4004_v11  ;;  %v1645_v12 = vsub.f32 %v1549_v25, %v1613_v26  ;;  %v1616_v26 = vunpack.c.l.bf16 %v5243_v28  ;;  %v462_v25 = vld [vmem:[#allocation2 + $0xa0] sm:$0xff] }
 0x1a8   : > { %v1452_v42 = vadd.f32 %v1374_v34, %v458_v44  ;;  %v1377_v40 = vadd.f32 %v4006_v5, %v5308_v38  ;;  %v2706_v53 = vpack.c.bf16 %v1645_v12, %v1644_v19  ;;  %v463_v19 = vld [vmem:[#allocation2 + $0xa8] sm:$0xff] }
 0x1a9   : > { %v1518_v23 = vld [vmem:[#allocation2 + $0x70] sm:$0xff] }
 0x1aa   : > { %1485 = vst.msk [vmem:[#allocation2 + $0x80] sm:$0xff] %vm409_vm0, %v1452_v42  ;;  %v1453_v60 = vadd.f32 %v1377_v40, %v459_v54  ;;  %v4007_v58 = vpop.f32.mrb[84].mxu1  ;;  %3793 = vmatmul.mubr.msk.bf16.gmra.mrb[40].mxu0 %vm409_vm0, %v2706_v53  ;;  %4182 = vmatprep.mubr.msk.bf16.mxu1 %vm409_vm0, %v2706_v53  ;;  %v1550_v35 = vmul.f32 2.0, %v1518_v23  ;;  %v1618_v53 = vunpack.c.l.bf16 %v5268_v49  ;;  %v1619_v23 = vunpack.c.h.bf16 %v5268_v49 }
 0x1ab   : > { %v4008_v0 = vpop.f32.mrb[85].mxu1  ;;  %2886 = vmatprep.mubr.bf16.mxu0 %v5835_v21  ;;  %v1519_v52 = vld [vmem:[#allocation2 + $0x78] sm:$0xff] }
 0x1ac   : > { %1486 = vst.msk [vmem:[#allocation2 + $0x88] sm:$0xff] %vm409_vm0, %v1453_v60  ;;  %v4009_v38 = vadd.f32 %v4008_v0, %v4007_v58  ;;  %v4010_v6 = vpop.f32.mrb[86].mxu1  ;;  %v1551_v61 = vmul.f32 2.0, %v1519_v52  ;;  %v1646_v46 = vsub.f32 %v1550_v35, %v1614_v59  ;;  %v464_v52 = vld [vmem:[#allocation2 + $0xb0] sm:$0xff] }
 0x1ad   : > { %v4011_v7 = vpop.f32.mrb[87].mxu1 }
 0x1ae   : > { %v1382_v13 = vadd.f32 %v4009_v38, %v5320_v47  ;;  %v4012_v55 = vadd.f32 %v4011_v7, %v4010_v6  ;;  %v1647_v31 = vsub.f32 %v1551_v61, %v1615_v51  ;;  %v465_v7 = vld [vmem:[#allocation2 + $0xb8] sm:$0xff] }
 0x1b0   : > { %v1454_v20 = vadd.f32 %v1382_v13, %v460_v48  ;;  %v1385_v17 = vadd.f32 %v4012_v55, %v5322_v63  ;;  %v2707_v37 = vpack.c.bf16 %v1647_v31, %v1646_v46 }
 0x1b1   : > { %v1520_v39 = vld [vmem:[#allocation2 + $0x80] sm:$0xff] }
 0x1b2   : > { %1487 = vst.msk [vmem:[#allocation2 + $0x90] sm:$0xff] %vm409_vm0, %v1454_v20  ;;  %v1455_v33 = vadd.f32 %v1385_v17, %v461_v45  ;;  %v4013_v9 = vpop.f32.mrb[88].mxu1  ;;  %3794 = vmatmul.mubr.msk.bf16.gmra.mrb[44].mxu0 %vm409_vm0, %v2707_v37  ;;  %4183 = vmatmul.mubr.msk.bf16.gmra.mrb[124].mxu1 %vm409_vm0, %v2707_v37  ;;  %v1552_v47 = vmul.f32 2.0, %v1520_v39  ;;  %v1620_v45 = vunpack.c.l.bf16 %v5286_v4  ;;  %v1621_v20 = vunpack.c.h.bf16 %v5286_v4 }
 0x1b3   : > { %v4014_v41 = vpop.f32.mrb[89].mxu1  ;;  %2896 = vmatprep.mubr.bf16.mxu0 %v5835_v21  ;;  %v1521_v57 = vld [vmem:[#allocation2 + $0x88] sm:$0xff] }
 0x1b4   : > { %1488 = vst.msk [vmem:[#allocation2 + $0x98] sm:$0xff] %vm409_vm0, %v1455_v33  ;;  %v4015_v63 = vadd.f32 %v4014_v41, %v4013_v9  ;;  %v4016_v16 = vpop.f32.mrb[90].mxu1  ;;  %v1553_v11 = vmul.f32 2.0, %v1521_v57  ;;  %v1648_v34 = vsub.f32 %v1552_v47, %v1616_v26  ;;  %v466_v9 = vld [vmem:[#allocation2 + $0xc0] sm:$0xff] }
 0x1b5   : > { %v4017_v28 = vpop.f32.mrb[91].mxu1 }
 0x1b6   : > { %v1390_v44 = vadd.f32 %v4015_v63, %v5334_v56  ;;  %v4018_v1 = vadd.f32 %v4017_v28, %v4016_v16  ;;  %v1649_v5 = vsub.f32 %v1553_v11, %v1617_v32  ;;  %v467_v16 = vld [vmem:[#allocation2 + $0xc8] sm:$0xff] }
 0x1b8   : > { %v1456_v12 = vadd.f32 %v1390_v44, %v462_v25  ;;  %v1393_v54 = vadd.f32 %v4018_v1, %v5336_v3  ;;  %v2708_v42 = vpack.c.bf16 %v1649_v5, %v1648_v34  ;;  %v1622_v1 = vunpack.c.l.bf16 %v5304_v29 }
 0x1b9   : > { %v1522_v40 = vld [vmem:[#allocation2 + $0x90] sm:$0xff]  ;;  %v1623_v34 = vunpack.c.h.bf16 %v5304_v29 }
 0x1ba   : > { %1489 = vst.msk [vmem:[#allocation2 + $0xa0] sm:$0xff] %vm409_vm0, %v1456_v12  ;;  %v1457_v59 = vadd.f32 %v1393_v54, %v463_v19  ;;  %v4019_v51 = vpop.f32.mrb[92].mxu1  ;;  %3795 = vmatmul.mubr.msk.bf16.gmra.mrb[48].mxu0 %vm409_vm0, %v2708_v42  ;;  %4186 = vmatprep.mubr.msk.bf16.mxu1 %vm409_vm0, %v2708_v42  ;;  %v1554_v56 = vmul.f32 2.0, %v1522_v40 }
 0x1bb   : > { %v4020_v60 = vpop.f32.mrb[93].mxu1  ;;  %2906 = vmatprep.mubr.bf16.mxu0 %v5835_v21  ;;  %v1523_v58 = vld [vmem:[#allocation2 + $0x98] sm:$0xff] }
 0x1bc   : > { %1490 = vst.msk [vmem:[#allocation2 + $0xa8] sm:$0xff] %vm409_vm0, %v1457_v59  ;;  %v4021_v3 = vadd.f32 %v4020_v60, %v4019_v51  ;;  %v4022_v35 = vpop.f32.mrb[94].mxu1  ;;  %v1555_v0 = vmul.f32 2.0, %v1523_v58  ;;  %v1650_v61 = vsub.f32 %v1554_v56, %v1618_v53  ;;  %v468_v53 = vld [vmem:[#allocation2 + $0xd0] sm:$0xff]  ;;  %v469_v60 = vld [vmem:[#allocation2 + $0xd8] sm:$0xff] }
 0x1bd   : > { %v4023_v49 = vpop.f32.mrb[95].mxu1 }
 0x1be   : > { %v1398_v38 = vadd.f32 %v4021_v3, %v5348_v10  ;;  %v4024_v6 = vadd.f32 %v4023_v49, %v4022_v35  ;;  %v1651_v48 = vsub.f32 %v1555_v0, %v1619_v23  ;;  %v1625_v49 = vunpack.c.h.bf16 %v5318_v43 }
 0x1c0   : > { %v1458_v13 = vadd.f32 %v1398_v38, %v464_v52  ;;  %v1401_v55 = vadd.f32 %v4024_v6, %v5350_v14  ;;  %v2709_v46 = vpack.c.bf16 %v1651_v48, %v1650_v61  ;;  %v1624_v52 = vunpack.c.l.bf16 %v5318_v43 }
 0x1c1   : > { %v1524_v31 = vld [vmem:[#allocation2 + $0xa0] sm:$0xff] }
 0x1c2   : > { %1491 = vst.msk [vmem:[#allocation2 + $0xb0] sm:$0xff] %vm409_vm0, %v1458_v13  ;;  %v1459_v17 = vadd.f32 %v1401_v55, %v465_v7  ;;  %v4025_v37 = vpop.f32.mrb[96].mxu1  ;;  %3796 = vmatmul.mubr.msk.bf16.gmra.mrb[52].mxu0 %vm409_vm0, %v2709_v46  ;;  %4187 = vmatmul.mubr.msk.bf16.gmra.mrb[128].mxu1 %vm409_vm0, %v2709_v46  ;;  %v1556_v10 = vmul.f32 2.0, %v1524_v31  ;;  %v470_v55 = vld [vmem:[#allocation2 + $0xe0] sm:$0xff] }
 0x1c3   : > { %v4026_v39 = vpop.f32.mrb[97].mxu1  ;;  %2916 = vmatprep.mubr.bf16.mxu0 %v5835_v21  ;;  %v1525_v26 = vld [vmem:[#allocation2 + $0xa8] sm:$0xff] }
 0x1c4   : > { %1492 = vst.msk [vmem:[#allocation2 + $0xb8] sm:$0xff] %vm409_vm0, %v1459_v17  ;;  %v4027_v14 = vadd.f32 %v4026_v39, %v4025_v37  ;;  %v4028_v32 = vpop.f32.mrb[98].mxu1  ;;  %v1557_v33 = vmul.f32 2.0, %v1525_v26  ;;  %v1652_v57 = vsub.f32 %v1556_v10, %v1620_v45  ;;  %v471_v17 = vld [vmem:[#allocation2 + $0xe8] sm:$0xff] }
 0x1c5   : > { %v4029_v4 = vpop.f32.mrb[99].mxu1 }
 0x1c6   : > { %v1406_v47 = vadd.f32 %v4027_v14, %v5362_v22  ;;  %v4030_v41 = vadd.f32 %v4029_v4, %v4028_v32  ;;  %v1653_v63 = vsub.f32 %v1557_v33, %v1621_v20  ;;  %v1626_v14 = vunpack.c.l.bf16 %v5332_v18 }
 0x1c7   : > { %v1627_v32 = vunpack.c.h.bf16 %v5332_v18 }
 0x1c8   : > { %v1460_v11 = vadd.f32 %v1406_v47, %v466_v9  ;;  %v1409_v25 = vadd.f32 %v4030_v41, %v5364_v36  ;;  %v2710_v28 = vpack.c.bf16 %v1653_v63, %v1652_v57  ;;  %v472_v63 = vld [vmem:[#allocation2 + $0xf0] sm:$0xff] }
 0x1c9   : > { %v1526_v44 = vld [vmem:[#allocation2 + $0xb0] sm:$0xff] }
 0x1ca   : > { %1493 = vst.msk [vmem:[#allocation2 + $0xc0] sm:$0xff] %vm409_vm0, %v1460_v11  ;;  %v1461_v5 = vadd.f32 %v1409_v25, %v467_v16  ;;  %v4031_v19 = vpop.f32.mrb[100].mxu1  ;;  %3797 = vmatmul.mubr.msk.bf16.gmra.mrb[56].mxu0 %vm409_vm0, %v2710_v28  ;;  %4190 = vmatprep.mubr.msk.bf16.mxu1 %vm409_vm0, %v2710_v28  ;;  %v1558_v22 = vmul.f32 2.0, %v1526_v44  ;;  %v473_v44 = vld [vmem:[#allocation2 + $0xf8] sm:$0xff] }
 0x1cb   : > { %v4032_v12 = vpop.f32.mrb[101].mxu1  ;;  %2926 = vmatprep.mubr.bf16.mxu0 %v5835_v21  ;;  %v1527_v54 = vld [vmem:[#allocation2 + $0xb8] sm:$0xff] }
 0x1cc   : > { %1494 = vst.msk [vmem:[#allocation2 + $0xc8] sm:$0xff] %vm409_vm0, %v1461_v5  ;;  %v4033_v36 = vadd.f32 %v4032_v12, %v4031_v19  ;;  %v4034_v42 = vpop.f32.mrb[102].mxu1  ;;  %v1559_v40 = vmul.f32 2.0, %v1527_v54  ;;  %v1654_v51 = vsub.f32 %v1558_v22, %v1622_v1  ;;  %v1628_v22 = vunpack.c.l.bf16 %v5346_v24 }
 0x1cd   : > { %v4035_v29 = vpop.f32.mrb[103].mxu1  ;;  %v1629_v12 = vunpack.c.h.bf16 %v5346_v24  ;;  %v1630_v24 = vunpack.c.l.bf16 %v5360_v30 }
 0x1ce   : > { %v1414_v23 = vadd.f32 %v4033_v36, %v5373_v8  ;;  %v4036_v59 = vadd.f32 %v4035_v29, %v4034_v42  ;;  %v1655_v56 = vsub.f32 %v1559_v40, %v1623_v34 }
 0x1d0   : > { %v1462_v58 = vadd.f32 %v1414_v23, %v468_v53  ;;  %v1417_v3 = vadd.f32 %v4036_v59, %v5375_v50  ;;  %v2711_v35 = vpack.c.bf16 %v1655_v56, %v1654_v51  ;;  %v1631_v23 = vunpack.c.h.bf16 %v5360_v30 }
 0x1d1   : > { %v1528_v0 = vld [vmem:[#allocation2 + $0xc0] sm:$0xff] }
 0x1d2   : > { %1495 = vst.msk [vmem:[#allocation2 + $0xd0] sm:$0xff] %vm409_vm0, %v1462_v58  ;;  %v1463_v38 = vadd.f32 %v1417_v3, %v469_v60  ;;  %v4037_v6 = vpop.f32.mrb[104].mxu1  ;;  %3798 = vmatmul.mubr.msk.bf16.gmra.mrb[60].mxu0 %vm409_vm0, %v2711_v35  ;;  %4191 = vmatmul.mubr.msk.bf16.gmra.mrb[132].mxu1 %vm409_vm0, %v2711_v35  ;;  %v1560_v8 = vmul.f32 2.0, %v1528_v0  ;;  %v3236_v35 = vlaneseq }
 0x1d3   : > { %v4038_v61 = vpop.f32.mrb[105].mxu1  ;;  %2936 = vmatprep.mubr.bf16.mxu0 %v5835_v21  ;;  %v1529_v48 = vld [vmem:[#allocation2 + $0xc8] sm:$0xff] }
 0x1d4   : > { %1496 = vst.msk [vmem:[#allocation2 + $0xd8] sm:$0xff] %vm409_vm0, %v1463_v38  ;;  %v4039_v50 = vadd.f32 %v4038_v61, %v4037_v6  ;;  %v4040_v7 = vpop.f32.mrb[106].mxu1  ;;  %v1561_v13 = vmul.f32 2.0, %v1529_v48  ;;  %v1656_v45 = vsub.f32 %v1560_v8, %v1624_v52  ;;  %v3237_v0 = vshrl.u32 %v3236_v35, 7  ;;  %v3234_v52 = vld [vmem:[%s5829_s7] sm:$0x7] }
 0x1d5   : > { %v4041_v43 = vpop.f32.mrb[107].mxu1 }
 0x1d6   : > { %v1422_v46 = vadd.f32 %v4039_v50, %v5382_v15  ;;  %v4042_v31 = vadd.f32 %v4041_v43, %v4040_v7  ;;  %v1657_v20 = vsub.f32 %v1561_v13, %v1625_v49  ;;  %v3238_v30 = vsub.s32 0, %v3237_v0 }
 0x1d7   : > { %v3242_v49 = vsub.s32 1, %v3237_v0 }
 0x1d8   : > { %v1464_v37 = vadd.f32 %v1422_v46, %v470_v55  ;;  %v1425_v10 = vadd.f32 %v4042_v31, %v5384_v62  ;;  %v2712_v39 = vpack.c.bf16 %v1657_v20, %v1656_v45 }
 0x1d9   : > { %v1530_v26 = vld [vmem:[#allocation2 + $0xd0] sm:$0xff]  ;;  %v5567_v38 = vrot.slane %v3234_v52, %v3242_v49 }
 0x1da   : > { %1497 = vst.msk [vmem:[#allocation2 + $0xe0] sm:$0xff] %vm409_vm0, %v1464_v37  ;;  %v1465_v33 = vadd.f32 %v1425_v10, %v471_v17  ;;  %v4043_v9 = vpop.f32.mrb[108].mxu1  ;;  %3799 = vmatmul.mubr.msk.bf16.gmra.mrb[64].mxu0 %vm409_vm0, %v2712_v39  ;;  %4194 = vmatprep.mubr.msk.bf16.mxu1 %vm409_vm0, %v2712_v39  ;;  %v1562_v15 = vmul.f32 2.0, %v1530_v26  ;;  %v3246_v39 = vsub.s32 2, %v3237_v0 }
 0x1db   : > { %v4044_v4 = vpop.f32.mrb[109].mxu1  ;;  %2946 = vmatprep.mubr.bf16.mxu0 %v5835_v21  ;;  %v1531_v47 = vld [vmem:[#allocation2 + $0xd8] sm:$0xff] }
 0x1dc   : > { %1498 = vst.msk [vmem:[#allocation2 + $0xe8] sm:$0xff] %vm409_vm0, %v1465_v33  ;;  %v4045_v62 = vadd.f32 %v4044_v4, %v4043_v9  ;;  %v4046_v41 = vpop.f32.mrb[110].mxu1  ;;  %v1563_v57 = vmul.f32 2.0, %v1531_v47  ;;  %v1658_v25 = vsub.f32 %v1562_v15, %v1626_v14  ;;  %v5589_v15 = vrot.slane %v3234_v52, %v3246_v39 }
 0x1dd   : > { %v4047_v18 = vpop.f32.mrb[111].mxu1 }
 0x1de   : > { %v1430_v16 = vadd.f32 %v4045_v62, %v5390_v2  ;;  %v4048_v11 = vadd.f32 %v4047_v18, %v4046_v41  ;;  %v1659_v28 = vsub.f32 %v1563_v57, %v1627_v32 }
 0x1e0   : > { %v1466_v1 = vadd.f32 %v1430_v16, %v472_v63  ;;  %v1433_v34 = vadd.f32 %v4048_v11, %v5392_v27  ;;  %v2713_v5 = vpack.c.bf16 %v1659_v28, %v1658_v25 }
 0x1e1   : > { %v1532_v19 = vld [vmem:[#allocation2 + $0xe0] sm:$0xff] }
 0x1e2   : > { %1499 = vst.msk [vmem:[#allocation2 + $0xf0] sm:$0xff] %vm409_vm0, %v1466_v1  ;;  %v1467_v54 = vadd.f32 %v1433_v34, %v473_v44  ;;  %3800 = vmatmul.mubr.msk.bf16.gmra.mrb[68].mxu0 %vm409_vm0, %v2713_v5  ;;  %4195 = vmatmul.mubr.msk.bf16.gmra.mrb[136].mxu1 %vm409_vm0, %v2713_v5  ;;  %v1564_v2 = vmul.f32 2.0, %v1532_v19 }
 0x1e3   : > { %2956 = vmatprep.mubr.bf16.mxu0 %v5835_v21  ;;  %v1533_v36 = vld [vmem:[#allocation2 + $0xe8] sm:$0xff] }
 0x1e4   : > { %1500 = vst.msk [vmem:[#allocation2 + $0xf8] sm:$0xff] %vm409_vm0, %v1467_v54  ;;  %v1565_v27 = vmul.f32 2.0, %v1533_v36  ;;  %v1660_v42 = vsub.f32 %v1564_v2, %v1628_v22 }
 0x1e6   : > { %v1661_v40 = vsub.f32 %v1565_v27, %v1629_v12 }
 0x1e8   : > { %v2714_v53 = vpack.c.bf16 %v1661_v40, %v1660_v42 }
 0x1e9   : > { %v1534_v29 = vld [vmem:[#allocation2 + $0xf0] sm:$0xff] }
 0x1ea   : > { %3801 = vmatmul.mubr.msk.bf16.gmra.mrb[72].mxu0 %vm409_vm0, %v2714_v53  ;;  %4198 = vmatprep.mubr.msk.bf16.mxu1 %vm409_vm0, %v2714_v53  ;;  %v1566_v59 = vmul.f32 2.0, %v1534_v29 }
 0x1eb   : > { %2966 = vmatprep.mubr.bf16.mxu0 %v5835_v21  ;;  %v1535_v51 = vld [vmem:[#allocation2 + $0xf8] sm:$0xff]  ;;  %v5565_v21 = vrot.slane %v3234_v52, %v3238_v30 }
 0x1ec   : > { %v1567_v56 = vmul.f32 2.0, %v1535_v51  ;;  %v1662_v60 = vsub.f32 %v1566_v59, %v1630_v24 }
 0x1ee   : > { %v1663_v58 = vsub.f32 %v1567_v56, %v1631_v23 }
 0x1f0   : > { %v2715_v3 = vpack.c.bf16 %v1663_v58, %v1662_v60 }
 0x1f2   : > { %3802 = vmatmul.mubr.msk.bf16.gmra.mrb[76].mxu0 %vm409_vm0, %v2715_v3  ;;  %4199 = vmatmul.mubr.msk.bf16.gmra.mrb[140].mxu1 %vm409_vm0, %v2715_v3 }
 0x24d   : > { %v2818_v6 = vpop.f32.mrb[16].mxu0 }
 0x24e   : > { %v3251_v8 = vadd.f32 %v5565_v21, %v2818_v6  ;;  %v2820_v61 = vpop.f32.mrb[17].mxu0 }
 0x24f   : > { %v3252_v48 = vadd.f32 %v5567_v38, %v2820_v61  ;;  %v2822_v50 = vpop.f32.mrb[18].mxu0 }
 0x250   : > { %3347 = vst [vmem:[%s5571_s12] sm:$0xff] %v3251_v8  ;;  %v3254_v7 = vadd.f32 %v5565_v21, %v2822_v50  ;;  %v2824_v13 = vpop.f32.mrb[19].mxu0 }
 0x251   : > { %3348 = vst [vmem:[%s5571_s12 + $0x8] sm:$0xff] %v3252_v48  ;;  %v3255_v55 = vadd.f32 %v5567_v38, %v2824_v13 }
 0x252   : > { %3350 = vst [vmem:[%s5571_s12 + $0x18] sm:$0xff] %v3254_v7 }
 0x253   : > { %3351 = vst [vmem:[%s5571_s12 + $0x20] sm:$0xff] %v3255_v55 }
 0x255   : > { %v2828_v43 = vpop.f32.mrb[20].mxu0 }
 0x256   : > { %v3257_v46 = vadd.f32 %v5565_v21, %v2828_v43  ;;  %v2830_v31 = vpop.f32.mrb[21].mxu0 }
 0x257   : > { %v3258_v45 = vadd.f32 %v5567_v38, %v2830_v31  ;;  %v2832_v20 = vpop.f32.mrb[22].mxu0 }
 0x258   : > { %3353 = vst [vmem:[%s5571_s12 + $0x30] sm:$0xff] %v3257_v46  ;;  %v3260_v17 = vadd.f32 %v5565_v21, %v2832_v20  ;;  %v2834_v37 = vpop.f32.mrb[23].mxu0 }
 0x259   : > { %3354 = vst [vmem:[%s5571_s12 + $0x38] sm:$0xff] %v3258_v45  ;;  %v3261_v10 = vadd.f32 %v5567_v38, %v2834_v37 }
 0x25a   : > { %3356 = vst [vmem:[%s5571_s12 + $0x48] sm:$0xff] %v3260_v17 }
 0x25b   : > { %3357 = vst [vmem:[%s5571_s12 + $0x50] sm:$0xff] %v3261_v10 }
 0x25d   : > { %v2838_v26 = vpop.f32.mrb[24].mxu0 }
 0x25e   : > { %v3263_v14 = vadd.f32 %v5565_v21, %v2838_v26  ;;  %v2840_v32 = vpop.f32.mrb[25].mxu0 }
 0x25f   : > { %v3264_v33 = vadd.f32 %v5567_v38, %v2840_v32  ;;  %v2842_v9 = vpop.f32.mrb[26].mxu0 }
 0x260   : > { %3359 = vst [vmem:[%s5571_s12 + $0x60] sm:$0xff] %v3263_v14  ;;  %v3266_v4 = vadd.f32 %v5565_v21, %v2842_v9  ;;  %v2844_v47 = vpop.f32.mrb[27].mxu0 }
 0x261   : > { %3360 = vst [vmem:[%s5571_s12 + $0x68] sm:$0xff] %v3264_v33  ;;  %v3267_v62 = vadd.f32 %v5567_v38, %v2844_v47 }
 0x262   : > { %3362 = vst [vmem:[%s5571_s12 + $0x78] sm:$0xff] %v3266_v4  ;;  %v4172_v41 = vpop.f32.mrb[112].mxu1 }
 0x263   : > { %3363 = vst [vmem:[%s5571_s12 + $0x80] sm:$0xff] %v3267_v62  ;;  %v3259_v57 = vadd.f32 %v4172_v41, %v5589_v15  ;;  %v3011_v63 = vpop.f32.mrb[113].mxu1 }
 0x264   : > { %v3253_v18 = vadd.f32 %v5589_v15, %v3011_v63  ;;  %v4173_v16 = vpop.f32.mrb[114].mxu1 }
 0x265   : > { %3355 = vst [vmem:[%s5571_s12 + $0x40] sm:$0xff] %v3259_v57  ;;  %v3262_v11 = vadd.f32 %v4173_v16, %v5589_v15  ;;  %v2848_v25 = vpop.f32.mrb[28].mxu0  ;;  %v3014_v28 = vpop.f32.mrb[115].mxu1 }
 0x266   : > { %3349 = vst [vmem:[%s5571_s12 + $0x10] sm:$0xff] %v3253_v18  ;;  %v3269_v44 = vadd.f32 %v5565_v21, %v2848_v25  ;;  %v3256_v1 = vadd.f32 %v5589_v15, %v3014_v28  ;;  %v2850_v34 = vpop.f32.mrb[29].mxu0 }
 0x267   : > { %3358 = vst [vmem:[%s5571_s12 + $0x58] sm:$0xff] %v3262_v11  ;;  %v3270_v5 = vadd.f32 %v5567_v38, %v2850_v34  ;;  %v2852_v19 = vpop.f32.mrb[30].mxu0 }
 0x268   : > { %3365 = vst [vmem:[%s5571_s12 + $0x90] sm:$0xff] %v3269_v44  ;;  %3352 = vst [vmem:[%s5571_s12 + $0x28] sm:$0xff] %v3256_v1  ;;  %v3272_v22 = vadd.f32 %v5565_v21, %v2852_v19  ;;  %v2854_v12 = vpop.f32.mrb[31].mxu0 }
 0x269   : > { %3366 = vst [vmem:[%s5571_s12 + $0x98] sm:$0xff] %v3270_v5  ;;  %v3273_v54 = vadd.f32 %v5567_v38, %v2854_v12 }
 0x26a   : > { %3368 = vst [vmem:[%s5571_s12 + $0xa8] sm:$0xff] %v3272_v22  ;;  %v4176_v2 = vpop.f32.mrb[116].mxu1 }
 0x26b   : > { %3369 = vst [vmem:[%s5571_s12 + $0xb0] sm:$0xff] %v3273_v54  ;;  %v3271_v36 = vadd.f32 %v4176_v2, %v5589_v15  ;;  %v3027_v27 = vpop.f32.mrb[117].mxu1 }
 0x26c   : > { %v3265_v42 = vadd.f32 %v5589_v15, %v3027_v27  ;;  %v4177_v40 = vpop.f32.mrb[118].mxu1 }
 0x26d   : > { %3367 = vst [vmem:[%s5571_s12 + $0xa0] sm:$0xff] %v3271_v36  ;;  %v3274_v53 = vadd.f32 %v4177_v40, %v5589_v15  ;;  %v2858_v29 = vpop.f32.mrb[32].mxu0  ;;  %v3030_v24 = vpop.f32.mrb[119].mxu1 }
 0x26e   : > { %3361 = vst [vmem:[%s5571_s12 + $0x70] sm:$0xff] %v3265_v42  ;;  %v3275_v23 = vadd.f32 %v5565_v21, %v2858_v29  ;;  %v3268_v59 = vadd.f32 %v5589_v15, %v3030_v24  ;;  %v2860_v51 = vpop.f32.mrb[33].mxu0 }
 0x26f   : > { %3370 = vst [vmem:[%s5571_s12 + $0xb8] sm:$0xff] %v3274_v53  ;;  %v3276_v56 = vadd.f32 %v5567_v38, %v2860_v51  ;;  %v2862_v60 = vpop.f32.mrb[34].mxu0 }
 0x270   : > { %3371 = vst [vmem:[%s5571_s12 + $0xc0] sm:$0xff] %v3275_v23  ;;  %3364 = vst [vmem:[%s5571_s12 + $0x88] sm:$0xff] %v3268_v59  ;;  %v3278_v58 = vadd.f32 %v5565_v21, %v2862_v60  ;;  %v2864_v3 = vpop.f32.mrb[35].mxu0 }
 0x271   : > { %3372 = vst [vmem:[%s5571_s12 + $0xc8] sm:$0xff] %v3276_v56  ;;  %v3279_v35 = vadd.f32 %v5567_v38, %v2864_v3 }
 0x272   : > { %3374 = vst [vmem:[%s5571_s12 + $0xd8] sm:$0xff] %v3278_v58 }
 0x273   : > { %3375 = vst [vmem:[%s5571_s12 + $0xe0] sm:$0xff] %v3279_v35 }
 0x275   : > { %v2868_v0 = vpop.f32.mrb[36].mxu0  ;;  %v4180_v30 = vpop.f32.mrb[120].mxu1 }
 0x276   : > { %v3281_v52 = vadd.f32 %v5565_v21, %v2868_v0  ;;  %v3283_v49 = vadd.f32 %v4180_v30, %v5589_v15  ;;  %v2870_v6 = vpop.f32.mrb[37].mxu0  ;;  %v3043_v8 = vpop.f32.mrb[121].mxu1 }
 0x277   : > { %v3282_v61 = vadd.f32 %v5567_v38, %v2870_v6  ;;  %v3277_v48 = vadd.f32 %v5589_v15, %v3043_v8  ;;  %v2872_v50 = vpop.f32.mrb[38].mxu0  ;;  %v4181_v7 = vpop.f32.mrb[122].mxu1 }
 0x278   : > { %3377 = vst [vmem:[%s5571_s12 + $0xf0] sm:$0xff] %v3281_v52  ;;  %3379 = vst [vmem:[%s5571_s12 + $0x100] sm:$0xff] %v3283_v49  ;;  %v3284_v13 = vadd.f32 %v5565_v21, %v2872_v50  ;;  %v3286_v55 = vadd.f32 %v4181_v7, %v5589_v15  ;;  %v2874_v43 = vpop.f32.mrb[39].mxu0  ;;  %v3046_v46 = vpop.f32.mrb[123].mxu1 }
 0x279   : > { %3378 = vst [vmem:[%s5571_s12 + $0xf8] sm:$0xff] %v3282_v61  ;;  %3373 = vst [vmem:[%s5571_s12 + $0xd0] sm:$0xff] %v3277_v48  ;;  %v3285_v31 = vadd.f32 %v5567_v38, %v2874_v43  ;;  %v3280_v45 = vadd.f32 %v5589_v15, %v3046_v46 }
 0x27a   : > { %3380 = vst [vmem:[%s5571_s12 + $0x108] sm:$0xff] %v3284_v13  ;;  %3382 = vst [vmem:[%s5571_s12 + $0x118] sm:$0xff] %v3286_v55 }
 0x27b   : > { %3381 = vst [vmem:[%s5571_s12 + $0x110] sm:$0xff] %v3285_v31  ;;  %3376 = vst [vmem:[%s5571_s12 + $0xe8] sm:$0xff] %v3280_v45 }
 0x27d   : > { %v2878_v20 = vpop.f32.mrb[40].mxu0 }
 0x27e   : > { %v3287_v17 = vadd.f32 %v5565_v21, %v2878_v20  ;;  %v2880_v37 = vpop.f32.mrb[41].mxu0 }
 0x27f   : > { %v3288_v10 = vadd.f32 %v5567_v38, %v2880_v37  ;;  %v2882_v39 = vpop.f32.mrb[42].mxu0 }
 0x280   : > { %3383 = vst [vmem:[%s5571_s12 + $0x120] sm:$0xff] %v3287_v17  ;;  %v3290_v26 = vadd.f32 %v5565_v21, %v2882_v39  ;;  %v2884_v14 = vpop.f32.mrb[43].mxu0 }
 0x281   : > { %3384 = vst [vmem:[%s5571_s12 + $0x128] sm:$0xff] %v3288_v10  ;;  %v3291_v32 = vadd.f32 %v5567_v38, %v2884_v14 }
 0x282   : > { %3386 = vst [vmem:[%s5571_s12 + $0x138] sm:$0xff] %v3290_v26 }
 0x283   : > { %3387 = vst [vmem:[%s5571_s12 + $0x140] sm:$0xff] %v3291_v32 }
 0x285   : > { %v2888_v33 = vpop.f32.mrb[44].mxu0  ;;  %v4184_v9 = vpop.f32.mrb[124].mxu1 }
 0x286   : > { %v3293_v4 = vadd.f32 %v5565_v21, %v2888_v33  ;;  %v3295_v47 = vadd.f32 %v4184_v9, %v5589_v15  ;;  %v2890_v62 = vpop.f32.mrb[45].mxu0  ;;  %v3059_v41 = vpop.f32.mrb[125].mxu1 }
 0x287   : > { %v3294_v57 = vadd.f32 %v5567_v38, %v2890_v62  ;;  %v3289_v63 = vadd.f32 %v5589_v15, %v3059_v41  ;;  %v2892_v18 = vpop.f32.mrb[46].mxu0  ;;  %v4185_v16 = vpop.f32.mrb[126].mxu1 }
 0x288   : > { %3389 = vst [vmem:[%s5571_s12 + $0x150] sm:$0xff] %v3293_v4  ;;  %3391 = vst [vmem:[%s5571_s12 + $0x160] sm:$0xff] %v3295_v47  ;;  %v3296_v11 = vadd.f32 %v5565_v21, %v2892_v18  ;;  %v3298_v25 = vadd.f32 %v4185_v16, %v5589_v15  ;;  %v2894_v28 = vpop.f32.mrb[47].mxu0  ;;  %v3062_v44 = vpop.f32.mrb[127].mxu1 }
 0x289   : > { %3390 = vst [vmem:[%s5571_s12 + $0x158] sm:$0xff] %v3294_v57  ;;  %3385 = vst [vmem:[%s5571_s12 + $0x130] sm:$0xff] %v3289_v63  ;;  %v3297_v1 = vadd.f32 %v5567_v38, %v2894_v28  ;;  %v3292_v34 = vadd.f32 %v5589_v15, %v3062_v44 }
 0x28a   : > { %3392 = vst [vmem:[%s5571_s12 + $0x168] sm:$0xff] %v3296_v11  ;;  %3394 = vst [vmem:[%s5571_s12 + $0x178] sm:$0xff] %v3298_v25 }
 0x28b   : > { %3393 = vst [vmem:[%s5571_s12 + $0x170] sm:$0xff] %v3297_v1  ;;  %3388 = vst [vmem:[%s5571_s12 + $0x148] sm:$0xff] %v3292_v34 }
 0x28d   : > { %v2898_v5 = vpop.f32.mrb[48].mxu0 }
 0x28e   : > { %v3299_v19 = vadd.f32 %v5565_v21, %v2898_v5  ;;  %v2900_v22 = vpop.f32.mrb[49].mxu0 }
 0x28f   : > { %v3300_v12 = vadd.f32 %v5567_v38, %v2900_v22  ;;  %v2902_v54 = vpop.f32.mrb[50].mxu0 }
 0x290   : > { %3395 = vst [vmem:[%s5571_s12 + $0x180] sm:$0xff] %v3299_v19  ;;  %v3302_v2 = vadd.f32 %v5565_v21, %v2902_v54  ;;  %v2904_v36 = vpop.f32.mrb[51].mxu0 }
 0x291   : > { %3396 = vst [vmem:[%s5571_s12 + $0x188] sm:$0xff] %v3300_v12  ;;  %v3303_v27 = vadd.f32 %v5567_v38, %v2904_v36 }
 0x292   : > { %3398 = vst [vmem:[%s5571_s12 + $0x198] sm:$0xff] %v3302_v2 }
 0x293   : > { %3399 = vst [vmem:[%s5571_s12 + $0x1a0] sm:$0xff] %v3303_v27 }
 0x295   : > { %v2908_v42 = vpop.f32.mrb[52].mxu0  ;;  %v4188_v40 = vpop.f32.mrb[128].mxu1 }
 0x296   : > { %v3305_v53 = vadd.f32 %v5565_v21, %v2908_v42  ;;  %v3307_v29 = vadd.f32 %v4188_v40, %v5589_v15  ;;  %v2910_v24 = vpop.f32.mrb[53].mxu0  ;;  %v3075_v23 = vpop.f32.mrb[129].mxu1 }
 0x297   : > { %v3306_v59 = vadd.f32 %v5567_v38, %v2910_v24  ;;  %v3301_v51 = vadd.f32 %v5589_v15, %v3075_v23  ;;  %v2912_v56 = vpop.f32.mrb[54].mxu0  ;;  %v4189_v60 = vpop.f32.mrb[130].mxu1 }
 0x298   : > { %3401 = vst [vmem:[%s5571_s12 + $0x1b0] sm:$0xff] %v3305_v53  ;;  %3403 = vst [vmem:[%s5571_s12 + $0x1c0] sm:$0xff] %v3307_v29  ;;  %v3308_v58 = vadd.f32 %v5565_v21, %v2912_v56  ;;  %v3310_v3 = vadd.f32 %v4189_v60, %v5589_v15  ;;  %v2914_v35 = vpop.f32.mrb[55].mxu0  ;;  %v3078_v0 = vpop.f32.mrb[131].mxu1 }
 0x299   : > { %3402 = vst [vmem:[%s5571_s12 + $0x1b8] sm:$0xff] %v3306_v59  ;;  %3397 = vst [vmem:[%s5571_s12 + $0x190] sm:$0xff] %v3301_v51  ;;  %v3309_v30 = vadd.f32 %v5567_v38, %v2914_v35  ;;  %v3304_v52 = vadd.f32 %v5589_v15, %v3078_v0 }
 0x29a   : > { %3404 = vst [vmem:[%s5571_s12 + $0x1c8] sm:$0xff] %v3308_v58  ;;  %3406 = vst [vmem:[%s5571_s12 + $0x1d8] sm:$0xff] %v3310_v3 }
 0x29b   : > { %3405 = vst [vmem:[%s5571_s12 + $0x1d0] sm:$0xff] %v3309_v30  ;;  %3400 = vst [vmem:[%s5571_s12 + $0x1a8] sm:$0xff] %v3304_v52 }
 0x29d   : > { %v2918_v49 = vpop.f32.mrb[56].mxu0 }
 0x29e   : > { %v3311_v6 = vadd.f32 %v5565_v21, %v2918_v49  ;;  %v2920_v8 = vpop.f32.mrb[57].mxu0 }
 0x29f   : > { %v3312_v61 = vadd.f32 %v5567_v38, %v2920_v8  ;;  %v2922_v48 = vpop.f32.mrb[58].mxu0 }
 0x2a0   : > { %3407 = vst [vmem:[%s5571_s12 + $0x1e0] sm:$0xff] %v3311_v6  ;;  %v3314_v50 = vadd.f32 %v5565_v21, %v2922_v48  ;;  %v2924_v7 = vpop.f32.mrb[59].mxu0 }
 0x2a1   : > { %3408 = vst [vmem:[%s5571_s12 + $0x1e8] sm:$0xff] %v3312_v61  ;;  %v3315_v13 = vadd.f32 %v5567_v38, %v2924_v7 }
 0x2a2   : > { %3410 = vst [vmem:[%s5571_s12 + $0x1f8] sm:$0xff] %v3314_v50 }
 0x2a3   : > { %3411 = vst [vmem:[%s5571_s12 + $0x200] sm:$0xff] %v3315_v13 }
 0x2a5   : > { %v2928_v55 = vpop.f32.mrb[60].mxu0  ;;  %v4192_v43 = vpop.f32.mrb[132].mxu1 }
 0x2a6   : > { %v3317_v46 = vadd.f32 %v5565_v21, %v2928_v55  ;;  %v3319_v31 = vadd.f32 %v4192_v43, %v5589_v15  ;;  %v2930_v45 = vpop.f32.mrb[61].mxu0  ;;  %v3091_v20 = vpop.f32.mrb[133].mxu1 }
 0x2a7   : > { %v3318_v17 = vadd.f32 %v5567_v38, %v2930_v45  ;;  %v3313_v37 = vadd.f32 %v5589_v15, %v3091_v20  ;;  %v2932_v10 = vpop.f32.mrb[62].mxu0  ;;  %v4193_v39 = vpop.f32.mrb[134].mxu1 }
 0x2a8   : > { %3413 = vst [vmem:[%s5571_s12 + $0x210] sm:$0xff] %v3317_v46  ;;  %3415 = vst [vmem:[%s5571_s12 + $0x220] sm:$0xff] %v3319_v31  ;;  %v3320_v26 = vadd.f32 %v5565_v21, %v2932_v10  ;;  %v3322_v14 = vadd.f32 %v4193_v39, %v5589_v15  ;;  %v2934_v32 = vpop.f32.mrb[63].mxu0  ;;  %v3094_v33 = vpop.f32.mrb[135].mxu1 }
 0x2a9   : > { %3414 = vst [vmem:[%s5571_s12 + $0x218] sm:$0xff] %v3318_v17  ;;  %3409 = vst [vmem:[%s5571_s12 + $0x1f0] sm:$0xff] %v3313_v37  ;;  %v3321_v9 = vadd.f32 %v5567_v38, %v2934_v32  ;;  %v3316_v4 = vadd.f32 %v5589_v15, %v3094_v33 }
 0x2aa   : > { %3416 = vst [vmem:[%s5571_s12 + $0x228] sm:$0xff] %v3320_v26  ;;  %3418 = vst [vmem:[%s5571_s12 + $0x238] sm:$0xff] %v3322_v14 }
 0x2ab   : > { %3417 = vst [vmem:[%s5571_s12 + $0x230] sm:$0xff] %v3321_v9  ;;  %3412 = vst [vmem:[%s5571_s12 + $0x208] sm:$0xff] %v3316_v4 }
 0x2ad   : > { %v2938_v47 = vpop.f32.mrb[64].mxu0 }
 0x2ae   : > { %v3323_v62 = vadd.f32 %v5565_v21, %v2938_v47  ;;  %v2940_v41 = vpop.f32.mrb[65].mxu0 }
 0x2af   : > { %v3324_v57 = vadd.f32 %v5567_v38, %v2940_v41  ;;  %v2942_v63 = vpop.f32.mrb[66].mxu0 }
 0x2b0   : > { %3419 = vst [vmem:[%s5571_s12 + $0x240] sm:$0xff] %v3323_v62  ;;  %v3326_v18 = vadd.f32 %v5565_v21, %v2942_v63  ;;  %v2944_v16 = vpop.f32.mrb[67].mxu0 }
 0x2b1   : > { %3420 = vst [vmem:[%s5571_s12 + $0x248] sm:$0xff] %v3324_v57  ;;  %v3327_v11 = vadd.f32 %v5567_v38, %v2944_v16 }
 0x2b2   : > { %3422 = vst [vmem:[%s5571_s12 + $0x258] sm:$0xff] %v3326_v18 }
 0x2b3   : > { %3423 = vst [vmem:[%s5571_s12 + $0x260] sm:$0xff] %v3327_v11 }
 0x2b5   : > { %v2948_v25 = vpop.f32.mrb[68].mxu0  ;;  %v4196_v28 = vpop.f32.mrb[136].mxu1 }
 0x2b6   : > { %v3329_v44 = vadd.f32 %v5565_v21, %v2948_v25  ;;  %v3331_v1 = vadd.f32 %v4196_v28, %v5589_v15  ;;  %v2950_v34 = vpop.f32.mrb[69].mxu0  ;;  %v3107_v5 = vpop.f32.mrb[137].mxu1 }
 0x2b7   : > { %v3330_v19 = vadd.f32 %v5567_v38, %v2950_v34  ;;  %v3325_v22 = vadd.f32 %v5589_v15, %v3107_v5  ;;  %v2952_v12 = vpop.f32.mrb[70].mxu0  ;;  %v4197_v54 = vpop.f32.mrb[138].mxu1 }
 0x2b8   : > { %3425 = vst [vmem:[%s5571_s12 + $0x270] sm:$0xff] %v3329_v44  ;;  %3427 = vst [vmem:[%s5571_s12 + $0x280] sm:$0xff] %v3331_v1  ;;  %v3332_v2 = vadd.f32 %v5565_v21, %v2952_v12  ;;  %v3334_v36 = vadd.f32 %v4197_v54, %v5589_v15  ;;  %v2954_v27 = vpop.f32.mrb[71].mxu0  ;;  %v3110_v42 = vpop.f32.mrb[139].mxu1 }
 0x2b9   : > { %3426 = vst [vmem:[%s5571_s12 + $0x278] sm:$0xff] %v3330_v19  ;;  %3421 = vst [vmem:[%s5571_s12 + $0x250] sm:$0xff] %v3325_v22  ;;  %v3333_v40 = vadd.f32 %v5567_v38, %v2954_v27  ;;  %v3328_v53 = vadd.f32 %v5589_v15, %v3110_v42 }
 0x2ba   : > { %3428 = vst [vmem:[%s5571_s12 + $0x288] sm:$0xff] %v3332_v2  ;;  %3430 = vst [vmem:[%s5571_s12 + $0x298] sm:$0xff] %v3334_v36 }
 0x2bb   : > { %3429 = vst [vmem:[%s5571_s12 + $0x290] sm:$0xff] %v3333_v40  ;;  %3424 = vst [vmem:[%s5571_s12 + $0x268] sm:$0xff] %v3328_v53 }
 0x2bd   : > { %v2958_v29 = vpop.f32.mrb[72].mxu0 }
 0x2be   : > { %v3335_v24 = vadd.f32 %v5565_v21, %v2958_v29  ;;  %v2960_v23 = vpop.f32.mrb[73].mxu0 }
 0x2bf   : > { %v3336_v59 = vadd.f32 %v5567_v38, %v2960_v23  ;;  %v2962_v51 = vpop.f32.mrb[74].mxu0 }
 0x2c0   : > { %3431 = vst [vmem:[%s5571_s12 + $0x2a0] sm:$0xff] %v3335_v24  ;;  %v3338_v56 = vadd.f32 %v5565_v21, %v2962_v51  ;;  %v2964_v60 = vpop.f32.mrb[75].mxu0 }
 0x2c1   : > { %3432 = vst [vmem:[%s5571_s12 + $0x2a8] sm:$0xff] %v3336_v59  ;;  %v3339_v58 = vadd.f32 %v5567_v38, %v2964_v60 }
 0x2c2   : > { %3434 = vst [vmem:[%s5571_s12 + $0x2b8] sm:$0xff] %v3338_v56 }
 0x2c3   : > { %3435 = vst [vmem:[%s5571_s12 + $0x2c0] sm:$0xff] %v3339_v58 }
 0x2c5   : > { %v2968_v3 = vpop.f32.mrb[76].mxu0  ;;  %v4200_v35 = vpop.f32.mrb[140].mxu1 }
 0x2c6   : > { %v3341_v0 = vadd.f32 %v5565_v21, %v2968_v3  ;;  %v3343_v30 = vadd.f32 %v4200_v35, %v5589_v15  ;;  %v2970_v52 = vpop.f32.mrb[77].mxu0  ;;  %v3123_v49 = vpop.f32.mrb[141].mxu1 }
 0x2c7   : > { %v3342_v6 = vadd.f32 %v5567_v38, %v2970_v52  ;;  %v3337_v8 = vadd.f32 %v5589_v15, %v3123_v49  ;;  %v2972_v61 = vpop.f32.mrb[78].mxu0  ;;  %v4201_v48 = vpop.f32.mrb[142].mxu1 }
 0x2c8   : > { %3437 = vst [vmem:[%s5571_s12 + $0x2d0] sm:$0xff] %v3341_v0  ;;  %3439 = vst [vmem:[%s5571_s12 + $0x2e0] sm:$0xff] %v3343_v30  ;;  %v3344_v50 = vadd.f32 %v5565_v21, %v2972_v61  ;;  %v3346_v7 = vadd.f32 %v4201_v48, %v5589_v15  ;;  %v2974_v13 = vpop.f32.mrb[79].mxu0  ;;  %v3126_v55 = vpop.f32.mrb[143].mxu1 }
 0x2c9   : > { %3438 = vst [vmem:[%s5571_s12 + $0x2d8] sm:$0xff] %v3342_v6  ;;  %3433 = vst [vmem:[%s5571_s12 + $0x2b0] sm:$0xff] %v3337_v8  ;;  %v3345_v43 = vadd.f32 %v5567_v38, %v2974_v13  ;;  %v3340_v21 = vadd.f32 %v5589_v15, %v3126_v55 }
 0x2ca   : > { %3440 = vst [vmem:[%s5571_s12 + $0x2e8] sm:$0xff] %v3344_v50  ;;  %3442 = vst [vmem:[%s5571_s12 + $0x2f8] sm:$0xff] %v3346_v7 }
 0x2cb   : > { %3441 = vst [vmem:[%s5571_s12 + $0x2f0] sm:$0xff] %v3345_v43  ;;  %3436 = vst [vmem:[%s5571_s12 + $0x2c8] sm:$0xff] %v3340_v21 }
 0x2cc   : > { %4672 = shalt.err (!%p4669_p5)
}
 0x2cd   : > { %s4673_s22 = scalar_lea.hbm %s5762_s21, 12288  ;;  %s4677_s14 = scalar_lea.hbm %s5830_s8, 24576 }
 0x2ce   : > { %p4674_p6 = scmp.ne.s32.totalorder %s5762_s21, %s4673_s22  ;;  %p4678_p10 = scmp.lt.u32.totalorder %s5762_s21, %s5830_s8 }
 0x2cf   : > { %p4679_p11 = scmp.lt.u32.totalorder %s4677_s14, %s4673_s22  ;;  %p4681_p13 = scmp.lt.u32.totalorder %s4673_s22, %s5762_s21 }
 0x2d0   : > { %p4675_p7 = pnand %p4674_p6, %p4829_p4 }
 0x2d1   : > { %p4680_p12 = por %p4679_p11, %p4678_p10 }
 0x2d2   : > { %p4676_p9 = pneg %p4675_p7 }
 0x2d3   : > { %p4682_p0 = por %p4681_p13, %p4680_p12 }
 0x2d5   : > { %p4683_p1 = pnand %p4682_p0, %p4676_p9 }
 0x2d7   : > { %4686 = shalt.err (!%p4683_p1)
}
 0x2d8   : > { %s4742_s16 = smov 384   ;;  %s4743_s25 = smov 24  }
 0x2d9   : > { %4412 = dma.vmem_to_hbm [thread:$0]  (%p4829_p4), %s5764_s19, 12288, %s5762_s21, %s5776_s23, %s4742_s16, %s4742_s16, %s4743_s25  }
 0x2da PF: > { %p4418_p2 = scmp.ge.s32.totalorder %s4737_s10, 2  ;;  %s3473_s24 = sand.u32 1, %s4717_s27  }
 0x2db   : > { %s3474_s26 = scalar_lea.sflag [#allocation4], %s3473_s24 }
 0x2dc   : > { %p4415_p3 = pnand %p4418_p2, %p4836_p8 }
 0x2de   : > { %4712 = dma.done.wait (!%p4415_p3), %s3474_s26, 12288  }
 0x2df   : > { %4714 = vsyncadd (!%p4415_p3), %s3474_s26, 4294955008  ;;  %s21_s10 = sadd.s32 1, %s4737_s10   ;;  %s5836_s27 = smov %s4721_s28 }
 0x2e0   : > { %p18_p5 = scmp.ge.s32.totalorder %s21_s10, 4   ;;  %s5837_s28 = smov %s4725_s29 }
 0x2e1   : > { %s5838_s29 = smov %s4842_s18  ;;  %s5839_s30 = smov %s4733_s9 }
 0x2e2   : > { %s5840_s9 = smov %s5842_s13  ;;  %20 = sbr.rel (!%p18_p5) target bundleno = 4 (0x4), region = 104 }
 0x2e9   :  { %3479 = vsyncpa [#allocation4], 1 }
 0x2ea   :  { %3481 = vsyncpa [#allocation4 + $0x1], 1 }

</bundles_post_ra>
